<compile_context>
chip_gen: v6e
topology: v6e:2x2x1
jax: 0.10.0
libtpu: 0.0.40
codegen_flags: <defaults>
</compile_context>

<pallas_src>
import functools

import numpy as np
import jax
import jax.numpy as jnp
from jax import lax
from jax.experimental import pallas as pl
from jax.experimental.pallas import tpu as pltpu


def _round_up(x, m):
    return (x + m - 1) // m * m


# ----------------------------- fused Pallas kernel ----------------------------
def _decoder_kernel(*refs, n_batch, neg_slope):
    """Whole decoder in one kernel.

    refs = (x_ref, L1, S1, B1, L2, S2, B2, L3, S3, B3, L4, S4, B4, o_ref, act_ref)
      x_ref   : (N*Cin0*H0, W0)        rows ordered (n, ci, ih), lanes = iw
      L_l     : (3, Rpad_l, Rinpad_l)  per-kw left matrices (BN scale folded, rows padded to 8)
      S_l     : (Wrows_l, 3*128)       horizontally-stacked 0/1 W-scatter blocks (128-lane padded)
      B_l     : (Rpad_l, 128)          pre-broadcast conv+BN bias tiles (zero in pad rows/lanes)
      o_ref   : (N*Rpad_last, 128)     lane-dense output
      act_ref : (N*max_Rpad, 128)      VMEM scratch holding inter-layer activations
    """
    x_ref = refs[0]
    o_ref = refs[-2]
    act_ref = refs[-1]
    n_layers = (len(refs) - 3) // 3

    x_all = x_ref[...]                                    # (N*Rin0, W0)
    for li in range(n_layers):
        l_ref = refs[1 + 3 * li]
        s_ref = refs[2 + 3 * li]
        b_ref = refs[3 + 3 * li]
        kwn, r_pad, rin_pad = l_ref.shape
        wp = s_ref.shape[0]
        blk = s_ref.shape[1] // kwn                       # 128
        last = li == n_layers - 1

        # ---- stage 1: W-scatter, one dot batched over the whole batch ----
        x_w = x_all if x_all.shape[1] == wp else x_all[:, :wp]
        u_all = jnp.dot(x_w, s_ref[...], preferred_element_type=jnp.float32)

        # ---- stage 2: channel mix + H-scatter (+ bias, LeakyReLU), per batch ----
        l_kw = [l_ref[kw] for kw in range(kwn)]           # hoisted static-index loads
        bias = b_ref[...]
        for nb in range(n_batch):                         # unrolled (small batch)
            acc = None
            for kw in range(kwn):
                u_blk = u_all[nb * rin_pad:(nb + 1) * rin_pad,
                              kw * blk:(kw + 1) * blk]    # 8-/128-aligned static slice
                t = jnp.dot(l_kw[kw], u_blk, preferred_element_type=jnp.float32)
                acc = t if acc is None else acc + t
            acc = acc + bias                              # folded conv + BN(eval) bias
            if last:
                o_ref[pl.ds(nb * r_pad, r_pad), :] = acc  # lane-dense 128-wide store
            else:
                acc = jnp.maximum(acc, neg_slope * acc)   # LeakyReLU (mul + max)
                act_ref[pl.ds(nb * r_pad, r_pad), :] = acc
        if not last:
            x_all = act_ref[pl.ds(0, n_batch * r_pad), :]


# ------------------------ constant construction (init time) -------------------
def _build_fused_consts(w, scale, bias_eff, H, W, pH, pW, opH, opW, rin_pad, w_rows,
                        lane_pad=128):
    """Build L_kw (channel-mix x H-scatter, BN folded, row-padded), stacked S_h and bias tile."""
    Cin, Cout, kH, kW = w.shape
    H_out = (H - 1) * 2 - 2 * pH + kH + opH
    W_out = (W - 1) * 2 - 2 * pW + kW + opW
    assert W_out <= lane_pad and Cin * H <= rin_pad
    w_eff = np.asarray(w, np.float32) * np.asarray(scale, np.float32)[None, :, None, None]

    R = Cout * H_out
    R_pad = _round_up(R, 8)
    L = np.zeros((kW, R_pad, rin_pad), np.float32)
    for kw in range(kW):
        for kh in range(kH):
            for ih in range(H):
                oh = 2 * ih - pH + kh
                if 0 <= oh < H_out:
                    rows = np.arange(Cout) * H_out + oh
                    cols = np.arange(Cin) * H + ih
                    L[kw][np.ix_(rows, cols)] += w_eff[:, :, kh, kw].T   # (Cout, Cin)

    S = np.zeros((w_rows, kW * lane_pad), np.float32)     # [S_0 | S_1 | S_2], 128-lane blocks
    for kw in range(kW):
        for iw in range(W):
            ow = 2 * iw - pW + kw
            if 0 <= ow < W_out:
                S[iw, kw * lane_pad + ow] = 1.0

    B = np.zeros((R_pad, lane_pad), np.float32)           # pre-broadcast bias tile
    b = np.asarray(bias_eff, np.float32)
    for co in range(Cout):
        B[co * H_out:(co + 1) * H_out, :W_out] = b[co]

    return L, S, B, H_out, W_out, R_pad


def init_params(key, num_filters):
    """Deterministic synthetic parameters (ConvTranspose2d + eval-mode BatchNorm)."""
    F = num_filters
    specs = [
        dict(cin=F,      cout=F // 2, padding=(0, 1), output_padding=(0, 0), bn=True),
        dict(cin=F // 2, cout=F // 2, padding=(1, 0), output_padding=(0, 0), bn=True),
        dict(cin=F // 2, cout=F // 4, padding=(1, 0), output_padding=(1, 0), bn=True),
        dict(cin=F // 4, cout=2,      padding=(1, 0), output_padding=(1, 1), bn=False),
    ]
    layers = []
    h, w = 5, 6
    rin_pad = F * 5                     # exact per-batch row count of the kernel input
    first = True
    for spec in specs:
        key, kw_, kb_, kg, kbe, km, kv = jax.random.split(key, 7)
        wgt = 0.2 * jax.random.normal(kw_, (spec["cin"], spec["cout"], 3, 3), jnp.float32)
        conv_b = 0.1 * jax.random.normal(kb_, (spec["cout"],), jnp.float32)
        if spec["bn"]:
            gamma = 1.0 + 0.1 * jax.random.normal(kg, (spec["cout"],), jnp.float32)
            beta = 0.1 * jax.random.normal(kbe, (spec["cout"],), jnp.float32)
            rmean = 0.1 * jax.random.normal(km, (spec["cout"],), jnp.float32)
            rvar = 0.5 + jnp.abs(jax.random.normal(kv, (spec["cout"],), jnp.float32))
            inv = gamma / jnp.sqrt(rvar + 1e-5)
            scale = inv
            bias = beta + (conv_b - rmean) * inv            # fold conv bias + BN(eval)
        else:
            scale = jnp.ones((spec["cout"],), jnp.float32)
            bias = conv_b
        w_rows = w if first else _round_up(w, 8)            # stage-1 contraction rows
        L, S, B, h_out, w_out, r_pad = _build_fused_consts(
            np.asarray(wgt), np.asarray(scale), np.asarray(bias),
            h, w, spec["padding"][0], spec["padding"][1],
            spec["output_padding"][0], spec["output_padding"][1],
            rin_pad, w_rows)
        layers.append(dict(
            # raw params (for the pure-JAX reference)
            w=wgt, scale=scale, bias=bias,
            padding=spec["padding"], output_padding=spec["output_padding"],
            apply_act=spec["bn"], cout=spec["cout"], h_out=h_out, w_out=w_out,
            # fused kernel constants
            L=jnp.asarray(L), S=jnp.asarray(S), B=jnp.asarray(B)))
        h, w = h_out, w_out
        rin_pad = r_pad
        first = False
    return layers


# ------------------------------- Decoder forward ------------------------------
@functools.partial(jax.jit, static_argnums=(2, 3, 4))
def _decoder_forward_jit(code, consts, num_filters, out_channels, out_hw):
    n = code.shape[0]
    # (N, F*5*6) -> (N*F*5, 6): rows (n, ci, ih), lanes iw -- free row-major reshape.
    x0 = code.reshape(n * num_filters * 5, 6)
    flat = (x0,) + consts

    n_layers = len(consts) // 3
    kwn = consts[0].shape[0]
    lane_pad = consts[1].shape[1] // kwn                    # 128
    r_pads = [consts[3 * l].shape[1] for l in range(n_layers)]
    r_pad_last = r_pads[-1]
    inter_rows = n * max(r_pads[:-1])
    h_out, w_out = out_hw

    flops = 0
    for l in range(n_layers):
        L, S = consts[3 * l], consts[3 * l + 1]
        _, r_pad, rin_pad = L.shape
        flops += 2 * (n * rin_pad) * S.shape[0] * S.shape[1]          # stage 1 (batched)
        flops += n * kwn * 2 * r_pad * rin_pad * lane_pad             # stage 2
    bytes_accessed = sum(int(a.size) * a.dtype.itemsize for a in flat)
    bytes_accessed += n * r_pad_last * lane_pad * 4

    kernel = functools.partial(_decoder_kernel, n_batch=n, neg_slope=0.01)
    out = pl.pallas_call(
        kernel,
        out_shape=jax.ShapeDtypeStruct((n * r_pad_last, lane_pad), jnp.float32),
        in_specs=[pl.BlockSpec(memory_space=pltpu.MemorySpace.VMEM)] * len(flat),
        out_specs=pl.BlockSpec(memory_space=pltpu.MemorySpace.VMEM),
        scratch_shapes=[pltpu.VMEM((inter_rows, lane_pad), jnp.float32)],
        compiler_params=pltpu.CompilerParams(vmem_limit_bytes=8 * 1024 * 1024),
        cost_estimate=pl.CostEstimate(flops=int(flops), transcendentals=0,
                                      bytes_accessed=int(bytes_accessed)),
    )(*flat)
    # rows are (n, co, oh) row-major; strip row padding and the 128-lane padding.
    out = out.reshape(n, r_pad_last, lane_pad)[:, :out_channels * h_out, :w_out]
    return out.reshape(n, out_channels, h_out, w_out)


def decoder_forward(code, layers, num_filters):
    consts = []
    for layer in layers:
        consts += [layer["L"], layer["S"], layer["B"]]
    out_hw = (int(layers[-1]["h_out"]), int(layers[-1]["w_out"]))
    # TODO(synk): training-mode Dropout / batch-statistics BatchNorm are not implemented
    #             (eval-mode forward only).
    return _decoder_forward_jit(code, tuple(consts), num_filters,
                                int(layers[-1]["cout"]), out_hw)


def decoder_forward_ref(code, layers, num_filters):
    """Pure-JAX reference (lax.conv_general_dilated) for correctness checking."""
    x = code.reshape(-1, num_filters, 5, 6)
    for layer in layers:
        w = layer["w"]
        kH, kW = w.shape[2], w.shape[3]
        pH, pW = layer["padding"]
        opH, opW = layer["output_padding"]
        wr = jnp.flip(w, axis=(2, 3)).transpose(1, 0, 2, 3)  # (Cout, Cin, kH, kW)
        y = lax.conv_general_dilated(
            x, wr, window_strides=(1, 1),
            padding=[(kH - 1 - pH, kH - 1 - pH + opH),
                     (kW - 1 - pW, kW - 1 - pW + opW)],
            lhs_dilation=(2, 2),
            dimension_numbers=("NCHW", "OIHW", "NCHW"))
        y = y * layer["scale"][None, :, None, None] + layer["bias"][None, :, None, None]
        if layer["apply_act"]:
            y = jnp.where(y >= 0, y, 0.01 * y)
        x = y
    return x


if __name__ == "__main__":
    NUM_FILTERS = 8          # conf.IMITATION_NUM_FILTERS_ENCODER (small, divisible by 4)
    BATCH = 2

    key = jax.random.PRNGKey(0)
    kparam, kcode = jax.random.split(key)
    layers = init_params(kparam, NUM_FILTERS)
    code = jax.random.normal(kcode, (BATCH, NUM_FILTERS * 5 * 6), jnp.float32)

    out = decoder_forward(code, layers, NUM_FILTERS)
    out = jax.block_until_ready(out)

    assert out.shape == (BATCH, 2, 84, 96), out.shape
    ref = decoder_forward_ref(code, layers, NUM_FILTERS)
    max_err = float(jnp.max(jnp.abs(out - ref)))
    assert max_err < 1e-3, f"mismatch vs reference: {max_err}"

    print("KERNEL_OK")
</pallas_src>

<mosaic_0001>
module attributes {stable_mosaic.version = 11 : i64} {
  func.func @_decoder_kernel(%arg0: memref<80x6xf32, #tpu.memory_space<vmem>>, %arg1: memref<3x48x40xf32, #tpu.memory_space<vmem>>, %arg2: memref<6x384xf32, #tpu.memory_space<vmem>>, %arg3: memref<48x128xf32, #tpu.memory_space<vmem>>, %arg4: memref<3x88x48xf32, #tpu.memory_space<vmem>>, %arg5: memref<16x384xf32, #tpu.memory_space<vmem>>, %arg6: memref<88x128xf32, #tpu.memory_space<vmem>>, %arg7: memref<3x88x88xf32, #tpu.memory_space<vmem>>, %arg8: memref<24x384xf32, #tpu.memory_space<vmem>>, %arg9: memref<88x128xf32, #tpu.memory_space<vmem>>, %arg10: memref<3x168x88xf32, #tpu.memory_space<vmem>>, %arg11: memref<48x384xf32, #tpu.memory_space<vmem>>, %arg12: memref<168x128xf32, #tpu.memory_space<vmem>>, %arg13: memref<336x128xf32, #tpu.memory_space<vmem>>, %arg14: memref<176x128xf32, #tpu.memory_space<vmem>>) attributes {dimension_semantics = [], scalar_prefetch = 0 : i64, scratch_operands = 1 : i64, tpu.core_type = #tpu.core_type<tc>} {
    %c0 = arith.constant 0 : index
    %c0_0 = arith.constant 0 : index
    %0 = vector.load %arg0[%c0, %c0_0] : memref<80x6xf32, #tpu.memory_space<vmem>>, vector<80x6xf32>
    %c0_1 = arith.constant 0 : index
    %c0_2 = arith.constant 0 : index
    %1 = vector.load %arg2[%c0_1, %c0_2] : memref<6x384xf32, #tpu.memory_space<vmem>>, vector<6x384xf32>
    %cst = arith.constant dense<0.000000e+00> : vector<80x384xf32>
    %2 = tpu.matmul %0, %1, %cst {dimension_numbers = #tpu.dot_dimension_numbers<[1], [0], [0], [1], [0, 0, 1, 1], [], []>} : vector<80x6xf32>, vector<6x384xf32>, vector<80x384xf32> -> vector<80x384xf32>
    %c0_3 = arith.constant 0 : index
    %c0_4 = arith.constant 0 : index
    %c0_5 = arith.constant 0 : index
    %3 = vector.load %arg1[%c0_3, %c0_4, %c0_5] : memref<3x48x40xf32, #tpu.memory_space<vmem>>, vector<1x48x40xf32>
    %4 = vector.shape_cast %3 : vector<1x48x40xf32> to vector<48x40xf32>
    %c1 = arith.constant 1 : index
    %c0_6 = arith.constant 0 : index
    %c0_7 = arith.constant 0 : index
    %5 = vector.load %arg1[%c1, %c0_6, %c0_7] : memref<3x48x40xf32, #tpu.memory_space<vmem>>, vector<1x48x40xf32>
    %6 = vector.shape_cast %5 : vector<1x48x40xf32> to vector<48x40xf32>
    %c2 = arith.constant 2 : index
    %c0_8 = arith.constant 0 : index
    %c0_9 = arith.constant 0 : index
    %7 = vector.load %arg1[%c2, %c0_8, %c0_9] : memref<3x48x40xf32, #tpu.memory_space<vmem>>, vector<1x48x40xf32>
    %8 = vector.shape_cast %7 : vector<1x48x40xf32> to vector<48x40xf32>
    %c0_10 = arith.constant 0 : index
    %c0_11 = arith.constant 0 : index
    %9 = vector.load %arg3[%c0_10, %c0_11] : memref<48x128xf32, #tpu.memory_space<vmem>>, vector<48x128xf32>
    %10 = vector.extract_strided_slice %2 {offsets = [0, 0], sizes = [40, 128], strides = [1, 1]} : vector<80x384xf32> to vector<40x128xf32>
    %cst_12 = arith.constant dense<0.000000e+00> : vector<48x128xf32>
    %11 = tpu.matmul %4, %10, %cst_12 {dimension_numbers = #tpu.dot_dimension_numbers<[1], [0], [0], [1], [0, 0, 1, 1], [], []>} : vector<48x40xf32>, vector<40x128xf32>, vector<48x128xf32> -> vector<48x128xf32>
    %12 = vector.extract_strided_slice %2 {offsets = [0, 128], sizes = [40, 128], strides = [1, 1]} : vector<80x384xf32> to vector<40x128xf32>
    %cst_13 = arith.constant dense<0.000000e+00> : vector<48x128xf32>
    %13 = tpu.matmul %6, %12, %cst_13 {dimension_numbers = #tpu.dot_dimension_numbers<[1], [0], [0], [1], [0, 0, 1, 1], [], []>} : vector<48x40xf32>, vector<40x128xf32>, vector<48x128xf32> -> vector<48x128xf32>
    %14 = arith.addf %11, %13 : vector<48x128xf32>
    %15 = vector.extract_strided_slice %2 {offsets = [0, 256], sizes = [40, 128], strides = [1, 1]} : vector<80x384xf32> to vector<40x128xf32>
    %cst_14 = arith.constant dense<0.000000e+00> : vector<48x128xf32>
    %16 = tpu.matmul %8, %15, %cst_14 {dimension_numbers = #tpu.dot_dimension_numbers<[1], [0], [0], [1], [0, 0, 1, 1], [], []>} : vector<48x40xf32>, vector<40x128xf32>, vector<48x128xf32> -> vector<48x128xf32>
    %17 = arith.addf %14, %16 : vector<48x128xf32>
    %18 = arith.addf %17, %9 : vector<48x128xf32>
    %cst_15 = arith.constant 0.00999999977 : f32
    %19 = vector.broadcast %cst_15 : f32 to vector<48x128xf32>
    %20 = arith.mulf %19, %18 : vector<48x128xf32>
    %21 = arith.maximumf %18, %20 : vector<48x128xf32>
    %c0_16 = arith.constant 0 : index
    %c0_17 = arith.constant 0 : index
    %22 = vector.load %arg14[%c0_16, %c0_17] : memref<176x128xf32, #tpu.memory_space<vmem>>, vector<48x128xf32>
    tpu.vector_store %arg14[%c0_16, %c0_17], %21 {strides = array<i32>} : memref<176x128xf32, #tpu.memory_space<vmem>>, vector<48x128xf32>,
    %23 = vector.extract_strided_slice %2 {offsets = [40, 0], sizes = [40, 128], strides = [1, 1]} : vector<80x384xf32> to vector<40x128xf32>
    %cst_18 = arith.constant dense<0.000000e+00> : vector<48x128xf32>
    %24 = tpu.matmul %4, %23, %cst_18 {dimension_numbers = #tpu.dot_dimension_numbers<[1], [0], [0], [1], [0, 0, 1, 1], [], []>} : vector<48x40xf32>, vector<40x128xf32>, vector<48x128xf32> -> vector<48x128xf32>
    %25 = vector.extract_strided_slice %2 {offsets = [40, 128], sizes = [40, 128], strides = [1, 1]} : vector<80x384xf32> to vector<40x128xf32>
    %cst_19 = arith.constant dense<0.000000e+00> : vector<48x128xf32>
    %26 = tpu.matmul %6, %25, %cst_19 {dimension_numbers = #tpu.dot_dimension_numbers<[1], [0], [0], [1], [0, 0, 1, 1], [], []>} : vector<48x40xf32>, vector<40x128xf32>, vector<48x128xf32> -> vector<48x128xf32>
    %27 = arith.addf %24, %26 : vector<48x128xf32>
    %28 = vector.extract_strided_slice %2 {offsets = [40, 256], sizes = [40, 128], strides = [1, 1]} : vector<80x384xf32> to vector<40x128xf32>
    %cst_20 = arith.constant dense<0.000000e+00> : vector<48x128xf32>
    %29 = tpu.matmul %8, %28, %cst_20 {dimension_numbers = #tpu.dot_dimension_numbers<[1], [0], [0], [1], [0, 0, 1, 1], [], []>} : vector<48x40xf32>, vector<40x128xf32>, vector<48x128xf32> -> vector<48x128xf32>
    %30 = arith.addf %27, %29 : vector<48x128xf32>
    %31 = arith.addf %30, %9 : vector<48x128xf32>
    %cst_21 = arith.constant 0.00999999977 : f32
    %32 = vector.broadcast %cst_21 : f32 to vector<48x128xf32>
    %33 = arith.mulf %32, %31 : vector<48x128xf32>
    %34 = arith.maximumf %31, %33 : vector<48x128xf32>
    %c48 = arith.constant 48 : index
    %c0_22 = arith.constant 0 : index
    %35 = vector.load %arg14[%c48, %c0_22] : memref<176x128xf32, #tpu.memory_space<vmem>>, vector<48x128xf32>
    tpu.vector_store %arg14[%c48, %c0_22], %34 {strides = array<i32>} : memref<176x128xf32, #tpu.memory_space<vmem>>, vector<48x128xf32>,
    %c0_23 = arith.constant 0 : index
    %c0_24 = arith.constant 0 : index
    %36 = vector.load %arg14[%c0_23, %c0_24] : memref<176x128xf32, #tpu.memory_space<vmem>>, vector<96x128xf32>
    %37 = vector.extract_strided_slice %36 {offsets = [0, 0], sizes = [96, 16], strides = [1, 1]} : vector<96x128xf32> to vector<96x16xf32>
    %c0_25 = arith.constant 0 : index
    %c0_26 = arith.constant 0 : index
    %38 = vector.load %arg5[%c0_25, %c0_26] : memref<16x384xf32, #tpu.memory_space<vmem>>, vector<16x384xf32>
    %cst_27 = arith.constant dense<0.000000e+00> : vector<96x384xf32>
    %39 = tpu.matmul %37, %38, %cst_27 {dimension_numbers = #tpu.dot_dimension_numbers<[1], [0], [0], [1], [0, 0, 1, 1], [], []>} : vector<96x16xf32>, vector<16x384xf32>, vector<96x384xf32> -> vector<96x384xf32>
    %c0_28 = arith.constant 0 : index
    %c0_29 = arith.constant 0 : index
    %c0_30 = arith.constant 0 : index
    %40 = vector.load %arg4[%c0_28, %c0_29, %c0_30] : memref<3x88x48xf32, #tpu.memory_space<vmem>>, vector<1x88x48xf32>
    %41 = vector.shape_cast %40 : vector<1x88x48xf32> to vector<88x48xf32>
    %c1_31 = arith.constant 1 : index
    %c0_32 = arith.constant 0 : index
    %c0_33 = arith.constant 0 : index
    %42 = vector.load %arg4[%c1_31, %c0_32, %c0_33] : memref<3x88x48xf32, #tpu.memory_space<vmem>>, vector<1x88x48xf32>
    %43 = vector.shape_cast %42 : vector<1x88x48xf32> to vector<88x48xf32>
    %c2_34 = arith.constant 2 : index
    %c0_35 = arith.constant 0 : index
    %c0_36 = arith.constant 0 : index
    %44 = vector.load %arg4[%c2_34, %c0_35, %c0_36] : memref<3x88x48xf32, #tpu.memory_space<vmem>>, vector<1x88x48xf32>
    %45 = vector.shape_cast %44 : vector<1x88x48xf32> to vector<88x48xf32>
    %c0_37 = arith.constant 0 : index
    %c0_38 = arith.constant 0 : index
    %46 = vector.load %arg6[%c0_37, %c0_38] : memref<88x128xf32, #tpu.memory_space<vmem>>, vector<88x128xf32>
    %47 = vector.extract_strided_slice %39 {offsets = [0, 0], sizes = [48, 128], strides = [1, 1]} : vector<96x384xf32> to vector<48x128xf32>
    %cst_39 = arith.constant dense<0.000000e+00> : vector<88x128xf32>
    %48 = tpu.matmul %41, %47, %cst_39 {dimension_numbers = #tpu.dot_dimension_numbers<[1], [0], [0], [1], [0, 0, 1, 1], [], []>} : vector<88x48xf32>, vector<48x128xf32>, vector<88x128xf32> -> vector<88x128xf32>
    %49 = vector.extract_strided_slice %39 {offsets = [0, 128], sizes = [48, 128], strides = [1, 1]} : vector<96x384xf32> to vector<48x128xf32>
    %cst_40 = arith.constant dense<0.000000e+00> : vector<88x128xf32>
    %50 = tpu.matmul %43, %49, %cst_40 {dimension_numbers = #tpu.dot_dimension_numbers<[1], [0], [0], [1], [0, 0, 1, 1], [], []>} : vector<88x48xf32>, vector<48x128xf32>, vector<88x128xf32> -> vector<88x128xf32>
    %51 = arith.addf %48, %50 : vector<88x128xf32>
    %52 = vector.extract_strided_slice %39 {offsets = [0, 256], sizes = [48, 128], strides = [1, 1]} : vector<96x384xf32> to vector<48x128xf32>
    %cst_41 = arith.constant dense<0.000000e+00> : vector<88x128xf32>
    %53 = tpu.matmul %45, %52, %cst_41 {dimension_numbers = #tpu.dot_dimension_numbers<[1], [0], [0], [1], [0, 0, 1, 1], [], []>} : vector<88x48xf32>, vector<48x128xf32>, vector<88x128xf32> -> vector<88x128xf32>
    %54 = arith.addf %51, %53 : vector<88x128xf32>
    %55 = arith.addf %54, %46 : vector<88x128xf32>
    %cst_42 = arith.constant 0.00999999977 : f32
    %56 = vector.broadcast %cst_42 : f32 to vector<88x128xf32>
    %57 = arith.mulf %56, %55 : vector<88x128xf32>
    %58 = arith.maximumf %55, %57 : vector<88x128xf32>
    %c0_43 = arith.constant 0 : index
    %c0_44 = arith.constant 0 : index
    %59 = vector.load %arg14[%c0_43, %c0_44] : memref<176x128xf32, #tpu.memory_space<vmem>>, vector<88x128xf32>
    tpu.vector_store %arg14[%c0_43, %c0_44], %58 {strides = array<i32>} : memref<176x128xf32, #tpu.memory_space<vmem>>, vector<88x128xf32>,
    %60 = vector.extract_strided_slice %39 {offsets = [48, 0], sizes = [48, 128], strides = [1, 1]} : vector<96x384xf32> to vector<48x128xf32>
    %cst_45 = arith.constant dense<0.000000e+00> : vector<88x128xf32>
    %61 = tpu.matmul %41, %60, %cst_45 {dimension_numbers = #tpu.dot_dimension_numbers<[1], [0], [0], [1], [0, 0, 1, 1], [], []>} : vector<88x48xf32>, vector<48x128xf32>, vector<88x128xf32> -> vector<88x128xf32>
    %62 = vector.extract_strided_slice %39 {offsets = [48, 128], sizes = [48, 128], strides = [1, 1]} : vector<96x384xf32> to vector<48x128xf32>
    %cst_46 = arith.constant dense<0.000000e+00> : vector<88x128xf32>
    %63 = tpu.matmul %43, %62, %cst_46 {dimension_numbers = #tpu.dot_dimension_numbers<[1], [0], [0], [1], [0, 0, 1, 1], [], []>} : vector<88x48xf32>, vector<48x128xf32>, vector<88x128xf32> -> vector<88x128xf32>
    %64 = arith.addf %61, %63 : vector<88x128xf32>
    %65 = vector.extract_strided_slice %39 {offsets = [48, 256], sizes = [48, 128], strides = [1, 1]} : vector<96x384xf32> to vector<48x128xf32>
    %cst_47 = arith.constant dense<0.000000e+00> : vector<88x128xf32>
    %66 = tpu.matmul %45, %65, %cst_47 {dimension_numbers = #tpu.dot_dimension_numbers<[1], [0], [0], [1], [0, 0, 1, 1], [], []>} : vector<88x48xf32>, vector<48x128xf32>, vector<88x128xf32> -> vector<88x128xf32>
    %67 = arith.addf %64, %66 : vector<88x128xf32>
    %68 = arith.addf %67, %46 : vector<88x128xf32>
    %cst_48 = arith.constant 0.00999999977 : f32
    %69 = vector.broadcast %cst_48 : f32 to vector<88x128xf32>
    %70 = arith.mulf %69, %68 : vector<88x128xf32>
    %71 = arith.maximumf %68, %70 : vector<88x128xf32>
    %c88 = arith.constant 88 : index
    %c0_49 = arith.constant 0 : index
    %72 = vector.load %arg14[%c88, %c0_49] : memref<176x128xf32, #tpu.memory_space<vmem>>, vector<88x128xf32>
    tpu.vector_store %arg14[%c88, %c0_49], %71 {strides = array<i32>} : memref<176x128xf32, #tpu.memory_space<vmem>>, vector<88x128xf32>,
    %c0_50 = arith.constant 0 : index
    %c0_51 = arith.constant 0 : index
    %73 = vector.load %arg14[%c0_50, %c0_51] : memref<176x128xf32, #tpu.memory_space<vmem>>, vector<176x128xf32>
    %74 = vector.extract_strided_slice %73 {offsets = [0, 0], sizes = [176, 24], strides = [1, 1]} : vector<176x128xf32> to vector<176x24xf32>
    %c0_52 = arith.constant 0 : index
    %c0_53 = arith.constant 0 : index
    %75 = vector.load %arg8[%c0_52, %c0_53] : memref<24x384xf32, #tpu.memory_space<vmem>>, vector<24x384xf32>
    %cst_54 = arith.constant dense<0.000000e+00> : vector<176x384xf32>
    %76 = tpu.matmul %74, %75, %cst_54 {dimension_numbers = #tpu.dot_dimension_numbers<[1], [0], [0], [1], [0, 0, 1, 1], [], []>} : vector<176x24xf32>, vector<24x384xf32>, vector<176x384xf32> -> vector<176x384xf32>
    %c0_55 = arith.constant 0 : index
    %c0_56 = arith.constant 0 : index
    %c0_57 = arith.constant 0 : index
    %77 = vector.load %arg7[%c0_55, %c0_56, %c0_57] : memref<3x88x88xf32, #tpu.memory_space<vmem>>, vector<1x88x88xf32>
    %78 = vector.shape_cast %77 : vector<1x88x88xf32> to vector<88x88xf32>
    %c1_58 = arith.constant 1 : index
    %c0_59 = arith.constant 0 : index
    %c0_60 = arith.constant 0 : index
    %79 = vector.load %arg7[%c1_58, %c0_59, %c0_60] : memref<3x88x88xf32, #tpu.memory_space<vmem>>, vector<1x88x88xf32>
    %80 = vector.shape_cast %79 : vector<1x88x88xf32> to vector<88x88xf32>
    %c2_61 = arith.constant 2 : index
    %c0_62 = arith.constant 0 : index
    %c0_63 = arith.constant 0 : index
    %81 = vector.load %arg7[%c2_61, %c0_62, %c0_63] : memref<3x88x88xf32, #tpu.memory_space<vmem>>, vector<1x88x88xf32>
    %82 = vector.shape_cast %81 : vector<1x88x88xf32> to vector<88x88xf32>
    %c0_64 = arith.constant 0 : index
    %c0_65 = arith.constant 0 : index
    %83 = vector.load %arg9[%c0_64, %c0_65] : memref<88x128xf32, #tpu.memory_space<vmem>>, vector<88x128xf32>
    %84 = vector.extract_strided_slice %76 {offsets = [0, 0], sizes = [88, 128], strides = [1, 1]} : vector<176x384xf32> to vector<88x128xf32>
    %cst_66 = arith.constant dense<0.000000e+00> : vector<88x128xf32>
    %85 = tpu.matmul %78, %84, %cst_66 {dimension_numbers = #tpu.dot_dimension_numbers<[1], [0], [0], [1], [0, 0, 1, 1], [], []>} : vector<88x88xf32>, vector<88x128xf32>, vector<88x128xf32> -> vector<88x128xf32>
    %86 = vector.extract_strided_slice %76 {offsets = [0, 128], sizes = [88, 128], strides = [1, 1]} : vector<176x384xf32> to vector<88x128xf32>
    %cst_67 = arith.constant dense<0.000000e+00> : vector<88x128xf32>
    %87 = tpu.matmul %80, %86, %cst_67 {dimension_numbers = #tpu.dot_dimension_numbers<[1], [0], [0], [1], [0, 0, 1, 1], [], []>} : vector<88x88xf32>, vector<88x128xf32>, vector<88x128xf32> -> vector<88x128xf32>
    %88 = arith.addf %85, %87 : vector<88x128xf32>
    %89 = vector.extract_strided_slice %76 {offsets = [0, 256], sizes = [88, 128], strides = [1, 1]} : vector<176x384xf32> to vector<88x128xf32>
    %cst_68 = arith.constant dense<0.000000e+00> : vector<88x128xf32>
    %90 = tpu.matmul %82, %89, %cst_68 {dimension_numbers = #tpu.dot_dimension_numbers<[1], [0], [0], [1], [0, 0, 1, 1], [], []>} : vector<88x88xf32>, vector<88x128xf32>, vector<88x128xf32> -> vector<88x128xf32>
    %91 = arith.addf %88, %90 : vector<88x128xf32>
    %92 = arith.addf %91, %83 : vector<88x128xf32>
    %cst_69 = arith.constant 0.00999999977 : f32
    %93 = vector.broadcast %cst_69 : f32 to vector<88x128xf32>
    %94 = arith.mulf %93, %92 : vector<88x128xf32>
    %95 = arith.maximumf %92, %94 : vector<88x128xf32>
    %c0_70 = arith.constant 0 : index
    %c0_71 = arith.constant 0 : index
    %96 = vector.load %arg14[%c0_70, %c0_71] : memref<176x128xf32, #tpu.memory_space<vmem>>, vector<88x128xf32>
    tpu.vector_store %arg14[%c0_70, %c0_71], %95 {strides = array<i32>} : memref<176x128xf32, #tpu.memory_space<vmem>>, vector<88x128xf32>,
    %97 = vector.extract_strided_slice %76 {offsets = [88, 0], sizes = [88, 128], strides = [1, 1]} : vector<176x384xf32> to vector<88x128xf32>
    %cst_72 = arith.constant dense<0.000000e+00> : vector<88x128xf32>
    %98 = tpu.matmul %78, %97, %cst_72 {dimension_numbers = #tpu.dot_dimension_numbers<[1], [0], [0], [1], [0, 0, 1, 1], [], []>} : vector<88x88xf32>, vector<88x128xf32>, vector<88x128xf32> -> vector<88x128xf32>
    %99 = vector.extract_strided_slice %76 {offsets = [88, 128], sizes = [88, 128], strides = [1, 1]} : vector<176x384xf32> to vector<88x128xf32>
    %cst_73 = arith.constant dense<0.000000e+00> : vector<88x128xf32>
    %100 = tpu.matmul %80, %99, %cst_73 {dimension_numbers = #tpu.dot_dimension_numbers<[1], [0], [0], [1], [0, 0, 1, 1], [], []>} : vector<88x88xf32>, vector<88x128xf32>, vector<88x128xf32> -> vector<88x128xf32>
    %101 = arith.addf %98, %100 : vector<88x128xf32>
    %102 = vector.extract_strided_slice %76 {offsets = [88, 256], sizes = [88, 128], strides = [1, 1]} : vector<176x384xf32> to vector<88x128xf32>
    %cst_74 = arith.constant dense<0.000000e+00> : vector<88x128xf32>
    %103 = tpu.matmul %82, %102, %cst_74 {dimension_numbers = #tpu.dot_dimension_numbers<[1], [0], [0], [1], [0, 0, 1, 1], [], []>} : vector<88x88xf32>, vector<88x128xf32>, vector<88x128xf32> -> vector<88x128xf32>
    %104 = arith.addf %101, %103 : vector<88x128xf32>
    %105 = arith.addf %104, %83 : vector<88x128xf32>
    %cst_75 = arith.constant 0.00999999977 : f32
    %106 = vector.broadcast %cst_75 : f32 to vector<88x128xf32>
    %107 = arith.mulf %106, %105 : vector<88x128xf32>
    %108 = arith.maximumf %105, %107 : vector<88x128xf32>
    %c88_76 = arith.constant 88 : index
    %c0_77 = arith.constant 0 : index
    %109 = vector.load %arg14[%c88_76, %c0_77] : memref<176x128xf32, #tpu.memory_space<vmem>>, vector<88x128xf32>
    tpu.vector_store %arg14[%c88_76, %c0_77], %108 {strides = array<i32>} : memref<176x128xf32, #tpu.memory_space<vmem>>, vector<88x128xf32>,
    %c0_78 = arith.constant 0 : index
    %c0_79 = arith.constant 0 : index
    %110 = vector.load %arg14[%c0_78, %c0_79] : memref<176x128xf32, #tpu.memory_space<vmem>>, vector<176x128xf32>
    %111 = vector.extract_strided_slice %110 {offsets = [0, 0], sizes = [176, 48], strides = [1, 1]} : vector<176x128xf32> to vector<176x48xf32>
    %c0_80 = arith.constant 0 : index
    %c0_81 = arith.constant 0 : index
    %112 = vector.load %arg11[%c0_80, %c0_81] : memref<48x384xf32, #tpu.memory_space<vmem>>, vector<48x384xf32>
    %cst_82 = arith.constant dense<0.000000e+00> : vector<176x384xf32>
    %113 = tpu.matmul %111, %112, %cst_82 {dimension_numbers = #tpu.dot_dimension_numbers<[1], [0], [0], [1], [0, 0, 1, 1], [], []>} : vector<176x48xf32>, vector<48x384xf32>, vector<176x384xf32> -> vector<176x384xf32>
    %c0_83 = arith.constant 0 : index
    %c0_84 = arith.constant 0 : index
    %c0_85 = arith.constant 0 : index
    %114 = vector.load %arg10[%c0_83, %c0_84, %c0_85] : memref<3x168x88xf32, #tpu.memory_space<vmem>>, vector<1x168x88xf32>
    %115 = vector.shape_cast %114 : vector<1x168x88xf32> to vector<168x88xf32>
    %c1_86 = arith.constant 1 : index
    %c0_87 = arith.constant 0 : index
    %c0_88 = arith.constant 0 : index
    %116 = vector.load %arg10[%c1_86, %c0_87, %c0_88] : memref<3x168x88xf32, #tpu.memory_space<vmem>>, vector<1x168x88xf32>
    %117 = vector.shape_cast %116 : vector<1x168x88xf32> to vector<168x88xf32>
    %c2_89 = arith.constant 2 : index
    %c0_90 = arith.constant 0 : index
    %c0_91 = arith.constant 0 : index
    %118 = vector.load %arg10[%c2_89, %c0_90, %c0_91] : memref<3x168x88xf32, #tpu.memory_space<vmem>>, vector<1x168x88xf32>
    %119 = vector.shape_cast %118 : vector<1x168x88xf32> to vector<168x88xf32>
    %c0_92 = arith.constant 0 : index
    %c0_93 = arith.constant 0 : index
    %120 = vector.load %arg12[%c0_92, %c0_93] : memref<168x128xf32, #tpu.memory_space<vmem>>, vector<168x128xf32>
    %121 = vector.extract_strided_slice %113 {offsets = [0, 0], sizes = [88, 128], strides = [1, 1]} : vector<176x384xf32> to vector<88x128xf32>
    %cst_94 = arith.constant dense<0.000000e+00> : vector<168x128xf32>
    %122 = tpu.matmul %115, %121, %cst_94 {dimension_numbers = #tpu.dot_dimension_numbers<[1], [0], [0], [1], [0, 0, 1, 1], [], []>} : vector<168x88xf32>, vector<88x128xf32>, vector<168x128xf32> -> vector<168x128xf32>
    %123 = vector.extract_strided_slice %113 {offsets = [0, 128], sizes = [88, 128], strides = [1, 1]} : vector<176x384xf32> to vector<88x128xf32>
    %cst_95 = arith.constant dense<0.000000e+00> : vector<168x128xf32>
    %124 = tpu.matmul %117, %123, %cst_95 {dimension_numbers = #tpu.dot_dimension_numbers<[1], [0], [0], [1], [0, 0, 1, 1], [], []>} : vector<168x88xf32>, vector<88x128xf32>, vector<168x128xf32> -> vector<168x128xf32>
    %125 = arith.addf %122, %124 : vector<168x128xf32>
    %126 = vector.extract_strided_slice %113 {offsets = [0, 256], sizes = [88, 128], strides = [1, 1]} : vector<176x384xf32> to vector<88x128xf32>
    %cst_96 = arith.constant dense<0.000000e+00> : vector<168x128xf32>
    %127 = tpu.matmul %119, %126, %cst_96 {dimension_numbers = #tpu.dot_dimension_numbers<[1], [0], [0], [1], [0, 0, 1, 1], [], []>} : vector<168x88xf32>, vector<88x128xf32>, vector<168x128xf32> -> vector<168x128xf32>
    %128 = arith.addf %125, %127 : vector<168x128xf32>
    %129 = arith.addf %128, %120 : vector<168x128xf32>
    %c0_97 = arith.constant 0 : index
    %c0_98 = arith.constant 0 : index
    %130 = vector.load %arg13[%c0_97, %c0_98] : memref<336x128xf32, #tpu.memory_space<vmem>>, vector<168x128xf32>
    tpu.vector_store %arg13[%c0_97, %c0_98], %129 {strides = array<i32>} : memref<336x128xf32, #tpu.memory_space<vmem>>, vector<168x128xf32>,
    %131 = vector.extract_strided_slice %113 {offsets = [88, 0], sizes = [88, 128], strides = [1, 1]} : vector<176x384xf32> to vector<88x128xf32>
    %cst_99 = arith.constant dense<0.000000e+00> : vector<168x128xf32>
    %132 = tpu.matmul %115, %131, %cst_99 {dimension_numbers = #tpu.dot_dimension_numbers<[1], [0], [0], [1], [0, 0, 1, 1], [], []>} : vector<168x88xf32>, vector<88x128xf32>, vector<168x128xf32> -> vector<168x128xf32>
    %133 = vector.extract_strided_slice %113 {offsets = [88, 128], sizes = [88, 128], strides = [1, 1]} : vector<176x384xf32> to vector<88x128xf32>
    %cst_100 = arith.constant dense<0.000000e+00> : vector<168x128xf32>
    %134 = tpu.matmul %117, %133, %cst_100 {dimension_numbers = #tpu.dot_dimension_numbers<[1], [0], [0], [1], [0, 0, 1, 1], [], []>} : vector<168x88xf32>, vector<88x128xf32>, vector<168x128xf32> -> vector<168x128xf32>
    %135 = arith.addf %132, %134 : vector<168x128xf32>
    %136 = vector.extract_strided_slice %113 {offsets = [88, 256], sizes = [88, 128], strides = [1, 1]} : vector<176x384xf32> to vector<88x128xf32>
    %cst_101 = arith.constant dense<0.000000e+00> : vector<168x128xf32>
    %137 = tpu.matmul %119, %136, %cst_101 {dimension_numbers = #tpu.dot_dimension_numbers<[1], [0], [0], [1], [0, 0, 1, 1], [], []>} : vector<168x88xf32>, vector<88x128xf32>, vector<168x128xf32> -> vector<168x128xf32>
    %138 = arith.addf %135, %137 : vector<168x128xf32>
    %139 = arith.addf %138, %120 : vector<168x128xf32>
    %c168 = arith.constant 168 : index
    %c0_102 = arith.constant 0 : index
    %140 = vector.load %arg13[%c168, %c0_102] : memref<336x128xf32, #tpu.memory_space<vmem>>, vector<168x128xf32>
    tpu.vector_store %arg13[%c168, %c0_102], %139 {strides = array<i32>} : memref<336x128xf32, #tpu.memory_space<vmem>>, vector<168x128xf32>,
    return
  }
}

</mosaic_0001>

<bundles_post_ra>
// kernel: _decoder_forward_jit.1
= control target key start
LH: loop header
LB: loop body
LE: loop exit
PB: predicated region body
PF: predicated region fallthrough
CT: control target
= control target key end

     0   :  { %18 = vsyncpa [#allocation4], 0  ;;  %s11635_s0 = inlined_call_operand.vmem [shape: f32[80,6], index: 0, kind: input, shape index: {}]   ;;  %s11636_s1 = inlined_call_operand.vmem [shape: f32[3,48,40], index: 1, kind: input, shape index: {}]   ;;  %s11637_s2 = inlined_call_operand.hbm [shape: f32[6,384], index: 2, kind: input, shape index: {}]   ;;  %s11638_s3 = inlined_call_operand.hbm [shape: f32[48,128], index: 3, kind: input, shape index: {}]   ;;  %s11639_s4 = inlined_call_operand.vmem [shape: f32[3,88,48], index: 4, kind: input, shape index: {}]   ;;  %s11640_s5 = inlined_call_operand.hbm [shape: f32[16,384], index: 5, kind: input, shape index: {}]   ;;  %s11641_s6 = inlined_call_operand.hbm [shape: f32[88,128], index: 6, kind: input, shape index: {}]   ;;  %s11642_s7 = inlined_call_operand.vmem [shape: f32[3,88,88], index: 7, kind: input, shape index: {}]   ;;  %s11643_s8 = inlined_call_operand.hbm [shape: f32[24,384], index: 8, kind: input, shape index: {}]   ;;  %s11644_s9 = inlined_call_operand.hbm [shape: f32[88,128], index: 9, kind: input, shape index: {}]   ;;  %s11645_s10 = inlined_call_operand.vmem [shape: f32[3,168,88], index: 10, kind: input, shape index: {}]   ;;  %s11646_s11 = inlined_call_operand.hbm [shape: f32[48,384], index: 11, kind: input, shape index: {}]   ;;  %s11647_s12 = inlined_call_operand.hbm [shape: f32[168,128], index: 12, kind: input, shape index: {}]   ;;  %s11648_s13 = inlined_call_operand.vmem [shape: f32[336,128], index: 13, kind: output, shape index: {}]  }
   0x1   :  { %19 = vsyncpa [#allocation6], 0 }
   0x2   :  { %20 = vsyncpa [#allocation9], 0 }
   0x3   :  { %21 = vsyncpa [#allocation12], 0 }
   0x4   :  { %22 = vsyncpa [#allocation15], 0  ;;  %s8433_s25 = smov [#allocation5]  }
   0x5   :  { %s42_s26 = sshll.u32 %s8433_s25, 4  ;;  %s43_s26 = int_to_ptr.vmem [resolvable:$true] %s42_s26 }
   0x6   :  { %s8271_s27 = scalar_lea.vmem %s43_s26, 768  ;;  %p8276_p1 = scmp.lt.s32.totalorder %s43_s26, %s43_s26 }
   0x7   :  { %p8272_p0 = scmp.ne.s32.totalorder %s43_s26, %s8271_s27  ;;  %p8277_p2 = scmp.lt.s32.totalorder %s8271_s27, %s8271_s27 }
   0x9   :  { %p8278_p3 = por %p8277_p2, %p8276_p1 }
   0xb   :  { %p8279_p4 = pnand %p8278_p3, %p8272_p0 }
   0xd   :  { %8282 = shalt.err (!%p8279_p4)
}
   0xe   :  { %s8434_s28 = smov 128   ;;  %s8435_s29 = smov 8  }
   0xf   :  { %48 = dma.hbm_to_vmem [thread:$0]  %s11638_s3, 768, %s43_s26, [#allocation6], %s8434_s28, %s8434_s28, %s8435_s29  }
  0x10   :  { %s8436_s15 = smov [#allocation8]   ;;  %s8437_s17 = smov [#allocation11]  }
  0x11   :  { %s68_s16 = sshll.u32 %s8436_s15, 4  ;;  %s94_s18 = sshll.u32 %s8437_s17, 4  ;;  %s69_s16 = int_to_ptr.vmem [resolvable:$true] %s68_s16  ;;  %s95_s18 = int_to_ptr.vmem [resolvable:$true] %s94_s18 }
  0x12   :  { %s8291_s19 = scalar_lea.vmem %s69_s16, 1408  ;;  %p8296_p6 = scmp.lt.s32.totalorder %s69_s16, %s69_s16 }
  0x13   :  { %p8292_p5 = scmp.ne.s32.totalorder %s69_s16, %s8291_s19  ;;  %p8297_p7 = scmp.lt.s32.totalorder %s8291_s19, %s8291_s19 }
  0x15   :  { %p8298_p8 = por %p8297_p7, %p8296_p6 }
  0x17   :  { %p8299_p9 = pnand %p8298_p8, %p8292_p5 }
  0x19   :  { %8302 = shalt.err (!%p8299_p9)
}
  0x1a   :  { %74 = dma.hbm_to_vmem [thread:$0]  %s11641_s6, 1408, %s69_s16, [#allocation9], %s8434_s28, %s8434_s28, %s8435_s29  }
  0x1b   :  { %s8311_s3 = scalar_lea.vmem %s95_s18, 1408  ;;  %p8316_p11 = scmp.lt.s32.totalorder %s95_s18, %s95_s18 }
  0x1c   :  { %p8312_p10 = scmp.ne.s32.totalorder %s95_s18, %s8311_s3  ;;  %p8317_p12 = scmp.lt.s32.totalorder %s8311_s3, %s8311_s3 }
  0x1e   :  { %p8318_p13 = por %p8317_p12, %p8316_p11 }
  0x20   :  { %p8319_p0 = pnand %p8318_p13, %p8312_p10 }
  0x22   :  { %8322 = shalt.err (!%p8319_p0)
}
  0x23   :  { %100 = dma.hbm_to_vmem [thread:$0]  %s11644_s9, 1408, %s95_s18, [#allocation12], %s8434_s28, %s8434_s28, %s8435_s29  }
  0x24   :  { %s8438_s24 = smov [#allocation3]   ;;  %s8439_s26 = smov [#allocation7]  }
  0x25   :  { %s33_s25 = sshll.u32 %s8438_s24, 4  ;;  %s56_s6 = sshll.u32 %s8439_s26, 4  ;;  %s34_s25 = int_to_ptr.vmem [resolvable:$true] %s33_s25  ;;  %s57_s6 = int_to_ptr.vmem [resolvable:$true] %s56_s6 }
  0x26   :  { %s8331_s27 = scalar_lea.vmem %s34_s25, 384  ;;  %p8336_p2 = scmp.lt.s32.totalorder %s34_s25, %s34_s25 }
  0x27   :  { %p8332_p1 = scmp.ne.s32.totalorder %s34_s25, %s8331_s27  ;;  %p8337_p3 = scmp.lt.s32.totalorder %s8331_s27, %s8331_s27 }
  0x29   :  { %p8338_p4 = por %p8337_p3, %p8336_p2 }
  0x2b   :  { %p8339_p5 = pnand %p8338_p4, %p8332_p1 }
  0x2d   :  { %8342 = shalt.err (!%p8339_p5)
}
  0x2e   :  { %36 = dma.hbm_to_vmem [thread:$0]  %s11637_s2, 384, %s34_s25, [#allocation4]  }
  0x2f   :  { %s8351_s15 = scalar_lea.vmem %s57_s6, 768  ;;  %p8356_p7 = scmp.lt.s32.totalorder %s57_s6, %s57_s6 }
  0x30   :  { %p8352_p6 = scmp.ne.s32.totalorder %s57_s6, %s8351_s15  ;;  %p8357_p8 = scmp.lt.s32.totalorder %s8351_s15, %s8351_s15 }
  0x32   :  { %p8358_p9 = por %p8357_p8, %p8356_p7 }
  0x34   :  { %p8359_p10 = pnand %p8358_p9, %p8352_p6 }
  0x36   :  { %8362 = shalt.err (!%p8359_p10)
}
  0x37   :  { %s8440_s9 = smov 384   ;;  %s8441_s16 = smov 24  }
  0x38   :  { %62 = dma.hbm_to_vmem [thread:$0]  %s11640_s5, 768, %s57_s6, [#allocation6], %s8440_s9, %s8440_s9, %s8441_s16  }
  0x39   :  { %s8442_s19 = smov [#allocation10]   ;;  %s8443_s21 = smov [#allocation13]  }
  0x3a   :  { %s82_s20 = sshll.u32 %s8442_s19, 4  ;;  %s108_s3 = sshll.u32 %s8443_s21, 4  ;;  %s83_s20 = int_to_ptr.vmem [resolvable:$true] %s82_s20  ;;  %s109_s3 = int_to_ptr.vmem [resolvable:$true] %s108_s3 }
  0x3b   :  { %s8371_s2 = scalar_lea.vmem %s83_s20, 1152  ;;  %p8376_p12 = scmp.lt.s32.totalorder %s83_s20, %s83_s20 }
  0x3c   :  { %p8372_p11 = scmp.ne.s32.totalorder %s83_s20, %s8371_s2  ;;  %p8377_p13 = scmp.lt.s32.totalorder %s8371_s2, %s8371_s2 }
  0x3e   :  { %p8378_p0 = por %p8377_p13, %p8376_p12 }
  0x40   :  { %p8379_p1 = pnand %p8378_p0, %p8372_p11 }
  0x42   :  { %8382 = shalt.err (!%p8379_p1)
}
  0x43   :  { %88 = dma.hbm_to_vmem [thread:$0]  %s11643_s8, 1152, %s83_s20, [#allocation9], %s8440_s9, %s8440_s9, %s8441_s16  }
  0x44   :  { %s8391_s24 = scalar_lea.vmem %s109_s3, 2304  ;;  %p8396_p3 = scmp.lt.s32.totalorder %s109_s3, %s109_s3 }
  0x45   :  { %p8392_p2 = scmp.ne.s32.totalorder %s109_s3, %s8391_s24  ;;  %p8397_p4 = scmp.lt.s32.totalorder %s8391_s24, %s8391_s24 }
  0x47   :  { %p8398_p5 = por %p8397_p4, %p8396_p3 }
  0x49   :  { %p8399_p6 = pnand %p8398_p5, %p8392_p2 }
  0x4b   :  { %8402 = shalt.err (!%p8399_p6)
}
  0x4c   :  { %114 = dma.hbm_to_vmem [thread:$0]  %s11646_s11, 2304, %s109_s3, [#allocation12], %s8440_s9, %s8440_s9, %s8441_s16  }
  0x4d   :  { %s8444_s26 = smov [#allocation14]  }
  0x4e   :  { %s120_s6 = sshll.u32 %s8444_s26, 4  ;;  %s121_s6 = int_to_ptr.vmem [resolvable:$true] %s120_s6 }
  0x4f   :  { %s8411_s27 = scalar_lea.vmem %s121_s6, 2688  ;;  %p8416_p8 = scmp.lt.s32.totalorder %s121_s6, %s121_s6 }
  0x50   :  { %p8412_p7 = scmp.ne.s32.totalorder %s121_s6, %s8411_s27  ;;  %p8417_p9 = scmp.lt.s32.totalorder %s8411_s27, %s8411_s27 }
  0x52   :  { %p8418_p10 = por %p8417_p9, %p8416_p8 }
  0x54   :  { %p8419_p11 = pnand %p8418_p10, %p8412_p7 }
  0x56   :  { %8422 = shalt.err (!%p8419_p11)
}
  0x57   :  { %126 = dma.hbm_to_vmem [thread:$0]  %s11647_s12, 2688, %s121_s6, [#allocation15], %s8434_s28, %s8434_s28, %s8435_s29  }
  0x58   :  { %8423 = dma.done.wait [#allocation4], 384  }
  0x59   :  { %8424 = vsyncadd [#allocation4], 4294966912 }
  0x5a   :  { %8425 = dma.done.wait [#allocation6], 1536  }
  0x5b   :  { %8426 = vsyncadd [#allocation6], 4294965760 }
  0x5c   :  { %8427 = dma.done.wait [#allocation9], 2560  }
  0x5d   :  { %8428 = vsyncadd [#allocation9], 4294964736 }
  0x5e   :  { %8429 = dma.done.wait [#allocation12], 3712  }
  0x5f   :  { %8430 = vsyncadd [#allocation12], 4294963584 }
  0x60   :  { %8431 = dma.done.wait [#allocation15], 2688  }
  0x61   :  { %8432 = vsyncadd [#allocation15], 4294964608  ;;  %v8445_v0 = vmov 0.0   ;;  %vm195_vm0 = vcmask 1045504   ;;  %v162_v1 = vld [vmem:[#allocation3 + $0x8] sm:$0x3f] }
  0x62   :  { %269 = vmatprep.mubr.f32.mxu0 %v8445_v0  ;;  %317 = vmatprep.mubr.f32.mxu1 %v8445_v0  ;;  %v161_v2 = vld [vmem:[#allocation3] sm:$0x3f]  ;;  %v151_v3 = vld [vmem:[%s11635_s0] sm:$0xff]  ;;  %vm164_vm1 = vcmask 48128   ;;  %v163_v5 = vld [vmem:[#allocation3 + $0x10] sm:$0x3f] }
  0x63   :  { %5803 = vmatprep.subr.msk.mxu0 %vm195_vm0, %v162_v1  ;;  %8247 = vmatprep.subr.msk.mxu1 %vm195_vm0, %v162_v1  ;;  %v159_v4 = vld [vmem:[%s11635_s0 + $0x40] sm:$0xff]  ;;  %v152_v6 = vld [vmem:[%s11635_s0 + $0x8] sm:$0xff]  ;;  %v153_v8 = vld [vmem:[%s11635_s0 + $0x10] sm:$0xff]  ;;  %vm471_vm2 = vcmask 326656   ;;  %vm1174_vm3 = vcmask 130048   ;;  %vm8446_vm4 = vmmov 0  }
  0x64   :  { %5804 = vmatpush1.msk.msra.mxu0 %vm195_vm0, %v161_v2  ;;  %8248 = vmatpush1.msk.msra.mxu1 %vm195_vm0, %v161_v2  ;;  %v160_v7 = vld [vmem:[%s11635_s0 + $0x48] sm:$0xff]  ;;  %v154_v9 = vld [vmem:[%s11635_s0 + $0x18] sm:$0xff]  ;;  %v155_v10 = vld [vmem:[%s11635_s0 + $0x20] sm:$0xff]  ;;  %vm1519_vm5 = vcmask 392192   ;;  %vm2480_vm6 = vcmask 195584   ;;  %vm2965_vm7 = vcmask 719872  }
  0x65   :  { %5805 = vmatmul.mubr.msk.f32.vlgmr.msra.gmra.mxu0 %vm164_vm1, %v151_v3  ;;  %5813 = vmatmul.mubr.msk.f32.vlgmr.msra.gmra.mxu1 %vm164_vm1, %v159_v4  ;;  %v156_v11 = vld [vmem:[%s11635_s0 + $0x28] sm:$0xff]  ;;  %v157_v12 = vld [vmem:[%s11635_s0 + $0x30] sm:$0xff]  ;;  %v158_v13 = vld [vmem:[%s11635_s0 + $0x38] sm:$0xff] }
  0x66   :  { %275 = vmatprep.mubr.f32.mxu0 %v8445_v0  ;;  %323 = vmatprep.mubr.f32.mxu1 %v8445_v0  ;;  %v8622_v14 = vld [vmem:[%s11636_s1 + $0x30] sm:$0xff]  ;;  %v8629_v15 = vld [vmem:[%s11636_s1 + $0x60] sm:$0xff]  ;;  %v8648_v37 = vld [vmem:[%s11636_s1 + $0x38] sm:$0xff] }
  0x67   :  { %6900 = vmatprep.subr.msk.mxu1 %vm195_vm0, %v163_v5  ;;  %v8653_v38 = vld [vmem:[%s11636_s1 + $0x68] sm:$0xff]  ;;  %v8662_v40 = vld [vmem:[%s11636_s1 + $0x40] sm:$0xff]  ;;  %v8676_v42 = vld [vmem:[%s11636_s1 + $0x50] sm:$0xff] }
  0x68   :  { %6901 = vmatpush3.msk.msra.mxu1 %vm195_vm0, %v163_v5  ;;  %v8669_v41 = vld [vmem:[%s11636_s1 + $0x48] sm:$0xff]  ;;  %v8681_v44 = vld [vmem:[%s11636_s1 + $0x70] sm:$0xff]  ;;  %v8688_v45 = vld [vmem:[%s11636_s1 + $0x78] sm:$0xff] }
  0x69   :  { %5806 = vmatmul.mubr.msk.f32.gmra.mxu0 %vm164_vm1, %v152_v6  ;;  %5814 = vmatmul.mubr.msk.f32.gmra.mxu1 %vm164_vm1, %v160_v7  ;;  %v8695_v46 = vld [vmem:[%s11636_s1 + $0x80] sm:$0xff]  ;;  %v8700_v47 = vld [vmem:[%s11636_s1 + $0x58] sm:$0xff]  ;;  %v8716_v50 = vld [vmem:[%s11636_s1 + $0x88] sm:$0xff] }
  0x6a   :  { %281 = vmatprep.mubr.f32.mxu0 %v8445_v0  ;;  %6902 = vmatprep.mubr.msk.f32.mxu1 %vm164_vm1, %v151_v3  ;;  %v445_v49 = vld [vmem:[%s11636_s1] sm:$0xff]  ;;  %v446_v51 = vld [vmem:[%s11636_s1 + $0x8] sm:$0xff]  ;;  %v447_v53 = vld [vmem:[%s11636_s1 + $0x10] sm:$0xff] }
  0x6b   :  { %v448_v56 = vld [vmem:[%s11636_s1 + $0x18] sm:$0xff]  ;;  %v449_v57 = vld [vmem:[%s11636_s1 + $0x20] sm:$0xff]  ;;  %v450_v59 = vld [vmem:[%s11636_s1 + $0x28] sm:$0xff] }
  0x6c   :  { %v1172_v62 = vld [vmem:[#allocation7 + $0x20] sm:$0xff]  ;;  %v1171_v63 = vld [vmem:[#allocation7 + $0x18] sm:$0xff]  ;;  %v1173_v1 = vld [vmem:[#allocation7 + $0x28] sm:$0xff] }
  0x6d   :  { %5807 = vmatmul.mubr.msk.f32.gmra.mxu0 %vm164_vm1, %v153_v8  ;;  %6903 = vmatmul.mubr.msk.f32.vlgmr.msra.gmra.mxu1 %vm164_vm1, %v152_v6  ;;  %v1169_v2 = vld [vmem:[#allocation7 + $0x8] sm:$0xff]  ;;  %v1168_v3 = vld [vmem:[#allocation7] sm:$0xff] }
  0x6e   :  { %287 = vmatprep.mubr.f32.mxu0 %v8445_v0  ;;  %6905 = vmatprep.mubr.msk.f32.mxu1 %vm164_vm1, %v153_v8 }
  0x71   :  { %5808 = vmatmul.mubr.msk.f32.gmra.mxu0 %vm164_vm1, %v154_v9  ;;  %6906 = vmatmul.mubr.msk.f32.gmra.mxu1 %vm164_vm1, %v154_v9 }
  0x72   :  { %293 = vmatprep.mubr.f32.mxu0 %v8445_v0  ;;  %6908 = vmatprep.mubr.msk.f32.mxu1 %vm164_vm1, %v155_v10 }
  0x75   :  { %5809 = vmatmul.mubr.msk.f32.gmra.mxu0 %vm164_vm1, %v155_v10  ;;  %6909 = vmatmul.mubr.msk.f32.gmra.mxu1 %vm164_vm1, %v156_v11 }
  0x76   :  { %299 = vmatprep.mubr.f32.mxu0 %v8445_v0  ;;  %6911 = vmatprep.mubr.msk.f32.mxu1 %vm164_vm1, %v157_v12 }
  0x79   :  { %5810 = vmatmul.mubr.msk.f32.gmra.mxu0 %vm164_vm1, %v156_v11  ;;  %6912 = vmatmul.mubr.msk.f32.gmra.mxu1 %vm164_vm1, %v158_v13 }
  0x7a   :  { %305 = vmatprep.mubr.f32.mxu0 %v8445_v0  ;;  %6914 = vmatprep.mubr.msk.f32.mxu1 %vm164_vm1, %v159_v4  ;;  %v1170_v4 = vld [vmem:[#allocation7 + $0x10] sm:$0xff] }
  0x7d   :  { %5811 = vmatmul.mubr.msk.f32.gmra.mxu0 %vm164_vm1, %v157_v12  ;;  %6915 = vmatmul.mubr.msk.f32.gmra.mxu1 %vm164_vm1, %v160_v7 }
  0x7e   :  { %311 = vmatprep.mubr.f32.mxu0 %v8445_v0  ;;  %6927 = vmatprep.mubr.msk.f32.mxu1 %vm471_vm2, %v8622_v14 }
  0x81   :  { %5812 = vmatmul.mubr.msk.f32.gmra.mxu0 %vm164_vm1, %v158_v13 }
  0x82   :  { %6965 = vmatprep.mubr.msk.f32.mxu0 %vm471_vm2, %v8629_v15 }
 0x125   :  { %v8633_v16 = vpop.f32.mrf.mxu0  ;;  %v319_v17 = vpop.f32.mrf.mxu1 }
 0x127   :  { %v273_v18 = vpop.f32.mrf.mxu0  ;;  %v8635_v19 = vpop.f32.mrf.mxu1 }
 0x129   :  { %v8637_v20 = vpop.f32.mrf.mxu0  ;;  %v325_v21 = vpop.f32.mrf.mxu1 }
 0x12b   :  { %v279_v22 = vpop.f32.mrf.mxu0  ;;  %v8639_v23 = vpop.f32.mrf.mxu1 }
 0x12d   :  { %v283_v24 = vpop.f32.mrf.mxu0  ;;  %v6904_v25 = vpop.f32.mrf.mxu1 }
 0x12f   :  { %v285_v26 = vpop.f32.mrf.mxu0  ;;  %v396_v27 = vpop.f32.mrf.mxu1 }
 0x131   :  { %v289_v28 = vpop.f32.mrf.mxu0  ;;  %v6907_v29 = vpop.f32.mrf.mxu1 }
 0x133   :  { %v291_v30 = vpop.f32.mrf.mxu0  ;;  %v406_v31 = vpop.f32.mrf.mxu1 }
 0x135   :  { %v295_v32 = vpop.f32.mrf.mxu0  ;;  %v8641_v33 = vpop.f32.mrf.mxu1 }
 0x137   :  { %v297_v34 = vpop.f32.mrf.mxu0  ;;  %v416_v35 = vpop.f32.mrf.mxu1 }
 0x138   :  { %6917 = vmatprep.subr.mxu1 %v297_v34  ;;  %6955 = vmatprep.subr.mxu0 %v416_v35 }
 0x139   :  { %6918 = vmatpush3.msra.mxu1 %v297_v34  ;;  %6956 = vmatpush3.msra.mxu0 %v416_v35  ;;  %v8643_v36 = vpop.f32.mrf.mxu0  ;;  %v6913_v54 = vpop.f32.mrf.mxu1 }
 0x13a   :  { %6919 = vmatprep.subr.mxu1 %v291_v30  ;;  %6957 = vmatprep.subr.mxu0 %v6907_v29 }
 0x13b   :  { %6920 = vmatpush3.msra.mxu1 %v291_v30  ;;  %6958 = vmatpush3.msra.mxu0 %v6907_v29  ;;  %v8655_v39 = vpop.f32.mrf.mxu0  ;;  %v426_v58 = vpop.f32.mrf.mxu1 }
 0x13c   :  { %6921 = vmatprep.subr.mxu1 %v285_v26  ;;  %6959 = vmatprep.subr.mxu0 %v406_v31 }
 0x13d   :  { %6922 = vmatpush3.msra.mxu1 %v285_v26  ;;  %6960 = vmatpush3.msra.mxu0 %v406_v31  ;;  %v307_v43 = vpop.f32.mrf.mxu0  ;;  %v6916_v60 = vpop.f32.mrf.mxu1 }
 0x13e   :  { %6923 = vmatprep.subr.mxu1 %v279_v22  ;;  %6961 = vmatprep.subr.mxu0 %v6904_v25 }
 0x13f   :  { %6924 = vmatpush3.msra.mxu1 %v279_v22  ;;  %6962 = vmatpush3.msra.mxu0 %v6904_v25  ;;  %v309_v48 = vpop.f32.mrf.mxu0  ;;  %v436_v61 = vpop.f32.mrf.mxu1 }
 0x140   :  { %6925 = vmatprep.subr.mxu1 %v273_v18  ;;  %6963 = vmatprep.subr.mxu0 %v396_v27 }
 0x141   :  { %6926 = vmatpush3.msra.mxu1 %v273_v18  ;;  %6964 = vmatpush3.msra.mxu0 %v396_v27  ;;  %v313_v52 = vpop.f32.mrf.mxu0  ;;  %v8793_v27 = vld [vmem:[#allocation5 + $0x18] sm:$0xff] }
 0x142   :  { %6928 = vmatmul.mubr.msk.f32.vlgmr.msra.gmra.mxu1 %vm471_vm2, %v8648_v37  ;;  %6936 = vmatprep.subr.mxu1 %v295_v32 }
 0x143   :  { %6993 = vmatprep.subr.mxu0 %v325_v21  ;;  %6937 = vmatpush3.msra.mxu1 %v295_v32  ;;  %v315_v55 = vpop.f32.mrf.mxu0 }
 0x144   :  { %6966 = vmatmul.mubr.msk.f32.vlgmr.msra.gmra.mxu0 %vm471_vm2, %v8653_v38  ;;  %6938 = vmatprep.subr.mxu1 %v289_v28 }
 0x145   :  { %6994 = vmatpush3.msra.mxu0 %v325_v21  ;;  %6930 = vmatprep.mubr.msk.f32.mxu1 %vm471_vm2, %v8662_v40  ;;  %v8790_v21 = vld [vmem:[#allocation5] sm:$0xff] }
 0x146   :  { %6995 = vmatprep.subr.mxu0 %v319_v17  ;;  %6939 = vmatpush3.msra.mxu1 %v289_v28 }
 0x147   :  { %6996 = vmatpush3.msra.mxu0 %v319_v17  ;;  %6931 = vmatmul.mubr.msk.f32.gmra.mxu1 %vm471_vm2, %v8669_v41 }
 0x148   :  { %6940 = vmatprep.subr.mxu1 %v283_v24  ;;  %6933 = vmatprep.mubr.msk.f32.mxu1 %vm471_vm2, %v8676_v42 }
 0x149   :  { %6941 = vmatpush3.msra.mxu1 %v283_v24  ;;  %6968 = vmatprep.mubr.msk.f32.mxu0 %vm471_vm2, %v8681_v44 }
 0x14a   :  { %6942 = vmatprep.subr.mxu1 %v8637_v20  ;;  %6969 = vmatmul.mubr.msk.f32.gmra.mxu0 %vm471_vm2, %v8688_v45 }
 0x14b   :  { %6943 = vmatpush3.msra.mxu1 %v8637_v20  ;;  %6971 = vmatprep.mubr.msk.f32.mxu0 %vm471_vm2, %v8695_v46 }
 0x14c   :  { %6934 = vmatmul.mubr.msk.f32.gmra.mxu1 %vm471_vm2, %v8700_v47  ;;  %6944 = vmatprep.subr.mxu1 %v8633_v16 }
 0x14d   :  { %6945 = vmatpush3.msra.mxu1 %v8633_v16  ;;  %6946 = vmatprep.mubr.msk.f32.mxu1 %vm471_vm2, %v445_v49  ;;  %v8788_v16 = vld [vmem:[#allocation5 + $0x8] sm:$0xff] }
 0x14e   :  { %6974 = vmatprep.subr.mxu1 %v8639_v23  ;;  %6972 = vmatmul.mubr.msk.f32.gmra.mxu0 %vm471_vm2, %v8716_v50 }
 0x14f   :  { %6997 = vmatprep.subr.mxu0 %v313_v52  ;;  %7003 = vmatprep.mubr.msk.f32.mxu0 %vm471_vm2, %v445_v49 }
 0x150   :  { %6947 = vmatmul.mubr.msk.f32.vlgmr.msra.gmra.mxu1 %vm471_vm2, %v446_v51  ;;  %6998 = vmatpush3.msra.mxu0 %v313_v52 }
 0x151   :  { %6975 = vmatpush3.msra.mxu1 %v8639_v23  ;;  %6949 = vmatprep.mubr.msk.f32.mxu1 %vm471_vm2, %v447_v53 }
 0x152   :  { %6976 = vmatprep.subr.mxu1 %v8635_v19  ;;  %6999 = vmatprep.subr.mxu0 %v307_v43 }
 0x153   :  { %6977 = vmatpush3.msra.mxu1 %v8635_v19  ;;  %7000 = vmatpush3.msra.mxu0 %v307_v43 }
 0x154   :  { %6950 = vmatmul.mubr.msk.f32.gmra.mxu1 %vm471_vm2, %v448_v56  ;;  %6978 = vmatprep.subr.mxu1 %v315_v55 }
 0x155   :  { %6979 = vmatpush3.msra.mxu1 %v315_v55  ;;  %6952 = vmatprep.mubr.msk.f32.mxu1 %vm471_vm2, %v449_v57 }
 0x156   :  { %6980 = vmatprep.subr.mxu1 %v309_v48  ;;  %7001 = vmatprep.subr.mxu0 %v8643_v36 }
 0x157   :  { %6981 = vmatpush3.msra.mxu1 %v309_v48  ;;  %7002 = vmatpush3.msra.mxu0 %v8643_v36 }
 0x158   :  { %6953 = vmatmul.mubr.msk.f32.gmra.mxu1 %vm471_vm2, %v450_v59  ;;  %6982 = vmatprep.subr.mxu1 %v8655_v39 }
 0x159   :  { %6983 = vmatpush3.msra.mxu1 %v8655_v39  ;;  %6984 = vmatprep.mubr.msk.f32.mxu1 %vm471_vm2, %v8622_v14 }
 0x15a   :  { %7012 = vmatprep.subr.mxu1 %v6916_v60  ;;  %7004 = vmatmul.mubr.msk.f32.vlgmr.msra.gmra.mxu0 %vm471_vm2, %v446_v51 }
 0x15b   :  { %7006 = vmatprep.mubr.msk.f32.mxu0 %vm471_vm2, %v447_v53  ;;  %1239 = vmatprep.subr.mxu0 %v1172_v62 }
 0x15c   :  { %6985 = vmatmul.mubr.msk.f32.vlgmr.msra.gmra.mxu1 %vm471_vm2, %v8648_v37  ;;  %1240 = vmatpush1.msra.mxu0 %v1171_v63  ;;  %v8797_v37 = vld [vmem:[#allocation5 + $0x10] sm:$0xff] }
 0x15d   :  { %7013 = vmatpush3.msra.mxu1 %v6916_v60  ;;  %6987 = vmatprep.mubr.msk.f32.mxu1 %vm471_vm2, %v8662_v40  ;;  %v8799_v40 = vld [vmem:[#allocation5 + $0x28] sm:$0xff] }
 0x15e   :  { %7014 = vmatprep.subr.mxu1 %v436_v61  ;;  %7007 = vmatmul.mubr.msk.f32.gmra.mxu0 %vm471_vm2, %v448_v56 }
 0x15f   :  { %7015 = vmatpush3.msra.mxu1 %v436_v61  ;;  %7009 = vmatprep.mubr.msk.f32.mxu0 %vm471_vm2, %v449_v57 }
 0x160   :  { %7016 = vmatprep.subr.mxu1 %v6913_v54  ;;  %6988 = vmatmul.mubr.msk.f32.gmra.mxu1 %vm471_vm2, %v8669_v41 }
 0x161   :  { %7017 = vmatpush3.msra.mxu1 %v6913_v54  ;;  %6990 = vmatprep.mubr.msk.f32.mxu1 %vm471_vm2, %v8676_v42 }
 0x162   :  { %7018 = vmatprep.subr.mxu1 %v426_v58  ;;  %7010 = vmatmul.mubr.msk.f32.gmra.mxu0 %vm471_vm2, %v450_v59 }
 0x163   :  { %7019 = vmatpush3.msra.mxu1 %v426_v58  ;;  %1275 = vmatprep.mubr.f32.mxu0 %v8445_v0 }
 0x164   :  { %7020 = vmatprep.subr.mxu1 %v8641_v33  ;;  %6991 = vmatmul.mubr.msk.f32.gmra.mxu1 %vm471_vm2, %v8700_v47  ;;  %v8802_v47 = vld [vmem:[#allocation5 + $0x20] sm:$0xff] }
 0x165   :  { %7021 = vmatpush3.msra.mxu1 %v8641_v33  ;;  %7022 = vmatprep.mubr.msk.f32.mxu1 %vm471_vm2, %v8629_v15 }
 0x166   :  { %7031 = vmatprep.subr.mxu1 %v1173_v1  ;;  %1241 = vmatprep.subr.mxu0 %v1169_v2 }
 0x167   :  { %1242 = vmatpush1.msra.mxu0 %v1168_v3 }
 0x168   :  { %7023 = vmatmul.mubr.msk.f32.vlgmr.msra.gmra.mxu1 %vm471_vm2, %v8653_v38  ;;  %7098 = vmatprep.subr.mxu0 %v8445_v0 }
 0x169   :  { %7025 = vmatprep.mubr.msk.f32.mxu1 %vm471_vm2, %v8681_v44  ;;  %7032 = vmatpush3.msra.mxu1 %v1173_v1 }
 0x16a   :  { %7033 = vmatprep.subr.mxu1 %v1170_v4 }
 0x16b   :  { %7034 = vmatpush3.msra.mxu1 %v1170_v4 }
 0x16c   :  { %7026 = vmatmul.mubr.msk.f32.gmra.mxu1 %vm471_vm2, %v8688_v45  ;;  %7053 = vmatprep.subr.mxu1 %v8445_v0 }
 0x16d   :  { %7028 = vmatprep.mubr.msk.f32.mxu1 %vm471_vm2, %v8695_v46 }
 0x170   :  { %7029 = vmatmul.mubr.msk.f32.gmra.mxu1 %vm471_vm2, %v8716_v50 }
 0x202   :  { %v6929_v5 = vpop.f32.mrf.mxu1 }
 0x204   :  { %v556_v6 = vpop.f32.mrf.mxu1  ;;  %v6967_v8 = vpop.f32.mrf.mxu0 }
 0x206   :  { %v782_v11 = vpop.f32.mrf.mxu0 }
 0x207   :  { %v6932_v7 = vpop.f32.mrf.mxu1 }
 0x209   :  { %v566_v9 = vpop.f32.mrf.mxu1 }
 0x20a   :  { %v6970_v13 = vpop.f32.mrf.mxu0 }
 0x20c   :  { %v6935_v10 = vpop.f32.mrf.mxu1  ;;  %v792_v18 = vpop.f32.mrf.mxu0 }
 0x20e   :  { %v576_v12 = vpop.f32.mrf.mxu1  ;;  %v6973_v28 = vpop.f32.mrf.mxu0 }
 0x210   :  { %v6948_v14 = vpop.f32.mrf.mxu1  ;;  %v802_v41 = vpop.f32.mrf.mxu0 }
 0x211   :  { %v675_v15 = vadd.f32 %v6948_v14, %v6929_v5 }
 0x212   :  { %v669_v17 = vpop.f32.mrf.mxu1 }
 0x213   :  { %v812_v19 = vadd.f32 %v6967_v8, %v675_v15  ;;  %v670_v20 = vadd.f32 %v669_v17, %v556_v6 }
 0x214   :  { %v6951_v22 = vpop.f32.mrf.mxu1 }
 0x215   :  { %v818_v23 = vadd.f32 %v812_v19, %v8788_v16  ;;  %v811_v24 = vadd.f32 %v782_v11, %v670_v20  ;;  %v685_v25 = vadd.f32 %v6951_v22, %v6932_v7 }
 0x216   :  { %v679_v26 = vpop.f32.mrf.mxu1 }
 0x217   :  { %v817_v29 = vadd.f32 %v811_v24, %v8790_v21  ;;  %v680_v30 = vadd.f32 %v679_v26, %v566_v9  ;;  %v814_v31 = vadd.f32 %v6970_v13, %v685_v25  ;;  %v824_v32 = vmul.f32 0.01, %v818_v23 }
 0x218   :  { %v6954_v33 = vpop.f32.mrf.mxu1 }
 0x219   :  { %v823_v34 = vmul.f32 0.01, %v817_v29  ;;  %v820_v35 = vadd.f32 %v814_v31, %v8793_v27  ;;  %v695_v36 = vadd.f32 %v6954_v33, %v6935_v10  ;;  %v813_v38 = vadd.f32 %v792_v18, %v680_v30 }
 0x21a   :  { %v689_v39 = vpop.f32.mrf.mxu1  ;;  %v830_v45 = vmax.f32 %v818_v23, %v824_v32  ;;  %v7005_v49 = vpop.f32.mrf.mxu0 }
 0x21b   :  { %v829_v42 = vmax.f32 %v817_v29, %v823_v34  ;;  %v690_v43 = vadd.f32 %v689_v39, %v576_v12  ;;  %v816_v44 = vadd.f32 %v6973_v28, %v695_v36  ;;  %v819_v46 = vadd.f32 %v813_v38, %v8797_v37 }
 0x21c   :  { %v6986_v48 = vpop.f32.mrf.mxu1  ;;  %v826_v50 = vmul.f32 0.01, %v820_v35  ;;  %v1002_v58 = vpop.f32.mrf.mxu0 }
 0x21d   :  { %v822_v51 = vadd.f32 %v816_v44, %v8799_v40  ;;  %v815_v52 = vadd.f32 %v802_v41, %v690_v43  ;;  %5874 = vmatmul.mubr.msk.f32.vlgmr.msra.gmra.mxu0 %vm1174_vm3, %v829_v42  ;;  %7035 = vmatprep.mubr.msk.f32.mxu1 %vm1174_vm3, %v829_v42  ;;  %v825_v53 = vmul.f32 0.01, %v819_v46  ;;  %v1008_v4 = vadd.f32 %v7005_v49, %v6986_v48 }
 0x21e   :  { %7036 = vmatmul.mubr.msk.f32.vlgmr.msra.gmra.mxu1 %vm1174_vm3, %v830_v45  ;;  %1281 = vmatprep.mubr.f32.mxu0 %v8445_v0  ;;  %v907_v54 = vpop.f32.mrf.mxu1  ;;  %v832_v59 = vmax.f32 %v820_v35, %v826_v50  ;;  %v7008_v63 = vpop.f32.mrf.mxu0 }
 0x21f   :  { %v821_v55 = vadd.f32 %v815_v52, %v8802_v47  ;;  %v831_v56 = vmax.f32 %v819_v46, %v825_v53  ;;  %v828_v60 = vmul.f32 0.01, %v822_v51  ;;  %v1003_v7 = vadd.f32 %v1002_v58, %v907_v54 }
 0x220   :  { %v6989_v57 = vpop.f32.mrf.mxu1  ;;  %v1012_v6 = vpop.f32.mrf.mxu0 }
 0x221   :  { %v827_v61 = vmul.f32 0.01, %v821_v55  ;;  %5875 = vmatmul.mubr.msk.f32.gmra.mxu0 %vm1174_vm3, %v830_v45  ;;  %7038 = vmatprep.mubr.msk.f32.mxu1 %vm1174_vm3, %v831_v56  ;;  %v834_v3 = vmax.f32 %v822_v51, %v828_v60  ;;  %v1018_v11 = vadd.f32 %v7008_v63, %v6989_v57  ;;  %v8871_v63 = vld [vmem:[%s11639_s4] sm:$0xff] }
 0x222   :  { %1287 = vmatprep.mubr.f32.mxu0 %v8445_v0  ;;  %v917_v62 = vpop.f32.mrf.mxu1  ;;  %7039 = vmatmul.mubr.msk.f32.gmra.mxu1 %vm1174_vm3, %v832_v59  ;;  %v7011_v9 = vpop.f32.mrf.mxu0 }
 0x223   :  { %v833_v1 = vmax.f32 %v821_v55, %v827_v61  ;;  %v1013_v15 = vadd.f32 %v1012_v6, %v917_v62 }
 0x224   :  { %v6992_v2 = vpop.f32.mrf.mxu1  ;;  %v1022_v18 = vpop.f32.mrf.mxu0 }
 0x225   :  { %5876 = vmatmul.mubr.msk.f32.gmra.mxu0 %vm1174_vm3, %v831_v56  ;;  %7041 = vmatprep.mubr.msk.f32.mxu1 %vm1174_vm3, %v833_v1  ;;  %v1028_v22 = vadd.f32 %v7011_v9, %v6992_v2  ;;  %v8880_v2 = vld [vmem:[%s11639_s4 + $0x58] sm:$0xff] }
 0x226   :  { %1293 = vmatprep.mubr.f32.mxu0 %v8445_v0  ;;  %v927_v5 = vpop.f32.mrf.mxu1  ;;  %7042 = vmatmul.mubr.msk.f32.gmra.mxu1 %vm1174_vm3, %v834_v3 }
 0x227   :  { %v1023_v29 = vadd.f32 %v1022_v18, %v927_v5  ;;  %v8892_v5 = vld [vmem:[%s11639_s4 + $0x8] sm:$0xff] }
 0x228   :  { %v7024_v8 = vpop.f32.mrf.mxu1 }
 0x229   :  { %5877 = vmatmul.mubr.msk.f32.gmra.mxu0 %vm1174_vm3, %v832_v59  ;;  %v1127_v10 = vadd.f32 %v7024_v8, %v1008_v4 }
 0x22a   :  { %1299 = vmatprep.mubr.f32.mxu0 %v8445_v0  ;;  %v1097_v12 = vpop.f32.mrf.mxu1 }
 0x22b   :  { %v1133_v13 = vadd.f32 %v1127_v10, %v8788_v16  ;;  %v1126_v14 = vadd.f32 %v1097_v12, %v1003_v7  ;;  %v8902_v7 = vld [vmem:[%s11639_s4 + $0x60] sm:$0xff]  ;;  %v8914_v10 = vld [vmem:[%s11639_s4 + $0x10] sm:$0xff]  ;;  %v8924_v12 = vld [vmem:[%s11639_s4 + $0x68] sm:$0xff] }
 0x22c   :  { %v7027_v17 = vpop.f32.mrf.mxu1 }
 0x22d   :  { %5878 = vmatmul.mubr.msk.f32.gmra.mxu0 %vm1174_vm3, %v833_v1  ;;  %v1132_v19 = vadd.f32 %v1126_v14, %v8790_v21  ;;  %v1129_v20 = vadd.f32 %v7027_v17, %v1018_v11  ;;  %v1139_v23 = vmul.f32 0.01, %v1133_v13  ;;  %v8936_v14 = vld [vmem:[%s11639_s4 + $0x18] sm:$0xff]  ;;  %v8947_v17 = vld [vmem:[%s11639_s4 + $0x70] sm:$0xff] }
 0x22e   :  { %1305 = vmatprep.mubr.f32.mxu0 %v8445_v0  ;;  %v1107_v24 = vpop.f32.mrf.mxu1 }
 0x22f   :  { %v1138_v25 = vmul.f32 0.01, %v1132_v19  ;;  %v1135_v26 = vadd.f32 %v1129_v20, %v8793_v27  ;;  %v1128_v28 = vadd.f32 %v1107_v24, %v1013_v15  ;;  %v1145_v33 = vmax.f32 %v1133_v13, %v1139_v23  ;;  %v8980_v23 = vld [vmem:[%s11639_s4 + $0x28] sm:$0xff]  ;;  %v8990_v24 = vld [vmem:[%s11639_s4 + $0x80] sm:$0xff] }
 0x230   :  { %v7030_v16 = vpop.f32.mrf.mxu1 }
 0x231   :  { %5879 = vmatmul.mubr.msk.f32.gmra.mxu0 %vm1174_vm3, %v834_v3  ;;  %v1144_v30 = vmax.f32 %v1132_v19, %v1138_v25  ;;  %v1134_v31 = vadd.f32 %v1128_v28, %v8797_v37  ;;  %v1131_v32 = vadd.f32 %v7030_v16, %v1028_v22  ;;  %v1141_v21 = vmul.f32 0.01, %v1135_v26  ;;  %v8960_v19 = vld [vmem:[%s11639_s4 + $0x20] sm:$0xff]  ;;  %v8970_v22 = vld [vmem:[%s11639_s4 + $0x78] sm:$0xff]  ;;  %v9000_v25 = vld [vmem:[%s11639_s4 + $0x30] sm:$0xff] }
 0x232   :  { %1311 = vmatprep.mubr.f32.mxu0 %v8445_v0  ;;  %v1117_v34 = vpop.f32.mrf.mxu1  ;;  %v9032_v16 = vld [vmem:[%s11639_s4 + $0x90] sm:$0xff] }
 0x233   :  { %v1140_v35 = vmul.f32 0.01, %v1134_v31  ;;  %v1137_v36 = vadd.f32 %v1131_v32, %v8799_v40  ;;  %v1130_v38 = vadd.f32 %v1117_v34, %v1023_v29  ;;  %7044 = vmatprep.mubr.msk.f32.mxu1 %vm1174_vm3, %v1144_v30  ;;  %v1147_v37 = vmax.f32 %v1135_v26, %v1141_v21  ;;  %v9010_v26 = vld [vmem:[%s11639_s4 + $0x88] sm:$0xff]  ;;  %v9021_v29 = vld [vmem:[%s11639_s4 + $0x38] sm:$0xff]  ;;  %v9069_v34 = vld [vmem:[%s11639_s4 + $0xa0] sm:$0xff] }
 0x234   :  { %7045 = vmatmul.mubr.msk.f32.gmra.mxu1 %vm1174_vm3, %v1145_v33  ;;  %v9051_v32 = vld [vmem:[%s11639_s4 + $0x98] sm:$0xff]  ;;  %v9060_v21 = vld [vmem:[%s11639_s4 + $0x48] sm:$0xff] }
 0x235   :  { %v1146_v27 = vmax.f32 %v1134_v31, %v1140_v35  ;;  %5880 = vmatmul.mubr.msk.f32.gmra.mxu0 %vm1174_vm3, %v1144_v30  ;;  %v1136_v39 = vadd.f32 %v1130_v38, %v8802_v47  ;;  %v1143_v41 = vmul.f32 0.01, %v1137_v36  ;;  %v9042_v31 = vld [vmem:[%s11639_s4 + $0x40] sm:$0xff]  ;;  %v9087_v38 = vld [vmem:[%s11639_s4 + $0xa8] sm:$0xff] }
 0x236   :  { %1317 = vmatprep.mubr.f32.mxu0 %v8445_v0 }
 0x237   :  { %v1142_v42 = vmul.f32 0.01, %v1136_v39  ;;  %7047 = vmatprep.mubr.msk.f32.mxu1 %vm1174_vm3, %v1146_v27  ;;  %v1149_v43 = vmax.f32 %v1137_v36, %v1143_v41  ;;  %v9078_v36 = vld [vmem:[%s11639_s4 + $0x50] sm:$0xff]  ;;  %v9115_v41 = vld [vmem:[%s11639_s4 + $0xb8] sm:$0xff] }
 0x238   :  { %7048 = vmatmul.mubr.msk.f32.gmra.mxu1 %vm1174_vm3, %v1147_v37 }
 0x239   :  { %5881 = vmatmul.mubr.msk.f32.gmra.mxu0 %vm1174_vm3, %v1145_v33  ;;  %v1148_v40 = vmax.f32 %v1136_v39, %v1142_v42  ;;  %v9100_v39 = vld [vmem:[%s11639_s4 + $0xb0] sm:$0xff]  ;;  %v9133_v42 = vld [vmem:[%s11639_s4 + $0xc0] sm:$0xff] }
 0x23a   :  { %1323 = vmatprep.mubr.f32.mxu0 %v8445_v0 }
 0x23b   :  { %7050 = vmatprep.mubr.msk.f32.mxu1 %vm1174_vm3, %v1148_v40 }
 0x23c   :  { %7051 = vmatmul.mubr.msk.f32.gmra.mxu1 %vm1174_vm3, %v1149_v43 }
 0x23d   :  { %5882 = vmatmul.mubr.msk.f32.gmra.mxu0 %vm1174_vm3, %v1146_v27  ;;  %7065 = vmatprep.mubr.msk.f32.mxu1 %vm8446_vm4, %v8445_v0 }
 0x23e   :  { %1329 = vmatprep.mubr.f32.mxu0 %v8445_v0 }
 0x241   :  { %5883 = vmatmul.mubr.msk.f32.gmra.mxu0 %vm1174_vm3, %v1147_v37 }
 0x242   :  { %1335 = vmatprep.mubr.f32.mxu0 %v8445_v0 }
 0x245   :  { %5884 = vmatmul.mubr.msk.f32.gmra.mxu0 %vm1174_vm3, %v1148_v40  ;;  %v5912_v40 = vld [vmem:[%s11639_s4 + $0xc8] sm:$0xff] }
 0x246   :  { %1341 = vmatprep.mubr.f32.mxu0 %v8445_v0 }
 0x249   :  { %5885 = vmatmul.mubr.msk.f32.gmra.mxu0 %vm1174_vm3, %v1149_v43  ;;  %v5913_v43 = vld [vmem:[%s11639_s4 + $0xd0] sm:$0xff] }
 0x24a   :  { %7110 = vmatprep.mubr.msk.f32.mxu0 %vm8446_vm4, %v8445_v0 }
 0x2dd   :  { %v1277_v44 = vpop.f32.mrf.mxu0 }
 0x2de   :  { %v8851_v52 = vpop.f32.mrf.mxu1 }
 0x2df   :  { %v1279_v45 = vpop.f32.mrf.mxu0 }
 0x2e0   :  { %v8853_v55 = vpop.f32.mrf.mxu1 }
 0x2e1   :  { %v1283_v46 = vpop.f32.mrf.mxu0 }
 0x2e2   :  { %v7040_v58 = vpop.f32.mrf.mxu1 }
 0x2e3   :  { %v1285_v47 = vpop.f32.mrf.mxu0 }
 0x2e4   :  { %v1424_v61 = vpop.f32.mrf.mxu1 }
 0x2e5   :  { %v1289_v48 = vpop.f32.mrf.mxu0 }
 0x2e6   :  { %v7043_v3 = vpop.f32.mrf.mxu1 }
 0x2e7   :  { %v1291_v49 = vpop.f32.mrf.mxu0 }
 0x2e8   :  { %v1434_v8 = vpop.f32.mrf.mxu1 }
 0x2e9   :  { %v1295_v50 = vpop.f32.mrf.mxu0 }
 0x2eb   :  { %v1297_v51 = vpop.f32.mrf.mxu0 }
 0x2ed   :  { %v1301_v53 = vpop.f32.mrf.mxu0 }
 0x2ef   :  { %v1303_v54 = vpop.f32.mrf.mxu0 }
 0x2f1   :  { %v1307_v56 = vpop.f32.mrf.mxu0 }
 0x2f2   :  { %7099 = vmatpush3.msra.mxu0 %v1307_v56  ;;  %v2471_v56 = vld [vmem:[#allocation10] sm:$0xff] }
 0x2f3   :  { %v1309_v57 = vpop.f32.mrf.mxu0  ;;  %7100 = vmatprep.subr.mxu0 %v8445_v0 }
 0x2f4   :  { %7054 = vmatpush3.msra.mxu1 %v1309_v57  ;;  %7101 = vmatpush3.msra.mxu0 %v1301_v53  ;;  %v7046_v28 = vpop.f32.mrf.mxu1  ;;  %v2474_v53 = vld [vmem:[#allocation10 + $0x18] sm:$0xff]  ;;  %v2476_v57 = vld [vmem:[#allocation10 + $0x28] sm:$0xff] }
 0x2f5   :  { %7055 = vmatprep.subr.mxu1 %v8445_v0  ;;  %7102 = vmatprep.subr.mxu0 %v8445_v0  ;;  %v8858_v59 = vpop.f32.mrf.mxu0 }
 0x2f6   :  { %7056 = vmatpush3.msra.mxu1 %v1303_v54  ;;  %7103 = vmatpush3.msra.mxu0 %v1295_v50  ;;  %v1444_v30 = vpop.f32.mrf.mxu1  ;;  %v2478_v50 = vld [vmem:[#allocation10 + $0x38] sm:$0xff]  ;;  %v2472_v54 = vld [vmem:[#allocation10 + $0x8] sm:$0xff] }
 0x2f7   :  { %7057 = vmatprep.subr.mxu1 %v8445_v0  ;;  %7104 = vmatprep.subr.mxu0 %v8445_v0  ;;  %v8862_v60 = vpop.f32.mrf.mxu0 }
 0x2f8   :  { %7058 = vmatpush3.msra.mxu1 %v1297_v51  ;;  %7105 = vmatpush3.msra.mxu0 %v1289_v48  ;;  %v7049_v33 = vpop.f32.mrf.mxu1  ;;  %v9217_v48 = vld [vmem:[%s11639_s4 + $0xf8] sm:$0xff] }
 0x2f9   :  { %7059 = vmatprep.subr.mxu1 %v8445_v0  ;;  %7106 = vmatprep.subr.mxu0 %v8445_v0  ;;  %v8866_v62 = vpop.f32.mrf.mxu0  ;;  %v2477_v51 = vld [vmem:[#allocation10 + $0x30] sm:$0xff] }
 0x2fa   :  { %7060 = vmatpush3.msra.mxu1 %v1291_v49  ;;  %7107 = vmatpush3.msra.mxu0 %v1283_v46  ;;  %v1454_v35 = vpop.f32.mrf.mxu1  ;;  %v9191_v46 = vld [vmem:[%s11639_s4 + $0xe8] sm:$0xff]  ;;  %v9230_v49 = vld [vmem:[%s11639_s4 + $0x100] sm:$0xff] }
 0x2fb   :  { %7061 = vmatprep.subr.mxu1 %v8445_v0  ;;  %7108 = vmatprep.subr.mxu0 %v8445_v0  ;;  %v8875_v1 = vpop.f32.mrf.mxu0 }
 0x2fc   :  { %7062 = vmatpush3.msra.mxu1 %v1285_v47  ;;  %7109 = vmatpush3.msra.mxu0 %v1277_v44  ;;  %v7052_v27 = vpop.f32.mrf.mxu1  ;;  %v5914_v44 = vld [vmem:[%s11639_s4 + $0xd8] sm:$0xff]  ;;  %v9204_v47 = vld [vmem:[%s11639_s4 + $0xf0] sm:$0xff] }
 0x2fd   :  { %7063 = vmatprep.subr.mxu1 %v8445_v0  ;;  %7111 = vmatmul.mubr.msk.f32.vlgmr.msra.gmra.mxu0 %vm1519_vm5, %v8871_v63  ;;  %v8885_v4 = vpop.f32.mrf.mxu0 }
 0x2fe   :  { %7064 = vmatpush3.msra.mxu1 %v1279_v45  ;;  %7113 = vmatprep.mubr.msk.f32.mxu0 %vm8446_vm4, %v8445_v0  ;;  %v1464_v37 = vpop.f32.mrf.mxu1  ;;  %v5915_v45 = vld [vmem:[%s11639_s4 + $0xe0] sm:$0xff] }
 0x2ff   :  { %7066 = vmatmul.mubr.msk.f32.vlgmr.msra.gmra.mxu1 %vm1519_vm5, %v8880_v2  ;;  %7143 = vmatprep.subr.mxu1 %v8445_v0  ;;  %v1327_v6 = vpop.f32.mrf.mxu0 }
 0x300   :  { %7144 = vmatpush3.msra.mxu1 %v7043_v3  ;;  %7068 = vmatprep.mubr.msk.f32.mxu1 %vm8446_vm4, %v8445_v0 }
 0x301   :  { %7114 = vmatmul.mubr.msk.f32.gmra.mxu0 %vm1519_vm5, %v8892_v5  ;;  %7145 = vmatprep.subr.mxu1 %v8445_v0  ;;  %v8907_v9 = vpop.f32.mrf.mxu0 }
 0x302   :  { %7146 = vmatpush3.msra.mxu1 %v1434_v8  ;;  %7116 = vmatprep.mubr.msk.f32.mxu0 %vm8446_vm4, %v8445_v0 }
 0x303   :  { %7069 = vmatmul.mubr.msk.f32.gmra.mxu1 %vm1519_vm5, %v8902_v7  ;;  %7147 = vmatprep.subr.mxu1 %v8445_v0  ;;  %v1333_v11 = vpop.f32.mrf.mxu0 }
 0x304   :  { %7148 = vmatpush3.msra.mxu1 %v7040_v58  ;;  %7071 = vmatprep.mubr.msk.f32.mxu1 %vm8446_vm4, %v8445_v0  ;;  %v2473_v58 = vld [vmem:[#allocation10 + $0x10] sm:$0xff] }
 0x305   :  { %7117 = vmatmul.mubr.msk.f32.gmra.mxu0 %vm1519_vm5, %v8914_v10  ;;  %7149 = vmatprep.subr.mxu1 %v8445_v0  ;;  %v8929_v13 = vpop.f32.mrf.mxu0 }
 0x306   :  { %7150 = vmatpush3.msra.mxu1 %v1424_v61  ;;  %7119 = vmatprep.mubr.msk.f32.mxu0 %vm8446_vm4, %v8445_v0 }
 0x307   :  { %7072 = vmatmul.mubr.msk.f32.gmra.mxu1 %vm1519_vm5, %v8924_v12  ;;  %7151 = vmatprep.subr.mxu1 %v8445_v0  ;;  %v1339_v15 = vpop.f32.mrf.mxu0 }
 0x308   :  { %7152 = vmatpush3.msra.mxu1 %v8851_v52  ;;  %7074 = vmatprep.mubr.msk.f32.mxu1 %vm8446_vm4, %v8445_v0  ;;  %v2475_v52 = vld [vmem:[#allocation10 + $0x20] sm:$0xff] }
 0x309   :  { %7120 = vmatmul.mubr.msk.f32.gmra.mxu0 %vm1519_vm5, %v8936_v14  ;;  %7153 = vmatprep.subr.mxu1 %v8445_v0  ;;  %v8952_v18 = vpop.f32.mrf.mxu0 }
 0x30a   :  { %7154 = vmatpush3.msra.mxu1 %v8853_v55  ;;  %7122 = vmatprep.mubr.msk.f32.mxu0 %vm8446_vm4, %v8445_v0  ;;  %v2479_v55 = vld [vmem:[#allocation10 + $0x40] sm:$0xff] }
 0x30b   :  { %7075 = vmatmul.mubr.msk.f32.gmra.mxu1 %vm1519_vm5, %v8947_v17  ;;  %v1345_v20 = vpop.f32.mrf.mxu0  ;;  %7188 = vmatprep.subr.mxu0 %v8445_v0 }
 0x30c   :  { %7077 = vmatprep.mubr.msk.f32.mxu1 %vm8446_vm4, %v8445_v0  ;;  %7189 = vmatpush3.msra.mxu0 %v1345_v20 }
 0x30d   :  { %7123 = vmatmul.mubr.msk.f32.gmra.mxu0 %vm1519_vm5, %v8960_v19  ;;  %7190 = vmatprep.subr.mxu0 %v8445_v0 }
 0x30e   :  { %7125 = vmatprep.mubr.msk.f32.mxu0 %vm8446_vm4, %v8445_v0  ;;  %7191 = vmatpush3.msra.mxu0 %v1339_v15 }
 0x30f   :  { %7078 = vmatmul.mubr.msk.f32.gmra.mxu1 %vm1519_vm5, %v8970_v22  ;;  %7192 = vmatprep.subr.mxu0 %v8445_v0 }
 0x310   :  { %7080 = vmatprep.mubr.msk.f32.mxu1 %vm8446_vm4, %v8445_v0  ;;  %7193 = vmatpush3.msra.mxu0 %v1333_v11 }
 0x311   :  { %7126 = vmatmul.mubr.msk.f32.gmra.mxu0 %vm1519_vm5, %v8980_v23  ;;  %7194 = vmatprep.subr.mxu0 %v8445_v0 }
 0x312   :  { %7128 = vmatprep.mubr.msk.f32.mxu0 %vm8446_vm4, %v8445_v0  ;;  %7195 = vmatpush3.msra.mxu0 %v1327_v6 }
 0x313   :  { %7081 = vmatmul.mubr.msk.f32.gmra.mxu1 %vm1519_vm5, %v8990_v24  ;;  %7196 = vmatprep.subr.mxu0 %v8445_v0 }
 0x314   :  { %7083 = vmatprep.mubr.msk.f32.mxu1 %vm8446_vm4, %v8445_v0  ;;  %7197 = vmatpush3.msra.mxu0 %v8875_v1 }
 0x315   :  { %7129 = vmatmul.mubr.msk.f32.gmra.mxu0 %vm1519_vm5, %v9000_v25  ;;  %7198 = vmatprep.subr.mxu0 %v8445_v0 }
 0x316   :  { %7131 = vmatprep.mubr.msk.f32.mxu0 %vm8446_vm4, %v8445_v0  ;;  %7199 = vmatpush3.msra.mxu0 %v8862_v60 }
 0x317   :  { %7084 = vmatmul.mubr.msk.f32.gmra.mxu1 %vm1519_vm5, %v9010_v26  ;;  %7278 = vmatprep.subr.mxu0 %v8445_v0 }
 0x318   :  { %7086 = vmatprep.mubr.msk.f32.mxu1 %vm8446_vm4, %v8445_v0  ;;  %7233 = vmatprep.subr.mxu1 %v8445_v0 }
 0x319   :  { %7132 = vmatmul.mubr.msk.f32.gmra.mxu0 %vm1519_vm5, %v9021_v29 }
 0x31a   :  { %7134 = vmatprep.mubr.msk.f32.mxu0 %vm8446_vm4, %v8445_v0 }
 0x31b   :  { %7087 = vmatmul.mubr.msk.f32.gmra.mxu1 %vm1519_vm5, %v9032_v16 }
 0x31c   :  { %7089 = vmatprep.mubr.msk.f32.mxu1 %vm8446_vm4, %v8445_v0 }
 0x31d   :  { %7135 = vmatmul.mubr.msk.f32.gmra.mxu0 %vm1519_vm5, %v9042_v31 }
 0x31e   :  { %7137 = vmatprep.mubr.msk.f32.mxu0 %vm8446_vm4, %v8445_v0 }
 0x31f   :  { %7090 = vmatmul.mubr.msk.f32.gmra.mxu1 %vm1519_vm5, %v9051_v32 }
 0x320   :  { %7092 = vmatprep.mubr.msk.f32.mxu1 %vm8446_vm4, %v8445_v0 }
 0x321   :  { %7138 = vmatmul.mubr.msk.f32.gmra.mxu0 %vm1519_vm5, %v9060_v21 }
 0x322   :  { %7140 = vmatprep.mubr.msk.f32.mxu0 %vm8446_vm4, %v8445_v0 }
 0x323   :  { %7093 = vmatmul.mubr.msk.f32.gmra.mxu1 %vm1519_vm5, %v9069_v34 }
 0x324   :  { %7095 = vmatprep.mubr.msk.f32.mxu1 %vm8446_vm4, %v8445_v0 }
 0x325   :  { %7141 = vmatmul.mubr.msk.f32.gmra.mxu0 %vm1519_vm5, %v9078_v36 }
 0x326   :  { %7200 = vmatprep.mubr.msk.f32.mxu0 %vm8446_vm4, %v8445_v0 }
 0x327   :  { %7096 = vmatmul.mubr.msk.f32.gmra.mxu1 %vm1519_vm5, %v9087_v38 }
 0x328   :  { %7155 = vmatprep.mubr.msk.f32.mxu1 %vm8446_vm4, %v8445_v0 }
 0x329   :  { %7201 = vmatmul.mubr.msk.f32.vlgmr.msra.gmra.mxu0 %vm1519_vm5, %v8880_v2 }
 0x32a   :  { %7279 = vmatpush3.msra.mxu0 %v7052_v27  ;;  %7203 = vmatprep.mubr.msk.f32.mxu0 %vm8446_vm4, %v8445_v0 }
 0x32b   :  { %7280 = vmatprep.subr.mxu0 %v8445_v0  ;;  %7156 = vmatmul.mubr.msk.f32.vlgmr.msra.gmra.mxu1 %vm1519_vm5, %v9100_v39 }
 0x32c   :  { %7234 = vmatpush3.msra.mxu1 %v8952_v18  ;;  %7281 = vmatpush3.msra.mxu0 %v1464_v37 }
 0x32d   :  { %7235 = vmatprep.subr.mxu1 %v8445_v0  ;;  %7282 = vmatprep.subr.mxu0 %v8445_v0 }
 0x32e   :  { %7236 = vmatpush3.msra.mxu1 %v8929_v13  ;;  %7283 = vmatpush3.msra.mxu0 %v7049_v33 }
 0x32f   :  { %7158 = vmatprep.mubr.msk.f32.mxu1 %vm8446_vm4, %v8445_v0  ;;  %7237 = vmatprep.subr.mxu1 %v8445_v0 }
 0x330   :  { %7284 = vmatprep.subr.mxu0 %v8445_v0  ;;  %7159 = vmatmul.mubr.msk.f32.gmra.mxu1 %vm1519_vm5, %v9115_v41 }
 0x331   :  { %7238 = vmatpush3.msra.mxu1 %v8907_v9  ;;  %7285 = vmatpush3.msra.mxu0 %v1454_v35 }
 0x332   :  { %7239 = vmatprep.subr.mxu1 %v8445_v0  ;;  %7286 = vmatprep.subr.mxu0 %v8445_v0 }
 0x333   :  { %7204 = vmatmul.mubr.msk.f32.gmra.mxu0 %vm1519_vm5, %v8902_v7  ;;  %7240 = vmatpush3.msra.mxu1 %v8885_v4 }
 0x334   :  { %7287 = vmatpush3.msra.mxu0 %v7046_v28  ;;  %7161 = vmatprep.mubr.msk.f32.mxu1 %vm8446_vm4, %v8445_v0 }
 0x335   :  { %7241 = vmatprep.subr.mxu1 %v8445_v0  ;;  %7288 = vmatprep.subr.mxu0 %v8445_v0 }
 0x336   :  { %7162 = vmatmul.mubr.msk.f32.gmra.mxu1 %vm1519_vm5, %v9133_v42  ;;  %7289 = vmatpush3.msra.mxu0 %v1444_v30 }
 0x337   :  { %7242 = vmatpush3.msra.mxu1 %v8866_v62  ;;  %7206 = vmatprep.mubr.msk.f32.mxu0 %vm8446_vm4, %v8445_v0 }
 0x338   :  { %7243 = vmatprep.subr.mxu1 %v8445_v0  ;;  %7207 = vmatmul.mubr.msk.f32.gmra.mxu0 %vm1519_vm5, %v8924_v12 }
 0x339   :  { %7244 = vmatpush3.msra.mxu1 %v8858_v59  ;;  %7164 = vmatprep.mubr.msk.f32.mxu1 %vm8446_vm4, %v8445_v0 }
 0x33a   :  { %7165 = vmatmul.mubr.msk.f32.gmra.mxu1 %vm1519_vm5, %v5912_v40  ;;  %7209 = vmatprep.mubr.msk.f32.mxu0 %vm8446_vm4, %v8445_v0 }
 0x33b   :  { %7167 = vmatprep.mubr.msk.f32.mxu1 %vm8446_vm4, %v8445_v0  ;;  %2573 = vmatprep.subr.mxu1 %v2478_v50  ;;  %v9360_v50 = vld [vmem:[#allocation8 + $0x8] sm:$0xff] }
 0x33c   :  { %7210 = vmatmul.mubr.msk.f32.gmra.mxu0 %vm1519_vm5, %v8947_v17  ;;  %7323 = vmatprep.subr.mxu0 %v2479_v55 }
 0x33d   :  { %7212 = vmatprep.mubr.msk.f32.mxu0 %vm8446_vm4, %v8445_v0 }
 0x33e   :  { %7168 = vmatmul.mubr.msk.f32.gmra.mxu1 %vm1519_vm5, %v5913_v43 }
 0x33f   :  { %7170 = vmatprep.mubr.msk.f32.mxu1 %vm8446_vm4, %v8445_v0 }
 0x340   :  { %7213 = vmatmul.mubr.msk.f32.gmra.mxu0 %vm1519_vm5, %v8970_v22 }
 0x341   :  { %7215 = vmatprep.mubr.msk.f32.mxu0 %vm8446_vm4, %v8445_v0 }
 0x342   :  { %7171 = vmatmul.mubr.msk.f32.gmra.mxu1 %vm1519_vm5, %v5914_v44 }
 0x343   :  { %7173 = vmatprep.mubr.msk.f32.mxu1 %vm8446_vm4, %v8445_v0 }
 0x344   :  { %7216 = vmatmul.mubr.msk.f32.gmra.mxu0 %vm1519_vm5, %v8990_v24 }
 0x345   :  { %7218 = vmatprep.mubr.msk.f32.mxu0 %vm8446_vm4, %v8445_v0 }
 0x346   :  { %7174 = vmatmul.mubr.msk.f32.gmra.mxu1 %vm1519_vm5, %v5915_v45 }
 0x347   :  { %7176 = vmatprep.mubr.msk.f32.mxu1 %vm8446_vm4, %v8445_v0 }
 0x348   :  { %7219 = vmatmul.mubr.msk.f32.gmra.mxu0 %vm1519_vm5, %v9010_v26 }
 0x349   :  { %7221 = vmatprep.mubr.msk.f32.mxu0 %vm8446_vm4, %v8445_v0 }
 0x34a   :  { %7177 = vmatmul.mubr.msk.f32.gmra.mxu1 %vm1519_vm5, %v9191_v46 }
 0x34b   :  { %7179 = vmatprep.mubr.msk.f32.mxu1 %vm8446_vm4, %v8445_v0 }
 0x34c   :  { %7222 = vmatmul.mubr.msk.f32.gmra.mxu0 %vm1519_vm5, %v9032_v16 }
 0x34d   :  { %7224 = vmatprep.mubr.msk.f32.mxu0 %vm8446_vm4, %v8445_v0 }
 0x34e   :  { %7180 = vmatmul.mubr.msk.f32.gmra.mxu1 %vm1519_vm5, %v9204_v47 }
 0x34f   :  { %7182 = vmatprep.mubr.msk.f32.mxu1 %vm8446_vm4, %v8445_v0 }
 0x350   :  { %7225 = vmatmul.mubr.msk.f32.gmra.mxu0 %vm1519_vm5, %v9051_v32 }
 0x351   :  { %7227 = vmatprep.mubr.msk.f32.mxu0 %vm8446_vm4, %v8445_v0 }
 0x352   :  { %7183 = vmatmul.mubr.msk.f32.gmra.mxu1 %vm1519_vm5, %v9217_v48 }
 0x353   :  { %7185 = vmatprep.mubr.msk.f32.mxu1 %vm8446_vm4, %v8445_v0 }
 0x354   :  { %7228 = vmatmul.mubr.msk.f32.gmra.mxu0 %vm1519_vm5, %v9069_v34 }
 0x355   :  { %7230 = vmatprep.mubr.msk.f32.mxu0 %vm8446_vm4, %v8445_v0 }
 0x356   :  { %7186 = vmatmul.mubr.msk.f32.gmra.mxu1 %vm1519_vm5, %v9230_v49 }
 0x357   :  { %7245 = vmatprep.mubr.msk.f32.mxu1 %vm8446_vm4, %v8445_v0 }
 0x358   :  { %7231 = vmatmul.mubr.msk.f32.gmra.mxu0 %vm1519_vm5, %v9087_v38 }
 0x359   :  { %7290 = vmatprep.mubr.msk.f32.mxu0 %vm8446_vm4, %v8445_v0 }
 0x35a   :  { %7246 = vmatmul.mubr.msk.f32.vlgmr.msra.gmra.mxu1 %vm1519_vm5, %v8871_v63 }
 0x35b   :  { %7248 = vmatprep.mubr.msk.f32.mxu1 %vm8446_vm4, %v8445_v0  ;;  %2574 = vmatpush1.msra.mxu1 %v2477_v51 }
 0x35c   :  { %7291 = vmatmul.mubr.msk.f32.vlgmr.msra.gmra.mxu0 %vm1519_vm5, %v9100_v39  ;;  %2575 = vmatprep.subr.mxu1 %v2475_v52 }
 0x35d   :  { %7293 = vmatprep.mubr.msk.f32.mxu0 %vm8446_vm4, %v8445_v0  ;;  %2576 = vmatpush1.msra.mxu1 %v2474_v53 }
 0x35e   :  { %7249 = vmatmul.mubr.msk.f32.gmra.mxu1 %vm1519_vm5, %v8892_v5  ;;  %2577 = vmatprep.subr.mxu1 %v2472_v54 }
 0x35f   :  { %7251 = vmatprep.mubr.msk.f32.mxu1 %vm8446_vm4, %v8445_v0  ;;  %2578 = vmatpush1.msra.mxu1 %v2471_v56 }
 0x360   :  { %7294 = vmatmul.mubr.msk.f32.gmra.mxu0 %vm1519_vm5, %v9115_v41  ;;  %7417 = vmatprep.subr.mxu1 %v8445_v0 }
 0x361   :  { %7296 = vmatprep.mubr.msk.f32.mxu0 %vm8446_vm4, %v8445_v0  ;;  %7324 = vmatpush3.msra.mxu0 %v2479_v55 }
 0x362   :  { %7252 = vmatmul.mubr.msk.f32.gmra.mxu1 %vm1519_vm5, %v8914_v10  ;;  %7325 = vmatprep.subr.mxu0 %v2476_v57 }
 0x363   :  { %7254 = vmatprep.mubr.msk.f32.mxu1 %vm8446_vm4, %v8445_v0  ;;  %7326 = vmatpush3.msra.mxu0 %v2476_v57 }
 0x364   :  { %7297 = vmatmul.mubr.msk.f32.gmra.mxu0 %vm1519_vm5, %v9133_v42  ;;  %7327 = vmatprep.subr.mxu0 %v2473_v58 }
 0x365   :  { %7299 = vmatprep.mubr.msk.f32.mxu0 %vm8446_vm4, %v8445_v0  ;;  %7328 = vmatpush3.msra.mxu0 %v2473_v58 }
 0x366   :  { %7255 = vmatmul.mubr.msk.f32.gmra.mxu1 %vm1519_vm5, %v8936_v14  ;;  %7362 = vmatprep.subr.mxu0 %v8445_v0 }
 0x367   :  { %7257 = vmatprep.mubr.msk.f32.mxu1 %vm8446_vm4, %v8445_v0 }
 0x368   :  { %7300 = vmatmul.mubr.msk.f32.gmra.mxu0 %vm1519_vm5, %v5912_v40  ;;  %v9357_v40 = vld [vmem:[#allocation8] sm:$0xff] }
 0x369   :  { %7302 = vmatprep.mubr.msk.f32.mxu0 %vm8446_vm4, %v8445_v0 }
 0x36a   :  { %7258 = vmatmul.mubr.msk.f32.gmra.mxu1 %vm1519_vm5, %v8960_v19 }
 0x36b   :  { %7260 = vmatprep.mubr.msk.f32.mxu1 %vm8446_vm4, %v8445_v0 }
 0x36c   :  { %7303 = vmatmul.mubr.msk.f32.gmra.mxu0 %vm1519_vm5, %v5913_v43 }
 0x36d   :  { %7305 = vmatprep.mubr.msk.f32.mxu0 %vm8446_vm4, %v8445_v0 }
 0x36e   :  { %7261 = vmatmul.mubr.msk.f32.gmra.mxu1 %vm1519_vm5, %v8980_v23 }
 0x36f   :  { %7263 = vmatprep.mubr.msk.f32.mxu1 %vm8446_vm4, %v8445_v0 }
 0x370   :  { %7306 = vmatmul.mubr.msk.f32.gmra.mxu0 %vm1519_vm5, %v5914_v44 }
 0x371   :  { %7308 = vmatprep.mubr.msk.f32.mxu0 %vm8446_vm4, %v8445_v0 }
 0x372   :  { %7264 = vmatmul.mubr.msk.f32.gmra.mxu1 %vm1519_vm5, %v9000_v25 }
 0x373   :  { %7266 = vmatprep.mubr.msk.f32.mxu1 %vm8446_vm4, %v8445_v0 }
 0x374   :  { %7309 = vmatmul.mubr.msk.f32.gmra.mxu0 %vm1519_vm5, %v5915_v45 }
 0x375   :  { %7311 = vmatprep.mubr.msk.f32.mxu0 %vm8446_vm4, %v8445_v0 }
 0x376   :  { %7267 = vmatmul.mubr.msk.f32.gmra.mxu1 %vm1519_vm5, %v9021_v29 }
 0x377   :  { %7269 = vmatprep.mubr.msk.f32.mxu1 %vm8446_vm4, %v8445_v0 }
 0x378   :  { %7312 = vmatmul.mubr.msk.f32.gmra.mxu0 %vm1519_vm5, %v9191_v46 }
 0x379   :  { %7314 = vmatprep.mubr.msk.f32.mxu0 %vm8446_vm4, %v8445_v0 }
 0x37a   :  { %7270 = vmatmul.mubr.msk.f32.gmra.mxu1 %vm1519_vm5, %v9042_v31 }
 0x37b   :  { %7272 = vmatprep.mubr.msk.f32.mxu1 %vm8446_vm4, %v8445_v0 }
 0x37c   :  { %7315 = vmatmul.mubr.msk.f32.gmra.mxu0 %vm1519_vm5, %v9204_v47 }
 0x37d   :  { %7317 = vmatprep.mubr.msk.f32.mxu0 %vm8446_vm4, %v8445_v0 }
 0x37e   :  { %7273 = vmatmul.mubr.msk.f32.gmra.mxu1 %vm1519_vm5, %v9060_v21 }
 0x37f   :  { %7275 = vmatprep.mubr.msk.f32.mxu1 %vm8446_vm4, %v8445_v0 }
 0x380   :  { %7318 = vmatmul.mubr.msk.f32.gmra.mxu0 %vm1519_vm5, %v9217_v48 }
 0x381   :  { %7320 = vmatprep.mubr.msk.f32.mxu0 %vm8446_vm4, %v8445_v0 }
 0x382   :  { %7276 = vmatmul.mubr.msk.f32.gmra.mxu1 %vm1519_vm5, %v9078_v36 }
 0x383   :  { %2611 = vmatprep.mubr.f32.mxu1 %v8445_v0 }
 0x384   :  { %7321 = vmatmul.mubr.msk.f32.gmra.mxu0 %vm1519_vm5, %v9230_v49 }
 0x3bd   :  { %v1772_v59 = vpop.f32.mrf.mxu0 }
 0x3bf   :  { %v1619_v60 = vpop.f32.mrf.mxu1  ;;  %v7112_v61 = vpop.f32.mrf.mxu0 }
 0x3c0   :  { %v1773_v42 = vadd.f32 %v1772_v59, %v1619_v60  ;;  %v9368_v60 = vld [vmem:[#allocation8 + $0x10] sm:$0xff] }
 0x3c1   :  { %v7067_v62 = vpop.f32.mrf.mxu1  ;;  %v1777_v63 = vpop.f32.mrf.mxu0 }
 0x3c3   :  { %v1624_v1 = vpop.f32.mrf.mxu1  ;;  %v7115_v2 = vpop.f32.mrf.mxu0 }
 0x3c4   :  { %v1778_v48 = vadd.f32 %v1777_v63, %v1624_v1 }
 0x3c5   :  { %v7070_v3 = vpop.f32.mrf.mxu1  ;;  %v1782_v4 = vpop.f32.mrf.mxu0 }
 0x3c7   :  { %v1629_v5 = vpop.f32.mrf.mxu1  ;;  %v7118_v6 = vpop.f32.mrf.mxu0 }
 0x3c8   :  { %v1783_v57 = vadd.f32 %v1782_v4, %v1629_v5  ;;  %v9375_v4 = vld [vmem:[#allocation8 + $0x18] sm:$0xff] }
 0x3c9   :  { %v7073_v7 = vpop.f32.mrf.mxu1  ;;  %v1787_v8 = vpop.f32.mrf.mxu0 }
 0x3cb   :  { %v1634_v9 = vpop.f32.mrf.mxu1  ;;  %v7121_v10 = vpop.f32.mrf.mxu0 }
 0x3cc   :  { %v1788_v3 = vadd.f32 %v1787_v8, %v1634_v9 }
 0x3cd   :  { %v7076_v11 = vpop.f32.mrf.mxu1  ;;  %v9327_v12 = vpop.f32.mrf.mxu0 }
 0x3cf   :  { %v9329_v13 = vpop.f32.mrf.mxu1  ;;  %v7124_v14 = vpop.f32.mrf.mxu0 }
 0x3d0   :  { %v1793_v8 = vadd.f32 %v9327_v12, %v9329_v13 }
 0x3d1   :  { %v7079_v15 = vpop.f32.mrf.mxu1  ;;  %v9331_v17 = vpop.f32.mrf.mxu0 }
 0x3d3   :  { %v9333_v18 = vpop.f32.mrf.mxu1  ;;  %v7127_v19 = vpop.f32.mrf.mxu0 }
 0x3d4   :  { %v1798_v12 = vadd.f32 %v9331_v17, %v9333_v18 }
 0x3d5   :  { %v7082_v20 = vpop.f32.mrf.mxu1  ;;  %v9335_v22 = vpop.f32.mrf.mxu0 }
 0x3d6   :  { %v9383_v20 = vld [vmem:[#allocation8 + $0x20] sm:$0xff] }
 0x3d7   :  { %v9337_v23 = vpop.f32.mrf.mxu1  ;;  %v7130_v24 = vpop.f32.mrf.mxu0 }
 0x3d8   :  { %v1803_v17 = vadd.f32 %v9335_v22, %v9337_v23 }
 0x3d9   :  { %v7085_v25 = vpop.f32.mrf.mxu1  ;;  %v9339_v26 = vpop.f32.mrf.mxu0 }
 0x3db   :  { %v9341_v28 = vpop.f32.mrf.mxu1  ;;  %v7133_v29 = vpop.f32.mrf.mxu0 }
 0x3dc   :  { %v1808_v22 = vadd.f32 %v9339_v26, %v9341_v28 }
 0x3dd   :  { %v7088_v16 = vpop.f32.mrf.mxu1  ;;  %v9343_v30 = vpop.f32.mrf.mxu0 }
 0x3df   :  { %v9345_v31 = vpop.f32.mrf.mxu1  ;;  %v7136_v32 = vpop.f32.mrf.mxu0 }
 0x3e0   :  { %v1813_v26 = vadd.f32 %v9343_v30, %v9345_v31 }
 0x3e1   :  { %v7091_v33 = vpop.f32.mrf.mxu1  ;;  %v9347_v21 = vpop.f32.mrf.mxu0 }
 0x3e3   :  { %v9349_v34 = vpop.f32.mrf.mxu1  ;;  %v7139_v35 = vpop.f32.mrf.mxu0 }
 0x3e4   :  { %v1818_v30 = vadd.f32 %v9347_v21, %v9349_v34 }
 0x3e5   :  { %v7094_v36 = vpop.f32.mrf.mxu1  ;;  %v9351_v38 = vpop.f32.mrf.mxu0 }
 0x3e6   :  { %v9393_v36 = vld [vmem:[#allocation8 + $0x28] sm:$0xff] }
 0x3e7   :  { %v9353_v27 = vpop.f32.mrf.mxu1  ;;  %v7142_v39 = vpop.f32.mrf.mxu0 }
 0x3e8   :  { %v1823_v21 = vadd.f32 %v9351_v38, %v9353_v27 }
 0x3e9   :  { %v7097_v37 = vpop.f32.mrf.mxu1  ;;  %v9355_v41 = vpop.f32.mrf.mxu0 }
 0x3eb   :  { %v1925_v43 = vpop.f32.mrf.mxu1  ;;  %v7202_v44 = vpop.f32.mrf.mxu0 }
 0x3ec   :  { %v1979_v45 = vadd.f32 %v1925_v43, %v1773_v42 }
 0x3ed   :  { %v7157_v46 = vpop.f32.mrf.mxu1 }
 0x3ee   :  { %v1990_v47 = vadd.f32 %v1979_v45, %v9357_v40 }
 0x3f0   :  { %v2001_v49 = vmul.f32 0.01, %v1990_v47  ;;  %v1930_v51 = vpop.f32.mrf.mxu1 }
 0x3f1   :  { %v1980_v52 = vadd.f32 %v1930_v51, %v1778_v48 }
 0x3f2   :  { %v2012_v53 = vmax.f32 %v1990_v47, %v2001_v49  ;;  %v7160_v54 = vpop.f32.mrf.mxu1  ;;  %v9403_v47 = vld [vmem:[#allocation8 + $0x30] sm:$0xff] }
 0x3f3   :  { %v1991_v55 = vadd.f32 %v1980_v52, %v9360_v50  ;;  %v9363_v56 = vpop.f32.mrf.mxu0 }
 0x3f4   :  { %5986 = vmatmul.mubr.msk.f32.vlgmr.msra.gmra.mxu1 %vm2480_vm6, %v2012_v53  ;;  %7329 = vmatprep.mubr.msk.f32.mxu0 %vm2480_vm6, %v2012_v53 }
 0x3f5   :  { %v2002_v58 = vmul.f32 0.01, %v1991_v55  ;;  %v7205_v59 = vpop.f32.mrf.mxu0  ;;  %2617 = vmatprep.mubr.f32.mxu1 %v8445_v0 }
 0x3f6   :  { %v1935_v61 = vpop.f32.mrf.mxu1 }
 0x3f7   :  { %v2013_v62 = vmax.f32 %v1991_v55, %v2002_v58  ;;  %v1981_v63 = vadd.f32 %v1935_v61, %v1783_v57  ;;  %v9413_v57 = vld [vmem:[#allocation8 + $0x38] sm:$0xff] }
 0x3f8   :  { %v7163_v1 = vpop.f32.mrf.mxu1  ;;  %v9370_v2 = vpop.f32.mrf.mxu0 }
 0x3f9   :  { %v1992_v6 = vadd.f32 %v1981_v63, %v9368_v60  ;;  %5987 = vmatmul.mubr.msk.f32.gmra.mxu1 %vm2480_vm6, %v2013_v62  ;;  %7330 = vmatmul.mubr.msk.f32.vlgmr.msra.gmra.mxu0 %vm2480_vm6, %v2013_v62 }
 0x3fa   :  { %v1940_v5 = vpop.f32.mrf.mxu1  ;;  %v7208_v7 = vpop.f32.mrf.mxu0  ;;  %2623 = vmatprep.mubr.f32.mxu1 %v8445_v0 }
 0x3fb   :  { %v2003_v10 = vmul.f32 0.01, %v1992_v6  ;;  %v1982_v11 = vadd.f32 %v1940_v5, %v1788_v3 }
 0x3fc   :  { %v7166_v14 = vpop.f32.mrf.mxu1  ;;  %v9378_v15 = vpop.f32.mrf.mxu0 }
 0x3fd   :  { %v2014_v9 = vmax.f32 %v1992_v6, %v2003_v10  ;;  %v1993_v19 = vadd.f32 %v1982_v11, %v9375_v4  ;;  %v9423_v6 = vld [vmem:[#allocation8 + $0x40] sm:$0xff] }
 0x3fe   :  { %v1945_v24 = vpop.f32.mrf.mxu1  ;;  %v7211_v25 = vpop.f32.mrf.mxu0 }
 0x3ff   :  { %v2004_v29 = vmul.f32 0.01, %v1993_v19  ;;  %v1983_v16 = vadd.f32 %v1945_v24, %v1793_v8  ;;  %5988 = vmatmul.mubr.msk.f32.gmra.mxu1 %vm2480_vm6, %v2014_v9  ;;  %7332 = vmatprep.mubr.msk.f32.mxu0 %vm2480_vm6, %v2014_v9 }
 0x400   :  { %v7169_v32 = vpop.f32.mrf.mxu1  ;;  %v9387_v33 = vpop.f32.mrf.mxu0  ;;  %2629 = vmatprep.mubr.f32.mxu1 %v8445_v0 }
 0x401   :  { %v2015_v13 = vmax.f32 %v1993_v19, %v2004_v29  ;;  %v1994_v35 = vadd.f32 %v1983_v16, %v9383_v20  ;;  %v9433_v19 = vld [vmem:[#allocation8 + $0x48] sm:$0xff] }
 0x402   :  { %v1950_v39 = vpop.f32.mrf.mxu1  ;;  %v7214_v37 = vpop.f32.mrf.mxu0 }
 0x403   :  { %v2005_v42 = vmul.f32 0.01, %v1994_v35  ;;  %v1984_v43 = vadd.f32 %v1950_v39, %v1798_v12  ;;  %5989 = vmatmul.mubr.msk.f32.gmra.mxu1 %vm2480_vm6, %v2015_v13  ;;  %7333 = vmatmul.mubr.msk.f32.gmra.mxu0 %vm2480_vm6, %v2015_v13 }
 0x404   :  { %v7172_v44 = vpop.f32.mrf.mxu1  ;;  %v9397_v45 = vpop.f32.mrf.mxu0  ;;  %2635 = vmatprep.mubr.f32.mxu1 %v8445_v0 }
 0x405   :  { %v2016_v18 = vmax.f32 %v1994_v35, %v2005_v42  ;;  %v1995_v46 = vadd.f32 %v1984_v43, %v9393_v36  ;;  %v9443_v35 = vld [vmem:[#allocation8 + $0x50] sm:$0xff] }
 0x406   :  { %v1955_v48 = vpop.f32.mrf.mxu1  ;;  %v7217_v49 = vpop.f32.mrf.mxu0 }
 0x407   :  { %v2006_v51 = vmul.f32 0.01, %v1995_v46  ;;  %v1985_v52 = vadd.f32 %v1955_v48, %v1803_v17  ;;  %5990 = vmatmul.mubr.msk.f32.gmra.mxu1 %vm2480_vm6, %v2016_v18  ;;  %7335 = vmatprep.mubr.msk.f32.mxu0 %vm2480_vm6, %v2016_v18 }
 0x408   :  { %v7175_v53 = vpop.f32.mrf.mxu1  ;;  %v9407_v54 = vpop.f32.mrf.mxu0  ;;  %2641 = vmatprep.mubr.f32.mxu1 %v8445_v0 }
 0x409   :  { %v2017_v23 = vmax.f32 %v1995_v46, %v2006_v51  ;;  %v1996_v55 = vadd.f32 %v1985_v52, %v9403_v47 }
 0x40a   :  { %v1960_v58 = vpop.f32.mrf.mxu1  ;;  %v7220_v59 = vpop.f32.mrf.mxu0 }
 0x40b   :  { %v2007_v61 = vmul.f32 0.01, %v1996_v55  ;;  %v1986_v62 = vadd.f32 %v1960_v58, %v1808_v22  ;;  %5991 = vmatmul.mubr.msk.f32.gmra.mxu1 %vm2480_vm6, %v2017_v23  ;;  %7336 = vmatmul.mubr.msk.f32.gmra.mxu0 %vm2480_vm6, %v2017_v23 }
 0x40c   :  { %v7178_v63 = vpop.f32.mrf.mxu1  ;;  %v9417_v1 = vpop.f32.mrf.mxu0  ;;  %2647 = vmatprep.mubr.f32.mxu1 %v8445_v0 }
 0x40d   :  { %v2018_v28 = vmax.f32 %v1996_v55, %v2007_v61  ;;  %v1997_v3 = vadd.f32 %v1986_v62, %v9413_v57 }
 0x40e   :  { %v1965_v5 = vpop.f32.mrf.mxu1  ;;  %v7223_v7 = vpop.f32.mrf.mxu0 }
 0x40f   :  { %v2008_v10 = vmul.f32 0.01, %v1997_v3  ;;  %v1987_v11 = vadd.f32 %v1965_v5, %v1813_v26  ;;  %5992 = vmatmul.mubr.msk.f32.gmra.mxu1 %vm2480_vm6, %v2018_v28  ;;  %7338 = vmatprep.mubr.msk.f32.mxu0 %vm2480_vm6, %v2018_v28 }
 0x410   :  { %v7181_v14 = vpop.f32.mrf.mxu1  ;;  %v9427_v8 = vpop.f32.mrf.mxu0  ;;  %2653 = vmatprep.mubr.f32.mxu1 %v8445_v0 }
 0x411   :  { %v2019_v31 = vmax.f32 %v1997_v3, %v2008_v10  ;;  %v1998_v9 = vadd.f32 %v1987_v11, %v9423_v6 }
 0x412   :  { %v1970_v24 = vpop.f32.mrf.mxu1  ;;  %v7226_v25 = vpop.f32.mrf.mxu0 }
 0x413   :  { %v2009_v29 = vmul.f32 0.01, %v1998_v9  ;;  %v1988_v16 = vadd.f32 %v1970_v24, %v1818_v30  ;;  %5993 = vmatmul.mubr.msk.f32.gmra.mxu1 %vm2480_vm6, %v2019_v31  ;;  %7339 = vmatmul.mubr.msk.f32.gmra.mxu0 %vm2480_vm6, %v2019_v31 }
 0x414   :  { %v7184_v32 = vpop.f32.mrf.mxu1  ;;  %v9437_v12 = vpop.f32.mrf.mxu0  ;;  %2659 = vmatprep.mubr.f32.mxu1 %v8445_v0 }
 0x415   :  { %v2020_v34 = vmax.f32 %v1998_v9, %v2009_v29  ;;  %v1999_v13 = vadd.f32 %v1988_v16, %v9433_v19 }
 0x416   :  { %v1975_v39 = vpop.f32.mrf.mxu1  ;;  %v7229_v37 = vpop.f32.mrf.mxu0 }
 0x417   :  { %v2010_v42 = vmul.f32 0.01, %v1999_v13  ;;  %v1989_v43 = vadd.f32 %v1975_v39, %v1823_v21  ;;  %5994 = vmatmul.mubr.msk.f32.gmra.mxu1 %vm2480_vm6, %v2020_v34  ;;  %7341 = vmatprep.mubr.msk.f32.mxu0 %vm2480_vm6, %v2020_v34 }
 0x418   :  { %v7187_v44 = vpop.f32.mrf.mxu1  ;;  %v9447_v17 = vpop.f32.mrf.mxu0  ;;  %2665 = vmatprep.mubr.f32.mxu1 %v8445_v0 }
 0x419   :  { %v2021_v18 = vmax.f32 %v1999_v13, %v2010_v42  ;;  %v2000_v38 = vadd.f32 %v1989_v43, %v9443_v35 }
 0x41a   :  { %v7232_v27 = vpop.f32.mrf.mxu0  ;;  %v2220_v46 = vpop.f32.mrf.mxu1 }
 0x41b   :  { %v2011_v48 = vmul.f32 0.01, %v2000_v38  ;;  %v2221_v49 = vadd.f32 %v2220_v46, %v9355_v41  ;;  %5995 = vmatmul.mubr.msk.f32.gmra.mxu1 %vm2480_vm6, %v2021_v18  ;;  %7342 = vmatmul.mubr.msk.f32.gmra.mxu0 %vm2480_vm6, %v2021_v18 }
 0x41c   :  { %v7247_v51 = vpop.f32.mrf.mxu1  ;;  %v2340_v52 = vpop.f32.mrf.mxu0  ;;  %2671 = vmatprep.mubr.f32.mxu1 %v8445_v0 }
 0x41d   :  { %v2022_v53 = vmax.f32 %v2000_v38, %v2011_v48  ;;  %v2394_v22 = vadd.f32 %v2340_v52, %v2221_v49 }
 0x41e   :  { %v2225_v23 = vpop.f32.mrf.mxu1  ;;  %v7292_v55 = vpop.f32.mrf.mxu0 }
 0x41f   :  { %v2405_v58 = vadd.f32 %v2394_v22, %v9357_v40  ;;  %v2226_v59 = vadd.f32 %v2225_v23, %v9363_v56  ;;  %5996 = vmatmul.mubr.msk.f32.gmra.mxu1 %vm2480_vm6, %v2022_v53  ;;  %7344 = vmatprep.mubr.msk.f32.mxu0 %vm2480_vm6, %v2022_v53 }
 0x420   :  { %v7250_v41 = vpop.f32.mrf.mxu1  ;;  %v2345_v61 = vpop.f32.mrf.mxu0  ;;  %2677 = vmatprep.mubr.f32.mxu1 %v8445_v0 }
 0x421   :  { %v2416_v62 = vmul.f32 0.01, %v2405_v58  ;;  %v2395_v63 = vadd.f32 %v2345_v61, %v2226_v59 }
 0x422   :  { %v2230_v26 = vpop.f32.mrf.mxu1  ;;  %v7295_v28 = vpop.f32.mrf.mxu0 }
 0x423   :  { %v2427_v3 = vmax.f32 %v2405_v58, %v2416_v62  ;;  %v2406_v5 = vadd.f32 %v2395_v63, %v9360_v50  ;;  %v2231_v7 = vadd.f32 %v2230_v26, %v9370_v2 }
 0x424   :  { %v7253_v40 = vpop.f32.mrf.mxu1  ;;  %v2350_v10 = vpop.f32.mrf.mxu0 }
 0x425   :  { %v2417_v56 = vmul.f32 0.01, %v2406_v5  ;;  %v2396_v11 = vadd.f32 %v2350_v10, %v2231_v7  ;;  %5997 = vmatmul.mubr.msk.f32.gmra.mxu1 %vm2480_vm6, %v2427_v3  ;;  %7345 = vmatmul.mubr.msk.f32.gmra.mxu0 %vm2480_vm6, %v2427_v3 }
 0x426   :  { %v2235_v14 = vpop.f32.mrf.mxu1  ;;  %v7298_v30 = vpop.f32.mrf.mxu0  ;;  %2683 = vmatprep.mubr.f32.mxu1 %v8445_v0 }
 0x427   :  { %v2428_v31 = vmax.f32 %v2406_v5, %v2417_v56  ;;  %v2407_v9 = vadd.f32 %v2396_v11, %v9368_v60  ;;  %v2236_v24 = vadd.f32 %v2235_v14, %v9378_v15 }
 0x428   :  { %v7256_v50 = vpop.f32.mrf.mxu1  ;;  %v2355_v25 = vpop.f32.mrf.mxu0 }
 0x429   :  { %v2418_v2 = vmul.f32 0.01, %v2407_v9  ;;  %v2397_v29 = vadd.f32 %v2355_v25, %v2236_v24  ;;  %5998 = vmatmul.mubr.msk.f32.gmra.mxu1 %vm2480_vm6, %v2428_v31  ;;  %7347 = vmatprep.mubr.msk.f32.mxu0 %vm2480_vm6, %v2428_v31 }
 0x42a   :  { %v2240_v16 = vpop.f32.mrf.mxu1  ;;  %v7301_v32 = vpop.f32.mrf.mxu0  ;;  %2689 = vmatprep.mubr.f32.mxu1 %v8445_v0 }
 0x42b   :  { %v2429_v21 = vmax.f32 %v2407_v9, %v2418_v2  ;;  %v2408_v34 = vadd.f32 %v2397_v29, %v9375_v4  ;;  %v2241_v13 = vadd.f32 %v2240_v16, %v9387_v33 }
 0x42c   :  { %v7259_v60 = vpop.f32.mrf.mxu1  ;;  %v2360_v39 = vpop.f32.mrf.mxu0 }
 0x42d   :  { %v2419_v15 = vmul.f32 0.01, %v2408_v34  ;;  %v2398_v37 = vadd.f32 %v2360_v39, %v2241_v13  ;;  %5999 = vmatmul.mubr.msk.f32.gmra.mxu1 %vm2480_vm6, %v2429_v21  ;;  %7348 = vmatmul.mubr.msk.f32.gmra.mxu0 %vm2480_vm6, %v2429_v21 }
 0x42e   :  { %v2245_v42 = vpop.f32.mrf.mxu1  ;;  %v7304_v43 = vpop.f32.mrf.mxu0  ;;  %2695 = vmatprep.mubr.f32.mxu1 %v8445_v0 }
 0x42f   :  { %v2430_v44 = vmax.f32 %v2408_v34, %v2419_v15  ;;  %v2409_v18 = vadd.f32 %v2398_v37, %v9383_v20  ;;  %v2246_v38 = vadd.f32 %v2245_v42, %v9397_v45 }
 0x430   :  { %v7262_v4 = vpop.f32.mrf.mxu1  ;;  %v2365_v27 = vpop.f32.mrf.mxu0 }
 0x431   :  { %v2420_v33 = vmul.f32 0.01, %v2409_v18  ;;  %v2399_v46 = vadd.f32 %v2365_v27, %v2246_v38  ;;  %6000 = vmatmul.mubr.msk.f32.gmra.mxu1 %vm2480_vm6, %v2430_v44  ;;  %7350 = vmatprep.mubr.msk.f32.mxu0 %vm2480_vm6, %v2430_v44 }
 0x432   :  { %v2250_v48 = vpop.f32.mrf.mxu1  ;;  %v7307_v49 = vpop.f32.mrf.mxu0  ;;  %2701 = vmatprep.mubr.f32.mxu1 %v8445_v0 }
 0x433   :  { %v2431_v51 = vmax.f32 %v2409_v18, %v2420_v33  ;;  %v2410_v52 = vadd.f32 %v2399_v46, %v9393_v36  ;;  %v2251_v53 = vadd.f32 %v2250_v48, %v9407_v54 }
 0x434   :  { %v7265_v20 = vpop.f32.mrf.mxu1  ;;  %v2370_v22 = vpop.f32.mrf.mxu0 }
 0x435   :  { %v2421_v45 = vmul.f32 0.01, %v2410_v52  ;;  %v2400_v23 = vadd.f32 %v2370_v22, %v2251_v53  ;;  %6001 = vmatmul.mubr.msk.f32.gmra.mxu1 %vm2480_vm6, %v2431_v51  ;;  %7351 = vmatmul.mubr.msk.f32.gmra.mxu0 %vm2480_vm6, %v2431_v51 }
 0x436   :  { %v2255_v55 = vpop.f32.mrf.mxu1  ;;  %v7310_v58 = vpop.f32.mrf.mxu0  ;;  %2707 = vmatprep.mubr.f32.mxu1 %v8445_v0 }
 0x437   :  { %v2432_v59 = vmax.f32 %v2410_v52, %v2421_v45  ;;  %v2411_v41 = vadd.f32 %v2400_v23, %v9403_v47  ;;  %v2256_v61 = vadd.f32 %v2255_v55, %v9417_v1 }
 0x438   :  { %v7268_v36 = vpop.f32.mrf.mxu1  ;;  %v2375_v62 = vpop.f32.mrf.mxu0 }
 0x439   :  { %v2422_v54 = vmul.f32 0.01, %v2411_v41  ;;  %v2401_v63 = vadd.f32 %v2375_v62, %v2256_v61  ;;  %6002 = vmatmul.mubr.msk.f32.gmra.mxu1 %vm2480_vm6, %v2432_v59  ;;  %7353 = vmatprep.mubr.msk.f32.mxu0 %vm2480_vm6, %v2432_v59 }
 0x43a   :  { %v2260_v26 = vpop.f32.mrf.mxu1  ;;  %v7313_v28 = vpop.f32.mrf.mxu0  ;;  %2713 = vmatprep.mubr.f32.mxu1 %v8445_v0 }
 0x43b   :  { %v2433_v3 = vmax.f32 %v2411_v41, %v2422_v54  ;;  %v2412_v5 = vadd.f32 %v2401_v63, %v9413_v57  ;;  %v2261_v7 = vadd.f32 %v2260_v26, %v9427_v8 }
 0x43c   :  { %v7271_v47 = vpop.f32.mrf.mxu1  ;;  %v2380_v40 = vpop.f32.mrf.mxu0 }
 0x43d   :  { %v2423_v1 = vmul.f32 0.01, %v2412_v5  ;;  %v2402_v10 = vadd.f32 %v2380_v40, %v2261_v7  ;;  %6003 = vmatmul.mubr.msk.f32.gmra.mxu1 %vm2480_vm6, %v2433_v3  ;;  %7354 = vmatmul.mubr.msk.f32.gmra.mxu0 %vm2480_vm6, %v2433_v3 }
 0x43e   :  { %v2265_v56 = vpop.f32.mrf.mxu1  ;;  %v7316_v11 = vpop.f32.mrf.mxu0  ;;  %2719 = vmatprep.mubr.f32.mxu1 %v8445_v0 }
 0x43f   :  { %v2434_v14 = vmax.f32 %v2412_v5, %v2423_v1  ;;  %v2413_v30 = vadd.f32 %v2402_v10, %v9423_v6  ;;  %v2266_v31 = vadd.f32 %v2265_v56, %v9437_v12  ;;  %v9580_v10 = vld [vmem:[%s11642_s7] sm:$0xff] }
 0x440   :  { %v7274_v57 = vpop.f32.mrf.mxu1  ;;  %v2385_v9 = vpop.f32.mrf.mxu0 }
 0x441   :  { %v2424_v8 = vmul.f32 0.01, %v2413_v30  ;;  %v2403_v24 = vadd.f32 %v2385_v9, %v2266_v31  ;;  %6004 = vmatmul.mubr.msk.f32.gmra.mxu1 %vm2480_vm6, %v2434_v14  ;;  %7356 = vmatprep.mubr.msk.f32.mxu0 %vm2480_vm6, %v2434_v14  ;;  %v9593_v14 = vld [vmem:[%s11642_s7 + $0x58] sm:$0xff]  ;;  %v9606_v31 = vld [vmem:[%s11642_s7 + $0x8] sm:$0xff] }
 0x442   :  { %v2270_v50 = vpop.f32.mrf.mxu1  ;;  %v7319_v25 = vpop.f32.mrf.mxu0  ;;  %2725 = vmatprep.mubr.f32.mxu1 %v8445_v0 }
 0x443   :  { %v2435_v2 = vmax.f32 %v2413_v30, %v2424_v8  ;;  %v2414_v29 = vadd.f32 %v2403_v24, %v9433_v19  ;;  %v2271_v16 = vadd.f32 %v2270_v50, %v9447_v17  ;;  %v9618_v8 = vld [vmem:[%s11642_s7 + $0x60] sm:$0xff]  ;;  %v9630_v50 = vld [vmem:[%s11642_s7 + $0x10] sm:$0xff] }
 0x444   :  { %v2390_v6 = vpop.f32.mrf.mxu0  ;;  %v7277_v32 = vpop.f32.mrf.mxu1 }
 0x445   :  { %v2425_v12 = vmul.f32 0.01, %v2414_v29  ;;  %v2404_v21 = vadd.f32 %v2390_v6, %v2271_v16  ;;  %6005 = vmatmul.mubr.msk.f32.gmra.mxu1 %vm2480_vm6, %v2435_v2  ;;  %7357 = vmatmul.mubr.msk.f32.gmra.mxu0 %vm2480_vm6, %v2435_v2  ;;  %v9642_v2 = vld [vmem:[%s11642_s7 + $0x68] sm:$0xff]  ;;  %v9655_v16 = vld [vmem:[%s11642_s7 + $0x18] sm:$0xff]  ;;  %v9668_v32 = vld [vmem:[%s11642_s7 + $0x70] sm:$0xff] }
 0x446   :  { %2731 = vmatprep.mubr.f32.mxu1 %v8445_v0  ;;  %v7322_v34 = vpop.f32.mrf.mxu0 }
 0x447   :  { %v2436_v13 = vmax.f32 %v2414_v29, %v2425_v12  ;;  %v2415_v60 = vadd.f32 %v2404_v21, %v9443_v35  ;;  %v9681_v21 = vld [vmem:[%s11642_s7 + $0x20] sm:$0xff] }
 0x449   :  { %v2426_v39 = vmul.f32 0.01, %v2415_v60  ;;  %6006 = vmatmul.mubr.msk.f32.gmra.mxu1 %vm2480_vm6, %v2436_v13  ;;  %7359 = vmatprep.mubr.msk.f32.mxu0 %vm2480_vm6, %v2436_v13  ;;  %v9692_v13 = vld [vmem:[%s11642_s7 + $0x78] sm:$0xff] }
 0x44a   :  { %2737 = vmatprep.mubr.f32.mxu1 %v8445_v0 }
 0x44b   :  { %v2437_v19 = vmax.f32 %v2415_v60, %v2426_v39  ;;  %v9705_v39 = vld [vmem:[%s11642_s7 + $0x28] sm:$0xff] }
 0x44d   :  { %6007 = vmatmul.mubr.msk.f32.gmra.mxu1 %vm2480_vm6, %v2437_v19  ;;  %7360 = vmatmul.mubr.msk.f32.gmra.mxu0 %vm2480_vm6, %v2437_v19 }
 0x44e   :  { %7384 = vmatprep.mubr.msk.f32.mxu0 %vm8446_vm4, %v8445_v0  ;;  %7439 = vmatprep.mubr.msk.f32.mxu1 %vm8446_vm4, %v8445_v0 }
 0x4b4   :  { %v9515_v17 = vpop.f32.mrf.mxu1 }
 0x4b6   :  { %v9517_v35 = vpop.f32.mrf.mxu1 }
 0x4b9   :  { %v9519_v15 = vpop.f32.mrf.mxu1  ;;  %v9527_v51 = vpop.f32.mrf.mxu0 }
 0x4bb   :  { %v9521_v37 = vpop.f32.mrf.mxu1  ;;  %v9529_v20 = vpop.f32.mrf.mxu0 }
 0x4bf   :  { %v9523_v42 = vpop.f32.mrf.mxu1 }
 0x4c1   :  { %v9525_v43 = vpop.f32.mrf.mxu1 }
 0x4c3   :  { %v2631_v44 = vpop.f32.mrf.mxu1  ;;  %v9531_v45 = vpop.f32.mrf.mxu0 }
 0x4c5   :  { %v2633_v18 = vpop.f32.mrf.mxu1  ;;  %v9533_v58 = vpop.f32.mrf.mxu0 }
 0x4c7   :  { %v2637_v38 = vpop.f32.mrf.mxu1 }
 0x4c9   :  { %v2639_v4 = vpop.f32.mrf.mxu1 }
 0x4cb   :  { %v2643_v27 = vpop.f32.mrf.mxu1  ;;  %v9535_v41 = vpop.f32.mrf.mxu0 }
 0x4cd   :  { %v2645_v33 = vpop.f32.mrf.mxu1  ;;  %v9540_v36 = vpop.f32.mrf.mxu0 }
 0x4cf   :  { %v2649_v46 = vpop.f32.mrf.mxu1 }
 0x4d1   :  { %v2651_v48 = vpop.f32.mrf.mxu1 }
 0x4d3   :  { %v2655_v49 = vpop.f32.mrf.mxu1  ;;  %v9546_v54 = vpop.f32.mrf.mxu0 }
 0x4d5   :  { %v2657_v52 = vpop.f32.mrf.mxu1  ;;  %v9556_v28 = vpop.f32.mrf.mxu0 }
 0x4d7   :  { %v2661_v53 = vpop.f32.mrf.mxu1 }
 0x4d9   :  { %v2663_v22 = vpop.f32.mrf.mxu1 }
 0x4db   :  { %v2667_v23 = vpop.f32.mrf.mxu1  ;;  %v7343_v5 = vpop.f32.mrf.mxu0 }
 0x4dd   :  { %v2669_v55 = vpop.f32.mrf.mxu1  ;;  %v2850_v40 = vpop.f32.mrf.mxu0 }
 0x4df   :  { %v2673_v59 = vpop.f32.mrf.mxu1 }
 0x4e0   :  { %7418 = vmatpush3.msra.mxu1 %v2673_v59  ;;  %v9862_v59 = vld [vmem:[%s11642_s7 + $0xb8] sm:$0xff] }
 0x4e1   :  { %v2675_v61 = vpop.f32.mrf.mxu1  ;;  %7419 = vmatprep.subr.mxu1 %v8445_v0 }
 0x4e2   :  { %7363 = vmatpush3.msra.mxu0 %v2675_v61  ;;  %7420 = vmatpush3.msra.mxu1 %v2667_v23 }
 0x4e3   :  { %7364 = vmatprep.subr.mxu0 %v8445_v0  ;;  %7421 = vmatprep.subr.mxu1 %v8445_v0 }
 0x4e4   :  { %7365 = vmatpush3.msra.mxu0 %v2669_v55  ;;  %7422 = vmatpush3.msra.mxu1 %v2661_v53  ;;  %v9848_v55 = vld [vmem:[%s11642_s7 + $0xb0] sm:$0xff] }
 0x4e5   :  { %v9542_v62 = vpop.f32.mrf.mxu1  ;;  %7366 = vmatprep.subr.mxu0 %v8445_v0  ;;  %7423 = vmatprep.subr.mxu1 %v8445_v0  ;;  %v9582_v56 = vpop.f32.mrf.mxu0 }
 0x4e6   :  { %7367 = vmatpush3.msra.mxu0 %v2663_v22  ;;  %7424 = vmatpush3.msra.mxu1 %v2655_v49  ;;  %v9796_v49 = vld [vmem:[%s11642_s7 + $0x48] sm:$0xff] }
 0x4e7   :  { %v9548_v63 = vpop.f32.mrf.mxu1  ;;  %7368 = vmatprep.subr.mxu0 %v8445_v0  ;;  %7425 = vmatprep.subr.mxu1 %v8445_v0  ;;  %v2860_v57 = vpop.f32.mrf.mxu0  ;;  %v9831_v22 = vld [vmem:[%s11642_s7 + $0xa8] sm:$0xff] }
 0x4e8   :  { %7369 = vmatpush3.msra.mxu0 %v2657_v52  ;;  %7426 = vmatpush3.msra.mxu1 %v2649_v46  ;;  %v9809_v52 = vld [vmem:[%s11642_s7 + $0xa0] sm:$0xff] }
 0x4e9   :  { %v9552_v26 = vpop.f32.mrf.mxu1  ;;  %7370 = vmatprep.subr.mxu0 %v8445_v0  ;;  %7427 = vmatprep.subr.mxu1 %v8445_v0 }
 0x4ea   :  { %7371 = vmatpush3.msra.mxu0 %v2651_v48  ;;  %7428 = vmatpush3.msra.mxu1 %v2643_v27  ;;  %v9786_v48 = vld [vmem:[%s11642_s7 + $0x98] sm:$0xff] }
 0x4eb   :  { %v9558_v3 = vpop.f32.mrf.mxu1  ;;  %7372 = vmatprep.subr.mxu0 %v8445_v0  ;;  %7429 = vmatprep.subr.mxu1 %v8445_v0 }
 0x4ec   :  { %7373 = vmatpush3.msra.mxu0 %v2645_v33  ;;  %7430 = vmatpush3.msra.mxu1 %v2637_v38  ;;  %v9774_v33 = vld [vmem:[%s11642_s7 + $0x40] sm:$0xff] }
 0x4ed   :  { %v9562_v7 = vpop.f32.mrf.mxu1  ;;  %7374 = vmatprep.subr.mxu0 %v8445_v0  ;;  %7431 = vmatprep.subr.mxu1 %v8445_v0 }
 0x4ee   :  { %7375 = vmatpush3.msra.mxu0 %v2639_v4  ;;  %7432 = vmatpush3.msra.mxu1 %v2631_v44  ;;  %v9745_v44 = vpop.f32.mrf.mxu0  ;;  %v9762_v4 = vld [vmem:[%s11642_s7 + $0x90] sm:$0xff] }
 0x4ef   :  { %v9566_v47 = vpop.f32.mrf.mxu1  ;;  %7376 = vmatprep.subr.mxu0 %v8445_v0  ;;  %7433 = vmatprep.subr.mxu1 %v8445_v0 }
 0x4f0   :  { %7377 = vmatpush3.msra.mxu0 %v2633_v18  ;;  %7434 = vmatpush3.msra.mxu1 %v9523_v42  ;;  %v9740_v42 = vld [vmem:[%s11642_s7 + $0x88] sm:$0xff]  ;;  %v9752_v18 = vld [vmem:[%s11642_s7 + $0x38] sm:$0xff]  ;;  %v9767_v27 = vpop.f32.mrf.mxu0 }
 0x4f1   :  { %v9571_v1 = vpop.f32.mrf.mxu1  ;;  %7378 = vmatprep.subr.mxu0 %v8445_v0  ;;  %7435 = vmatprep.subr.mxu1 %v8445_v0 }
 0x4f2   :  { %7379 = vmatpush3.msra.mxu0 %v9525_v43  ;;  %7436 = vmatpush3.msra.mxu1 %v9519_v15  ;;  %v9729_v15 = vld [vmem:[%s11642_s7 + $0x30] sm:$0xff] }
 0x4f3   :  { %v9584_v11 = vpop.f32.mrf.mxu1  ;;  %7380 = vmatprep.subr.mxu0 %v8445_v0  ;;  %7437 = vmatprep.subr.mxu1 %v8445_v0 }
 0x4f4   :  { %7381 = vmatpush3.msra.mxu0 %v9521_v37  ;;  %7438 = vmatpush3.msra.mxu1 %v9515_v17  ;;  %v9716_v17 = vld [vmem:[%s11642_s7 + $0x80] sm:$0xff] }
 0x4f5   :  { %v9595_v30 = vpop.f32.mrf.mxu1  ;;  %7382 = vmatprep.subr.mxu0 %v8445_v0  ;;  %7440 = vmatmul.mubr.msk.f32.vlgmr.msra.gmra.mxu1 %vm2965_vm7, %v9580_v10  ;;  %v9779_v46 = vpop.f32.mrf.mxu0 }
 0x4f6   :  { %7383 = vmatpush3.msra.mxu0 %v9517_v35  ;;  %7442 = vmatprep.mubr.msk.f32.mxu1 %vm8446_vm4, %v8445_v0 }
 0x4f7   :  { %v9608_v9 = vpop.f32.mrf.mxu1  ;;  %7385 = vmatmul.mubr.msk.f32.vlgmr.msra.gmra.mxu0 %vm2965_vm7, %v9593_v14  ;;  %7472 = vmatprep.subr.mxu0 %v8445_v0 }
 0x4f8   :  { %7473 = vmatpush3.msra.mxu0 %v2860_v57  ;;  %7387 = vmatprep.mubr.msk.f32.mxu0 %vm8446_vm4, %v8445_v0  ;;  %v3923_v57 = vld [vmem:[#allocation13 + $0x30] sm:$0xff] }
 0x4f9   :  { %v9620_v24 = vpop.f32.mrf.mxu1  ;;  %7474 = vmatprep.subr.mxu0 %v8445_v0  ;;  %7443 = vmatmul.mubr.msk.f32.gmra.mxu1 %vm2965_vm7, %v9606_v31 }
 0x4fa   :  { %7475 = vmatpush3.msra.mxu0 %v7343_v5  ;;  %7445 = vmatprep.mubr.msk.f32.mxu1 %vm8446_vm4, %v8445_v0  ;;  %v10001_v5 = vld [vmem:[%s11642_s7 + $0xf8] sm:$0xff] }
 0x4fb   :  { %v9632_v25 = vpop.f32.mrf.mxu1  ;;  %7388 = vmatmul.mubr.msk.f32.gmra.mxu0 %vm2965_vm7, %v9618_v8  ;;  %7476 = vmatprep.subr.mxu0 %v8445_v0 }
 0x4fc   :  { %7477 = vmatpush3.msra.mxu0 %v2850_v40  ;;  %7390 = vmatprep.mubr.msk.f32.mxu0 %vm8446_vm4, %v8445_v0  ;;  %v3932_v40 = vld [vmem:[#allocation13 + $0x78] sm:$0xff] }
 0x4fd   :  { %v9644_v29 = vpop.f32.mrf.mxu1  ;;  %7478 = vmatprep.subr.mxu0 %v8445_v0  ;;  %7446 = vmatmul.mubr.msk.f32.gmra.mxu1 %vm2965_vm7, %v9630_v50 }
 0x4fe   :  { %7479 = vmatpush3.msra.mxu0 %v9546_v54  ;;  %7448 = vmatprep.mubr.msk.f32.mxu1 %vm8446_vm4, %v8445_v0  ;;  %v9899_v54 = vld [vmem:[%s11642_s7 + $0xc8] sm:$0xff] }
 0x4ff   :  { %v9657_v6 = vpop.f32.mrf.mxu1  ;;  %7391 = vmatmul.mubr.msk.f32.gmra.mxu0 %vm2965_vm7, %v9642_v2  ;;  %7480 = vmatprep.subr.mxu0 %v8445_v0 }
 0x500   :  { %7481 = vmatpush3.msra.mxu0 %v9556_v28  ;;  %7393 = vmatprep.mubr.msk.f32.mxu0 %vm8446_vm4, %v8445_v0  ;;  %v9939_v28 = vld [vmem:[%s11642_s7 + $0xd8] sm:$0xff] }
 0x501   :  { %v9670_v12 = vpop.f32.mrf.mxu1  ;;  %7482 = vmatprep.subr.mxu0 %v8445_v0  ;;  %7449 = vmatmul.mubr.msk.f32.gmra.mxu1 %vm2965_vm7, %v9655_v16 }
 0x502   :  { %7483 = vmatpush3.msra.mxu0 %v9535_v41  ;;  %7451 = vmatprep.mubr.msk.f32.mxu1 %vm8446_vm4, %v8445_v0 }
 0x503   :  { %v2723_v34 = vpop.f32.mrf.mxu1  ;;  %7394 = vmatmul.mubr.msk.f32.gmra.mxu0 %vm2965_vm7, %v9668_v32  ;;  %7484 = vmatprep.subr.mxu0 %v8445_v0 }
 0x504   :  { %7485 = vmatpush3.msra.mxu0 %v9540_v36  ;;  %7396 = vmatprep.mubr.msk.f32.mxu0 %vm8446_vm4, %v8445_v0  ;;  %v9880_v36 = vld [vmem:[%s11642_s7 + $0xc0] sm:$0xff] }
 0x505   :  { %v9694_v60 = vpop.f32.mrf.mxu1  ;;  %7486 = vmatprep.subr.mxu0 %v8445_v0  ;;  %7452 = vmatmul.mubr.msk.f32.gmra.mxu1 %vm2965_vm7, %v9681_v21 }
 0x506   :  { %7487 = vmatpush3.msra.mxu0 %v9531_v45  ;;  %7454 = vmatprep.mubr.msk.f32.mxu1 %vm8446_vm4, %v8445_v0 }
 0x507   :  { %v2729_v19 = vpop.f32.mrf.mxu1  ;;  %7397 = vmatmul.mubr.msk.f32.gmra.mxu0 %vm2965_vm7, %v9692_v13  ;;  %7488 = vmatprep.subr.mxu0 %v8445_v0 }
 0x508   :  { %7489 = vmatpush3.msra.mxu0 %v9533_v58  ;;  %7399 = vmatprep.mubr.msk.f32.mxu0 %vm8446_vm4, %v8445_v0 }
 0x509   :  { %v9718_v35 = vpop.f32.mrf.mxu1  ;;  %7490 = vmatprep.subr.mxu0 %v8445_v0  ;;  %7455 = vmatmul.mubr.msk.f32.gmra.mxu1 %vm2965_vm7, %v9705_v39 }
 0x50a   :  { %7491 = vmatpush3.msra.mxu0 %v9527_v51  ;;  %7457 = vmatprep.mubr.msk.f32.mxu1 %vm8446_vm4, %v8445_v0  ;;  %v9801_v51 = vpop.f32.mrf.mxu0 }
 0x50b   :  { %v2735_v37 = vpop.f32.mrf.mxu1  ;;  %7400 = vmatmul.mubr.msk.f32.gmra.mxu0 %vm2965_vm7, %v9716_v17  ;;  %7492 = vmatprep.subr.mxu0 %v8445_v0 }
 0x50c   :  { %7493 = vmatpush3.msra.mxu0 %v9529_v20  ;;  %7402 = vmatprep.mubr.msk.f32.mxu0 %vm8446_vm4, %v8445_v0  ;;  %v7355_v53 = vpop.f32.mrf.mxu0  ;;  %v9820_v20 = vld [vmem:[%s11642_s7 + $0x50] sm:$0xff] }
 0x50d   :  { %v2739_v43 = vpop.f32.mrf.mxu1  ;;  %7458 = vmatmul.mubr.msk.f32.gmra.mxu1 %vm2965_vm7, %v9729_v15  ;;  %7527 = vmatprep.subr.mxu1 %v8445_v0 }
 0x50e   :  { %7460 = vmatprep.mubr.msk.f32.mxu1 %vm8446_vm4, %v8445_v0  ;;  %7582 = vmatprep.subr.mxu0 %v8445_v0  ;;  %v2890_v45 = vpop.f32.mrf.mxu0 }
 0x50f   :  { %v2741_v38 = vpop.f32.mrf.mxu1  ;;  %7403 = vmatmul.mubr.msk.f32.gmra.mxu0 %vm2965_vm7, %v9740_v42 }
 0x510   :  { %7528 = vmatpush3.msra.mxu1 %v2741_v38  ;;  %7405 = vmatprep.mubr.msk.f32.mxu0 %vm8446_vm4, %v8445_v0  ;;  %v7358_v23 = vpop.f32.mrf.mxu0 }
 0x511   :  { %7529 = vmatprep.subr.mxu1 %v8445_v0  ;;  %7461 = vmatmul.mubr.msk.f32.gmra.mxu1 %vm2965_vm7, %v9752_v18 }
 0x512   :  { %7530 = vmatpush3.msra.mxu1 %v2735_v37  ;;  %7463 = vmatprep.mubr.msk.f32.mxu1 %vm8446_vm4, %v8445_v0  ;;  %v2900_v58 = vpop.f32.mrf.mxu0 }
 0x513   :  { %7406 = vmatmul.mubr.msk.f32.gmra.mxu0 %vm2965_vm7, %v9762_v4  ;;  %7531 = vmatprep.subr.mxu1 %v8445_v0 }
 0x514   :  { %7532 = vmatpush3.msra.mxu1 %v2729_v19  ;;  %7408 = vmatprep.mubr.msk.f32.mxu0 %vm8446_vm4, %v8445_v0  ;;  %v7361_v41 = vpop.f32.mrf.mxu0 }
 0x515   :  { %7533 = vmatprep.subr.mxu1 %v8445_v0  ;;  %7464 = vmatmul.mubr.msk.f32.gmra.mxu1 %vm2965_vm7, %v9774_v33 }
 0x516   :  { %7534 = vmatpush3.msra.mxu1 %v2723_v34  ;;  %7466 = vmatprep.mubr.msk.f32.mxu1 %vm8446_vm4, %v8445_v0  ;;  %v2910_v61 = vpop.f32.mrf.mxu0 }
 0x517   :  { %7409 = vmatmul.mubr.msk.f32.gmra.mxu0 %vm2965_vm7, %v9786_v48  ;;  %7535 = vmatprep.subr.mxu1 %v8445_v0 }
 0x518   :  { %7536 = vmatpush3.msra.mxu1 %v9657_v6  ;;  %7411 = vmatprep.mubr.msk.f32.mxu0 %vm8446_vm4, %v8445_v0 }
 0x519   :  { %7537 = vmatprep.subr.mxu1 %v8445_v0  ;;  %7467 = vmatmul.mubr.msk.f32.gmra.mxu1 %vm2965_vm7, %v9796_v49 }
 0x51a   :  { %7538 = vmatpush3.msra.mxu1 %v9632_v25  ;;  %7469 = vmatprep.mubr.msk.f32.mxu1 %vm8446_vm4, %v8445_v0  ;;  %v3925_v25 = vld [vmem:[#allocation13 + $0x40] sm:$0xff] }
 0x51b   :  { %7412 = vmatmul.mubr.msk.f32.gmra.mxu0 %vm2965_vm7, %v9809_v52  ;;  %7539 = vmatprep.subr.mxu1 %v8445_v0 }
 0x51c   :  { %7540 = vmatpush3.msra.mxu1 %v9608_v9  ;;  %7414 = vmatprep.mubr.msk.f32.mxu0 %vm8446_vm4, %v8445_v0  ;;  %v3921_v9 = vld [vmem:[#allocation13 + $0x20] sm:$0xff] }
 0x51d   :  { %7541 = vmatprep.subr.mxu1 %v8445_v0  ;;  %7470 = vmatmul.mubr.msk.f32.gmra.mxu1 %vm2965_vm7, %v9820_v20 }
 0x51e   :  { %7542 = vmatpush3.msra.mxu1 %v9584_v11  ;;  %7549 = vmatprep.mubr.msk.f32.mxu1 %vm8446_vm4, %v8445_v0  ;;  %v3934_v11 = vld [vmem:[#allocation13 + $0x88] sm:$0xff] }
 0x51f   :  { %7415 = vmatmul.mubr.msk.f32.gmra.mxu0 %vm2965_vm7, %v9831_v22  ;;  %7543 = vmatprep.subr.mxu1 %v8445_v0 }
 0x520   :  { %7544 = vmatpush3.msra.mxu1 %v9566_v47  ;;  %7494 = vmatprep.mubr.msk.f32.mxu0 %vm8446_vm4, %v8445_v0  ;;  %v3933_v47 = vld [vmem:[#allocation13 + $0x80] sm:$0xff] }
 0x521   :  { %7545 = vmatprep.subr.mxu1 %v8445_v0 }
 0x522   :  { %7546 = vmatpush3.msra.mxu1 %v9558_v3  ;;  %v9988_v3 = vld [vmem:[%s11642_s7 + $0xf0] sm:$0xff] }
 0x523   :  { %7495 = vmatmul.mubr.msk.f32.vlgmr.msra.gmra.mxu0 %vm2965_vm7, %v9848_v55  ;;  %7547 = vmatprep.subr.mxu1 %v8445_v0 }
 0x524   :  { %7583 = vmatpush3.msra.mxu0 %v2739_v43  ;;  %7548 = vmatpush3.msra.mxu1 %v9548_v63  ;;  %v9918_v63 = vld [vmem:[%s11642_s7 + $0xd0] sm:$0xff] }
 0x525   :  { %7584 = vmatprep.subr.mxu0 %v8445_v0  ;;  %7550 = vmatmul.mubr.msk.f32.vlgmr.msra.gmra.mxu1 %vm2965_vm7, %v9593_v14  ;;  %v3926_v14 = vld [vmem:[#allocation13 + $0x48] sm:$0xff] }
 0x526   :  { %7585 = vmatpush3.msra.mxu0 %v9718_v35  ;;  %7637 = vmatprep.subr.mxu1 %v8445_v0 }
 0x527   :  { %7497 = vmatprep.mubr.msk.f32.mxu0 %vm8446_vm4, %v8445_v0  ;;  %7586 = vmatprep.subr.mxu0 %v8445_v0 }
 0x528   :  { %7638 = vmatpush3.msra.mxu1 %v7361_v41  ;;  %7498 = vmatmul.mubr.msk.f32.gmra.mxu0 %vm2965_vm7, %v9862_v59 }
 0x529   :  { %7587 = vmatpush3.msra.mxu0 %v9694_v60  ;;  %7639 = vmatprep.subr.mxu1 %v8445_v0 }
 0x52a   :  { %7552 = vmatprep.mubr.msk.f32.mxu1 %vm8446_vm4, %v8445_v0  ;;  %7588 = vmatprep.subr.mxu0 %v8445_v0 }
 0x52b   :  { %7640 = vmatpush3.msra.mxu1 %v2910_v61  ;;  %7589 = vmatpush3.msra.mxu0 %v9670_v12 }
 0x52c   :  { %7553 = vmatmul.mubr.msk.f32.gmra.mxu1 %vm2965_vm7, %v9618_v8  ;;  %7641 = vmatprep.subr.mxu1 %v8445_v0  ;;  %v3928_v8 = vld [vmem:[#allocation13 + $0x58] sm:$0xff] }
 0x52d   :  { %7500 = vmatprep.mubr.msk.f32.mxu0 %vm8446_vm4, %v8445_v0  ;;  %7590 = vmatprep.subr.mxu0 %v8445_v0 }
 0x52e   :  { %7642 = vmatpush3.msra.mxu1 %v7358_v23  ;;  %7501 = vmatmul.mubr.msk.f32.gmra.mxu0 %vm2965_vm7, %v9880_v36 }
 0x52f   :  { %7591 = vmatpush3.msra.mxu0 %v9644_v29  ;;  %7643 = vmatprep.subr.mxu1 %v8445_v0  ;;  %v3922_v29 = vld [vmem:[#allocation13 + $0x28] sm:$0xff] }
 0x530   :  { %7555 = vmatprep.mubr.msk.f32.mxu1 %vm8446_vm4, %v8445_v0  ;;  %7592 = vmatprep.subr.mxu0 %v8445_v0 }
 0x531   :  { %7644 = vmatpush3.msra.mxu1 %v2900_v58  ;;  %7593 = vmatpush3.msra.mxu0 %v9620_v24  ;;  %v3920_v24 = vld [vmem:[#allocation13 + $0x18] sm:$0xff] }
 0x532   :  { %7556 = vmatmul.mubr.msk.f32.gmra.mxu1 %vm2965_vm7, %v9642_v2  ;;  %7645 = vmatprep.subr.mxu1 %v8445_v0  ;;  %v3917_v2 = vld [vmem:[#allocation13] sm:$0xff] }
 0x533   :  { %7503 = vmatprep.mubr.msk.f32.mxu0 %vm8446_vm4, %v8445_v0  ;;  %7594 = vmatprep.subr.mxu0 %v8445_v0 }
 0x534   :  { %7646 = vmatpush3.msra.mxu1 %v7355_v53  ;;  %7504 = vmatmul.mubr.msk.f32.gmra.mxu0 %vm2965_vm7, %v9899_v54 }
 0x535   :  { %7595 = vmatpush3.msra.mxu0 %v9595_v30  ;;  %7647 = vmatprep.subr.mxu1 %v8445_v0  ;;  %v3924_v30 = vld [vmem:[#allocation13 + $0x38] sm:$0xff] }
 0x536   :  { %7558 = vmatprep.mubr.msk.f32.mxu1 %vm8446_vm4, %v8445_v0  ;;  %7596 = vmatprep.subr.mxu0 %v8445_v0 }
 0x537   :  { %7648 = vmatpush3.msra.mxu1 %v2890_v45  ;;  %7597 = vmatpush3.msra.mxu0 %v9571_v1  ;;  %v3930_v1 = vld [vmem:[#allocation13 + $0x68] sm:$0xff] }
 0x538   :  { %7559 = vmatmul.mubr.msk.f32.gmra.mxu1 %vm2965_vm7, %v9668_v32  ;;  %7649 = vmatprep.subr.mxu1 %v8445_v0 }
 0x539   :  { %7506 = vmatprep.mubr.msk.f32.mxu0 %vm8446_vm4, %v8445_v0  ;;  %7598 = vmatprep.subr.mxu0 %v8445_v0 }
 0x53a   :  { %7650 = vmatpush3.msra.mxu1 %v9779_v46  ;;  %7507 = vmatmul.mubr.msk.f32.gmra.mxu0 %vm2965_vm7, %v9918_v63 }
 0x53b   :  { %7599 = vmatpush3.msra.mxu0 %v9562_v7  ;;  %7651 = vmatprep.subr.mxu1 %v8445_v0  ;;  %v10014_v7 = vld [vmem:[%s11642_s7 + $0x100] sm:$0xff] }
 0x53c   :  { %7561 = vmatprep.mubr.msk.f32.mxu1 %vm8446_vm4, %v8445_v0  ;;  %7600 = vmatprep.subr.mxu0 %v8445_v0 }
 0x53d   :  { %7652 = vmatpush3.msra.mxu1 %v9801_v51  ;;  %7601 = vmatpush3.msra.mxu0 %v9552_v26  ;;  %v9958_v26 = vld [vmem:[%s11642_s7 + $0xe0] sm:$0xff] }
 0x53e   :  { %7562 = vmatmul.mubr.msk.f32.gmra.mxu1 %vm2965_vm7, %v9692_v13  ;;  %7653 = vmatprep.subr.mxu1 %v8445_v0 }
 0x53f   :  { %7509 = vmatprep.mubr.msk.f32.mxu0 %vm8446_vm4, %v8445_v0  ;;  %7602 = vmatprep.subr.mxu0 %v8445_v0 }
 0x540   :  { %7654 = vmatpush3.msra.mxu1 %v9745_v44  ;;  %7510 = vmatmul.mubr.msk.f32.gmra.mxu0 %vm2965_vm7, %v9939_v28 }
 0x541   :  { %7603 = vmatpush3.msra.mxu0 %v9542_v62  ;;  %7655 = vmatprep.subr.mxu1 %v8445_v0  ;;  %v9975_v62 = vld [vmem:[%s11642_s7 + $0xe8] sm:$0xff] }
 0x542   :  { %7564 = vmatprep.mubr.msk.f32.mxu1 %vm8446_vm4, %v8445_v0  ;;  %7656 = vmatpush3.msra.mxu1 %v9767_v27 }
 0x543   :  { %7565 = vmatmul.mubr.msk.f32.gmra.mxu1 %vm2965_vm7, %v9716_v17  ;;  %7657 = vmatprep.subr.mxu1 %v8445_v0 }
 0x544   :  { %7512 = vmatprep.mubr.msk.f32.mxu0 %vm8446_vm4, %v8445_v0  ;;  %7658 = vmatpush3.msra.mxu1 %v9582_v56  ;;  %v3927_v56 = vld [vmem:[#allocation13 + $0x50] sm:$0xff] }
 0x545   :  { %7513 = vmatmul.mubr.msk.f32.gmra.mxu0 %vm2965_vm7, %v9958_v26  ;;  %7567 = vmatprep.mubr.msk.f32.mxu1 %vm8446_vm4, %v8445_v0 }
 0x546   :  { %7515 = vmatprep.mubr.msk.f32.mxu0 %vm8446_vm4, %v8445_v0  ;;  %4021 = vmatprep.subr.mxu0 %v3933_v47  ;;  %v10147_v47 = vld [vmem:[#allocation11] sm:$0xff] }
 0x547   :  { %7568 = vmatmul.mubr.msk.f32.gmra.mxu1 %vm2965_vm7, %v9740_v42  ;;  %7692 = vmatprep.subr.mxu1 %v3934_v11 }
 0x548   :  { %7570 = vmatprep.mubr.msk.f32.mxu1 %vm8446_vm4, %v8445_v0 }
 0x549   :  { %7516 = vmatmul.mubr.msk.f32.gmra.mxu0 %vm2965_vm7, %v9975_v62 }
 0x54a   :  { %7518 = vmatprep.mubr.msk.f32.mxu0 %vm8446_vm4, %v8445_v0 }
 0x54b   :  { %7571 = vmatmul.mubr.msk.f32.gmra.mxu1 %vm2965_vm7, %v9762_v4 }
 0x54c   :  { %7573 = vmatprep.mubr.msk.f32.mxu1 %vm8446_vm4, %v8445_v0 }
 0x54d   :  { %7519 = vmatmul.mubr.msk.f32.gmra.mxu0 %vm2965_vm7, %v9988_v3 }
 0x54e   :  { %7521 = vmatprep.mubr.msk.f32.mxu0 %vm8446_vm4, %v8445_v0 }
 0x54f   :  { %7574 = vmatmul.mubr.msk.f32.gmra.mxu1 %vm2965_vm7, %v9786_v48 }
 0x550   :  { %7576 = vmatprep.mubr.msk.f32.mxu1 %vm8446_vm4, %v8445_v0 }
 0x551   :  { %7522 = vmatmul.mubr.msk.f32.gmra.mxu0 %vm2965_vm7, %v10001_v5 }
 0x552   :  { %7524 = vmatprep.mubr.msk.f32.mxu0 %vm8446_vm4, %v8445_v0 }
 0x553   :  { %7577 = vmatmul.mubr.msk.f32.gmra.mxu1 %vm2965_vm7, %v9809_v52 }
 0x554   :  { %7579 = vmatprep.mubr.msk.f32.mxu1 %vm8446_vm4, %v8445_v0 }
 0x555   :  { %7525 = vmatmul.mubr.msk.f32.gmra.mxu0 %vm2965_vm7, %v10014_v7 }
 0x556   :  { %7604 = vmatprep.mubr.msk.f32.mxu0 %vm8446_vm4, %v8445_v0 }
 0x557   :  { %7580 = vmatmul.mubr.msk.f32.gmra.mxu1 %vm2965_vm7, %v9831_v22 }
 0x558   :  { %7659 = vmatprep.mubr.msk.f32.mxu1 %vm8446_vm4, %v8445_v0 }
 0x559   :  { %7605 = vmatmul.mubr.msk.f32.vlgmr.msra.gmra.mxu0 %vm2965_vm7, %v9580_v10  ;;  %v3929_v10 = vld [vmem:[#allocation13 + $0x60] sm:$0xff] }
 0x55a   :  { %7607 = vmatprep.mubr.msk.f32.mxu0 %vm8446_vm4, %v8445_v0  ;;  %4022 = vmatpush1.msra.mxu0 %v3932_v40 }
 0x55b   :  { %7660 = vmatmul.mubr.msk.f32.vlgmr.msra.gmra.mxu1 %vm2965_vm7, %v9848_v55  ;;  %4023 = vmatprep.subr.mxu0 %v3930_v1 }
 0x55c   :  { %7662 = vmatprep.mubr.msk.f32.mxu1 %vm8446_vm4, %v8445_v0  ;;  %4024 = vmatpush1.msra.mxu0 %v3929_v10 }
 0x55d   :  { %7608 = vmatmul.mubr.msk.f32.gmra.mxu0 %vm2965_vm7, %v9606_v31  ;;  %4025 = vmatprep.subr.mxu0 %v3927_v56  ;;  %v3931_v31 = vld [vmem:[#allocation13 + $0x70] sm:$0xff] }
 0x55e   :  { %7610 = vmatprep.mubr.msk.f32.mxu0 %vm8446_vm4, %v8445_v0  ;;  %4026 = vmatpush1.msra.mxu0 %v3926_v14 }
 0x55f   :  { %7663 = vmatmul.mubr.msk.f32.gmra.mxu1 %vm2965_vm7, %v9862_v59  ;;  %4027 = vmatprep.subr.mxu0 %v3924_v30 }
 0x560   :  { %7665 = vmatprep.mubr.msk.f32.mxu1 %vm8446_vm4, %v8445_v0  ;;  %7693 = vmatpush3.msra.mxu1 %v3934_v11 }
 0x561   :  { %7611 = vmatmul.mubr.msk.f32.gmra.mxu0 %vm2965_vm7, %v9630_v50  ;;  %7694 = vmatprep.subr.mxu1 %v3931_v31  ;;  %v3918_v50 = vld [vmem:[#allocation13 + $0x8] sm:$0xff] }
 0x562   :  { %7613 = vmatprep.mubr.msk.f32.mxu0 %vm8446_vm4, %v8445_v0  ;;  %4028 = vmatpush1.msra.mxu0 %v3923_v57  ;;  %v10152_v57 = vld [vmem:[#allocation11 + $0x8] sm:$0xff] }
 0x563   :  { %7666 = vmatmul.mubr.msk.f32.gmra.mxu1 %vm2965_vm7, %v9880_v36  ;;  %4029 = vmatprep.subr.mxu0 %v3921_v9 }
 0x564   :  { %7668 = vmatprep.mubr.msk.f32.mxu1 %vm8446_vm4, %v8445_v0  ;;  %7695 = vmatpush3.msra.mxu1 %v3931_v31 }
 0x565   :  { %7614 = vmatmul.mubr.msk.f32.gmra.mxu0 %vm2965_vm7, %v9655_v16  ;;  %7696 = vmatprep.subr.mxu1 %v3928_v8  ;;  %v3919_v16 = vld [vmem:[#allocation13 + $0x10] sm:$0xff] }
 0x566   :  { %7616 = vmatprep.mubr.msk.f32.mxu0 %vm8446_vm4, %v8445_v0  ;;  %4030 = vmatpush1.msra.mxu0 %v3920_v24 }
 0x567   :  { %7669 = vmatmul.mubr.msk.f32.gmra.mxu1 %vm2965_vm7, %v9899_v54  ;;  %4031 = vmatprep.subr.mxu0 %v3918_v50 }
 0x568   :  { %7671 = vmatprep.mubr.msk.f32.mxu1 %vm8446_vm4, %v8445_v0  ;;  %7697 = vmatpush3.msra.mxu1 %v3928_v8 }
 0x569   :  { %7617 = vmatmul.mubr.msk.f32.gmra.mxu0 %vm2965_vm7, %v9681_v21  ;;  %7698 = vmatprep.subr.mxu1 %v3925_v25 }
 0x56a   :  { %7619 = vmatprep.mubr.msk.f32.mxu0 %vm8446_vm4, %v8445_v0  ;;  %4032 = vmatpush1.msra.mxu0 %v3917_v2 }
 0x56b   :  { %7672 = vmatmul.mubr.msk.f32.gmra.mxu1 %vm2965_vm7, %v9918_v63  ;;  %7822 = vmatprep.subr.mxu0 %v8445_v0 }
 0x56c   :  { %7674 = vmatprep.mubr.msk.f32.mxu1 %vm8446_vm4, %v8445_v0  ;;  %7699 = vmatpush3.msra.mxu1 %v3925_v25 }
 0x56d   :  { %7620 = vmatmul.mubr.msk.f32.gmra.mxu0 %vm2965_vm7, %v9705_v39  ;;  %7700 = vmatprep.subr.mxu1 %v3922_v29 }
 0x56e   :  { %7622 = vmatprep.mubr.msk.f32.mxu0 %vm8446_vm4, %v8445_v0  ;;  %7701 = vmatpush3.msra.mxu1 %v3922_v29 }
 0x56f   :  { %7675 = vmatmul.mubr.msk.f32.gmra.mxu1 %vm2965_vm7, %v9939_v28  ;;  %7702 = vmatprep.subr.mxu1 %v3919_v16 }
 0x570   :  { %7677 = vmatprep.mubr.msk.f32.mxu1 %vm8446_vm4, %v8445_v0  ;;  %7703 = vmatpush3.msra.mxu1 %v3919_v16 }
 0x571   :  { %7623 = vmatmul.mubr.msk.f32.gmra.mxu0 %vm2965_vm7, %v9729_v15  ;;  %7737 = vmatprep.subr.mxu1 %v8445_v0 }
 0x572   :  { %7625 = vmatprep.mubr.msk.f32.mxu0 %vm8446_vm4, %v8445_v0 }
 0x573   :  { %7678 = vmatmul.mubr.msk.f32.gmra.mxu1 %vm2965_vm7, %v9958_v26 }
 0x574   :  { %7680 = vmatprep.mubr.msk.f32.mxu1 %vm8446_vm4, %v8445_v0 }
 0x575   :  { %7626 = vmatmul.mubr.msk.f32.gmra.mxu0 %vm2965_vm7, %v9752_v18 }
 0x576   :  { %7628 = vmatprep.mubr.msk.f32.mxu0 %vm8446_vm4, %v8445_v0 }
 0x577   :  { %7681 = vmatmul.mubr.msk.f32.gmra.mxu1 %vm2965_vm7, %v9975_v62 }
 0x578   :  { %7683 = vmatprep.mubr.msk.f32.mxu1 %vm8446_vm4, %v8445_v0 }
 0x579   :  { %7629 = vmatmul.mubr.msk.f32.gmra.mxu0 %vm2965_vm7, %v9774_v33 }
 0x57a   :  { %7631 = vmatprep.mubr.msk.f32.mxu0 %vm8446_vm4, %v8445_v0 }
 0x57b   :  { %7684 = vmatmul.mubr.msk.f32.gmra.mxu1 %vm2965_vm7, %v9988_v3 }
 0x57c   :  { %7686 = vmatprep.mubr.msk.f32.mxu1 %vm8446_vm4, %v8445_v0 }
 0x57d   :  { %7632 = vmatmul.mubr.msk.f32.gmra.mxu0 %vm2965_vm7, %v9796_v49 }
 0x57e   :  { %7634 = vmatprep.mubr.msk.f32.mxu0 %vm8446_vm4, %v8445_v0 }
 0x57f   :  { %7687 = vmatmul.mubr.msk.f32.gmra.mxu1 %vm2965_vm7, %v10001_v5 }
 0x580   :  { %7689 = vmatprep.mubr.msk.f32.mxu1 %vm8446_vm4, %v8445_v0 }
 0x581   :  { %7635 = vmatmul.mubr.msk.f32.gmra.mxu0 %vm2965_vm7, %v9820_v20 }
 0x582   :  { %4065 = vmatprep.mubr.f32.mxu0 %v8445_v0 }
 0x583   :  { %7690 = vmatmul.mubr.msk.f32.gmra.mxu1 %vm2965_vm7, %v10014_v7 }
 0x5b5   :  { %v3218_v6 = vpop.f32.mrf.mxu1 }
 0x5b7   :  { %v3065_v32 = vpop.f32.mrf.mxu0  ;;  %v7441_v12 = vpop.f32.mrf.mxu1 }
 0x5b8   :  { %v3219_v7 = vadd.f32 %v3218_v6, %v3065_v32  ;;  %v10160_v6 = vld [vmem:[#allocation11 + $0x10] sm:$0xff] }
 0x5b9   :  { %v7386_v21 = vpop.f32.mrf.mxu0  ;;  %v3223_v34 = vpop.f32.mrf.mxu1 }
 0x5bb   :  { %v3070_v13 = vpop.f32.mrf.mxu0  ;;  %v7444_v60 = vpop.f32.mrf.mxu1 }
 0x5bc   :  { %v3224_v14 = vadd.f32 %v3223_v34, %v3070_v13 }
 0x5bd   :  { %v7389_v39 = vpop.f32.mrf.mxu0  ;;  %v3228_v19 = vpop.f32.mrf.mxu1 }
 0x5bf   :  { %v3075_v17 = vpop.f32.mrf.mxu0  ;;  %v7447_v35 = vpop.f32.mrf.mxu1 }
 0x5c0   :  { %v3229_v29 = vadd.f32 %v3228_v19, %v3075_v17  ;;  %v10170_v35 = vld [vmem:[#allocation11 + $0x18] sm:$0xff] }
 0x5c1   :  { %v7392_v15 = vpop.f32.mrf.mxu0  ;;  %v10115_v37 = vpop.f32.mrf.mxu1 }
 0x5c3   :  { %v10117_v42 = vpop.f32.mrf.mxu0  ;;  %v7450_v43 = vpop.f32.mrf.mxu1 }
 0x5c4   :  { %v3234_v19 = vadd.f32 %v10115_v37, %v10117_v42 }
 0x5c5   :  { %v7395_v44 = vpop.f32.mrf.mxu0  ;;  %v10119_v18 = vpop.f32.mrf.mxu1 }
 0x5c7   :  { %v10121_v38 = vpop.f32.mrf.mxu0  ;;  %v7453_v4 = vpop.f32.mrf.mxu1 }
 0x5c8   :  { %v3239_v37 = vadd.f32 %v10119_v18, %v10121_v38 }
 0x5c9   :  { %v7398_v27 = vpop.f32.mrf.mxu0  ;;  %v10123_v33 = vpop.f32.mrf.mxu1 }
 0x5cb   :  { %v10125_v46 = vpop.f32.mrf.mxu0  ;;  %v7456_v48 = vpop.f32.mrf.mxu1 }
 0x5cc   :  { %v3244_v18 = vadd.f32 %v10123_v33, %v10125_v46  ;;  %v10200_v46 = vld [vmem:[#allocation11 + $0x30] sm:$0xff] }
 0x5cd   :  { %v7401_v49 = vpop.f32.mrf.mxu0  ;;  %v10127_v51 = vpop.f32.mrf.mxu1 }
 0x5cf   :  { %v10129_v52 = vpop.f32.mrf.mxu0  ;;  %v7459_v53 = vpop.f32.mrf.mxu1 }
 0x5d0   :  { %v10180_v53 = vld [vmem:[#allocation11 + $0x20] sm:$0xff] }
 0x5d1   :  { %v7404_v20 = vpop.f32.mrf.mxu0  ;;  %v10131_v22 = vpop.f32.mrf.mxu1 }
 0x5d3   :  { %v10133_v45 = vpop.f32.mrf.mxu0  ;;  %v7462_v23 = vpop.f32.mrf.mxu1 }
 0x5d5   :  { %v7407_v55 = vpop.f32.mrf.mxu0  ;;  %v10135_v58 = vpop.f32.mrf.mxu1 }
 0x5d7   :  { %v10137_v59 = vpop.f32.mrf.mxu0  ;;  %v7465_v41 = vpop.f32.mrf.mxu1 }
 0x5d9   :  { %v7410_v61 = vpop.f32.mrf.mxu0  ;;  %v10139_v36 = vpop.f32.mrf.mxu1 }
 0x5db   :  { %v10141_v54 = vpop.f32.mrf.mxu0  ;;  %v7468_v63 = vpop.f32.mrf.mxu1 }
 0x5dd   :  { %v7413_v28 = vpop.f32.mrf.mxu0  ;;  %v10143_v26 = vpop.f32.mrf.mxu1 }
 0x5df   :  { %v10145_v62 = vpop.f32.mrf.mxu0  ;;  %v7471_v3 = vpop.f32.mrf.mxu1 }
 0x5e0   :  { %v10190_v3 = vld [vmem:[#allocation11 + $0x28] sm:$0xff] }
 0x5e1   :  { %v7416_v5 = vpop.f32.mrf.mxu0 }
 0x5e3   :  { %v3371_v40 = vpop.f32.mrf.mxu0 }
 0x5e4   :  { %v3425_v1 = vadd.f32 %v3371_v40, %v3219_v7 }
 0x5e5   :  { %v7496_v10 = vpop.f32.mrf.mxu0  ;;  %v10149_v56 = vpop.f32.mrf.mxu1 }
 0x5e6   :  { %v3436_v11 = vadd.f32 %v3425_v1, %v10147_v47 }
 0x5e7   :  { %v7551_v30 = vpop.f32.mrf.mxu1 }
 0x5e8   :  { %v3447_v31 = vmul.f32 0.01, %v3436_v11  ;;  %v3376_v9 = vpop.f32.mrf.mxu0  ;;  %v3249_v30 = vadd.f32 %v10127_v51, %v10129_v52 }
 0x5e9   :  { %v3426_v8 = vadd.f32 %v3376_v9, %v3224_v14 }
 0x5ea   :  { %v3458_v24 = vmax.f32 %v3436_v11, %v3447_v31  ;;  %v7499_v50 = vpop.f32.mrf.mxu0 }
 0x5eb   :  { %v3437_v25 = vadd.f32 %v3426_v8, %v10152_v57 }
 0x5ec   :  { %v10155_v2 = vpop.f32.mrf.mxu1  ;;  %6118 = vmatmul.mubr.msk.f32.vlgmr.msra.gmra.mxu0 %vm1519_vm5, %v3458_v24  ;;  %7704 = vmatprep.mubr.msk.f32.mxu1 %vm1519_vm5, %v3458_v24 }
 0x5ed   :  { %v3448_v16 = vmul.f32 0.01, %v3437_v25  ;;  %4071 = vmatprep.mubr.f32.mxu0 %v8445_v0 }
 0x5ee   :  { %v3381_v32 = vpop.f32.mrf.mxu0  ;;  %v7554_v12 = vpop.f32.mrf.mxu1 }
 0x5ef   :  { %v3459_v21 = vmax.f32 %v3437_v25, %v3448_v16  ;;  %v3427_v34 = vadd.f32 %v3381_v32, %v3229_v29  ;;  %v3254_v29 = vadd.f32 %v10131_v22, %v10133_v45  ;;  %v10207_v32 = vld [vmem:[#allocation11 + $0x38] sm:$0xff]  ;;  %v3259_v22 = vadd.f32 %v10135_v58, %v10137_v59 }
 0x5f0   :  { %v7502_v13 = vpop.f32.mrf.mxu0  ;;  %v3264_v58 = vadd.f32 %v10139_v36, %v10141_v54  ;;  %v3269_v36 = vadd.f32 %v10143_v26, %v10145_v62 }
 0x5f1   :  { %v3438_v60 = vadd.f32 %v3427_v34, %v10160_v6  ;;  %6119 = vmatmul.mubr.msk.f32.gmra.mxu0 %vm1519_vm5, %v3459_v21  ;;  %7705 = vmatmul.mubr.msk.f32.vlgmr.msra.gmra.mxu1 %vm1519_vm5, %v3459_v21 }
 0x5f2   :  { %v10165_v39 = vpop.f32.mrf.mxu1  ;;  %4077 = vmatprep.mubr.f32.mxu0 %v8445_v0 }
 0x5f3   :  { %v3449_v17 = vmul.f32 0.01, %v3438_v60 }
 0x5f4   :  { %v3386_v15 = vpop.f32.mrf.mxu0  ;;  %v7557_v43 = vpop.f32.mrf.mxu1 }
 0x5f5   :  { %v3460_v44 = vmax.f32 %v3438_v60, %v3449_v17  ;;  %v3428_v4 = vadd.f32 %v3386_v15, %v3234_v19  ;;  %v10217_v19 = vld [vmem:[#allocation11 + $0x40] sm:$0xff] }
 0x5f6   :  { %v7505_v27 = vpop.f32.mrf.mxu0 }
 0x5f7   :  { %v3439_v48 = vadd.f32 %v3428_v4, %v10170_v35  ;;  %6120 = vmatmul.mubr.msk.f32.gmra.mxu0 %vm1519_vm5, %v3460_v44  ;;  %7707 = vmatprep.mubr.msk.f32.mxu1 %vm1519_vm5, %v3460_v44 }
 0x5f8   :  { %v10175_v49 = vpop.f32.mrf.mxu1  ;;  %4083 = vmatprep.mubr.f32.mxu0 %v8445_v0 }
 0x5f9   :  { %v3450_v42 = vmul.f32 0.01, %v3439_v48 }
 0x5fa   :  { %v3391_v20 = vpop.f32.mrf.mxu0  ;;  %v7560_v23 = vpop.f32.mrf.mxu1 }
 0x5fb   :  { %v3461_v55 = vmax.f32 %v3439_v48, %v3450_v42  ;;  %v3429_v41 = vadd.f32 %v3391_v20, %v3239_v37  ;;  %v10227_v37 = vld [vmem:[#allocation11 + $0x48] sm:$0xff] }
 0x5fc   :  { %v7508_v61 = vpop.f32.mrf.mxu0 }
 0x5fd   :  { %v3440_v63 = vadd.f32 %v3429_v41, %v10180_v53  ;;  %6121 = vmatmul.mubr.msk.f32.gmra.mxu0 %vm1519_vm5, %v3461_v55  ;;  %7708 = vmatmul.mubr.msk.f32.gmra.mxu1 %vm1519_vm5, %v3461_v55 }
 0x5fe   :  { %v10185_v28 = vpop.f32.mrf.mxu1  ;;  %4089 = vmatprep.mubr.f32.mxu0 %v8445_v0 }
 0x5ff   :  { %v3451_v38 = vmul.f32 0.01, %v3440_v63 }
 0x600   :  { %v3396_v5 = vpop.f32.mrf.mxu0  ;;  %v7563_v7 = vpop.f32.mrf.mxu1 }
 0x601   :  { %v3462_v40 = vmax.f32 %v3440_v63, %v3451_v38  ;;  %v3430_v1 = vadd.f32 %v3396_v5, %v3244_v18  ;;  %v10237_v18 = vld [vmem:[#allocation11 + $0x50] sm:$0xff] }
 0x602   :  { %v7511_v10 = vpop.f32.mrf.mxu0 }
 0x603   :  { %v3441_v11 = vadd.f32 %v3430_v1, %v10190_v3  ;;  %v10193_v14 = vpop.f32.mrf.mxu1  ;;  %6122 = vmatmul.mubr.msk.f32.gmra.mxu0 %vm1519_vm5, %v3462_v40  ;;  %7710 = vmatprep.mubr.msk.f32.mxu1 %vm1519_vm5, %v3462_v40 }
 0x604   :  { %4095 = vmatprep.mubr.f32.mxu0 %v8445_v0 }
 0x605   :  { %v3452_v33 = vmul.f32 0.01, %v3441_v11  ;;  %v3401_v31 = vpop.f32.mrf.mxu0  ;;  %v7566_v9 = vpop.f32.mrf.mxu1 }
 0x606   :  { %v3431_v8 = vadd.f32 %v3401_v31, %v3249_v30 }
 0x607   :  { %v3463_v24 = vmax.f32 %v3441_v11, %v3452_v33  ;;  %v7514_v50 = vpop.f32.mrf.mxu0  ;;  %v10202_v25 = vpop.f32.mrf.mxu1 }
 0x608   :  { %v3442_v16 = vadd.f32 %v3431_v8, %v10200_v46 }
 0x609   :  { %v3406_v51 = vpop.f32.mrf.mxu0  ;;  %v7569_v52 = vpop.f32.mrf.mxu1  ;;  %6123 = vmatmul.mubr.msk.f32.gmra.mxu0 %vm1519_vm5, %v3463_v24  ;;  %7711 = vmatmul.mubr.msk.f32.gmra.mxu1 %vm1519_vm5, %v3463_v24 }
 0x60a   :  { %v3453_v12 = vmul.f32 0.01, %v3442_v16  ;;  %v3432_v21 = vadd.f32 %v3406_v51, %v3254_v29  ;;  %4101 = vmatprep.mubr.f32.mxu0 %v8445_v0 }
 0x60b   :  { %v7517_v34 = vpop.f32.mrf.mxu0  ;;  %v10212_v13 = vpop.f32.mrf.mxu1 }
 0x60c   :  { %v3464_v45 = vmax.f32 %v3442_v16, %v3453_v12  ;;  %v3443_v60 = vadd.f32 %v3432_v21, %v10207_v32 }
 0x60d   :  { %v3411_v17 = vpop.f32.mrf.mxu0  ;;  %v7572_v15 = vpop.f32.mrf.mxu1 }
 0x60e   :  { %v3454_v43 = vmul.f32 0.01, %v3443_v60  ;;  %v3433_v44 = vadd.f32 %v3411_v17, %v3259_v22  ;;  %6124 = vmatmul.mubr.msk.f32.gmra.mxu0 %vm1519_vm5, %v3464_v45  ;;  %7713 = vmatprep.mubr.msk.f32.mxu1 %vm1519_vm5, %v3464_v45 }
 0x60f   :  { %v7520_v4 = vpop.f32.mrf.mxu0  ;;  %v10221_v27 = vpop.f32.mrf.mxu1  ;;  %4107 = vmatprep.mubr.f32.mxu0 %v8445_v0 }
 0x610   :  { %v3465_v59 = vmax.f32 %v3443_v60, %v3454_v43  ;;  %v3444_v48 = vadd.f32 %v3433_v44, %v10217_v19 }
 0x611   :  { %v3416_v42 = vpop.f32.mrf.mxu0  ;;  %v7575_v20 = vpop.f32.mrf.mxu1 }
 0x612   :  { %v3455_v23 = vmul.f32 0.01, %v3444_v48  ;;  %v3434_v55 = vadd.f32 %v3416_v42, %v3264_v58  ;;  %6125 = vmatmul.mubr.msk.f32.gmra.mxu0 %vm1519_vm5, %v3465_v59  ;;  %7714 = vmatmul.mubr.msk.f32.gmra.mxu1 %vm1519_vm5, %v3465_v59 }
 0x613   :  { %v7523_v41 = vpop.f32.mrf.mxu0  ;;  %v10231_v61 = vpop.f32.mrf.mxu1  ;;  %4113 = vmatprep.mubr.f32.mxu0 %v8445_v0 }
 0x614   :  { %v3466_v54 = vmax.f32 %v3444_v48, %v3455_v23  ;;  %v3445_v63 = vadd.f32 %v3434_v55, %v10227_v37 }
 0x615   :  { %v3421_v38 = vpop.f32.mrf.mxu0  ;;  %v7578_v5 = vpop.f32.mrf.mxu1 }
 0x616   :  { %v3456_v7 = vmul.f32 0.01, %v3445_v63  ;;  %v3435_v40 = vadd.f32 %v3421_v38, %v3269_v36  ;;  %6126 = vmatmul.mubr.msk.f32.gmra.mxu0 %vm1519_vm5, %v3466_v54  ;;  %7716 = vmatprep.mubr.msk.f32.mxu1 %vm1519_vm5, %v3466_v54 }
 0x617   :  { %v7526_v1 = vpop.f32.mrf.mxu0  ;;  %v10241_v10 = vpop.f32.mrf.mxu1  ;;  %4119 = vmatprep.mubr.f32.mxu0 %v8445_v0 }
 0x618   :  { %v3467_v11 = vmax.f32 %v3445_v63, %v3456_v7  ;;  %v3446_v26 = vadd.f32 %v3435_v40, %v10237_v18 }
 0x619   :  { %v7581_v62 = vpop.f32.mrf.mxu1  ;;  %v3666_v30 = vpop.f32.mrf.mxu0 }
 0x61a   :  { %v3457_v33 = vmul.f32 0.01, %v3446_v26  ;;  %v3667_v31 = vadd.f32 %v3666_v30, %v10149_v56  ;;  %6127 = vmatmul.mubr.msk.f32.gmra.mxu0 %vm1519_vm5, %v3467_v11  ;;  %7717 = vmatmul.mubr.msk.f32.gmra.mxu1 %vm1519_vm5, %v3467_v11 }
 0x61b   :  { %v7606_v9 = vpop.f32.mrf.mxu0  ;;  %v3786_v8 = vpop.f32.mrf.mxu1  ;;  %4125 = vmatprep.mubr.f32.mxu0 %v8445_v0 }
 0x61c   :  { %v3468_v24 = vmax.f32 %v3446_v26, %v3457_v33  ;;  %v3840_v50 = vadd.f32 %v3786_v8, %v3667_v31 }
 0x61d   :  { %v3671_v29 = vpop.f32.mrf.mxu0  ;;  %v7661_v16 = vpop.f32.mrf.mxu1 }
 0x61e   :  { %v3851_v51 = vadd.f32 %v3840_v50, %v10147_v47  ;;  %v3672_v52 = vadd.f32 %v3671_v29, %v10155_v2  ;;  %6128 = vmatmul.mubr.msk.f32.gmra.mxu0 %vm1519_vm5, %v3468_v24  ;;  %7719 = vmatprep.mubr.msk.f32.mxu1 %vm1519_vm5, %v3468_v24 }
 0x61f   :  { %v7609_v56 = vpop.f32.mrf.mxu0  ;;  %v3791_v12 = vpop.f32.mrf.mxu1  ;;  %4131 = vmatprep.mubr.f32.mxu0 %v8445_v0 }
 0x620   :  { %v3862_v21 = vmul.f32 0.01, %v3851_v51  ;;  %v3841_v34 = vadd.f32 %v3791_v12, %v3672_v52 }
 0x621   :  { %v3676_v22 = vpop.f32.mrf.mxu0  ;;  %v7664_v45 = vpop.f32.mrf.mxu1 }
 0x622   :  { %v3873_v60 = vmax.f32 %v3851_v51, %v3862_v21  ;;  %v3852_v17 = vadd.f32 %v3841_v34, %v10152_v57  ;;  %v3677_v15 = vadd.f32 %v3676_v22, %v10165_v39 }
 0x623   :  { %v7612_v47 = vpop.f32.mrf.mxu0  ;;  %v3796_v43 = vpop.f32.mrf.mxu1 }
 0x624   :  { %v3863_v2 = vmul.f32 0.01, %v3852_v17  ;;  %v3842_v44 = vadd.f32 %v3796_v43, %v3677_v15  ;;  %6129 = vmatmul.mubr.msk.f32.gmra.mxu0 %vm1519_vm5, %v3873_v60  ;;  %7720 = vmatmul.mubr.msk.f32.gmra.mxu1 %vm1519_vm5, %v3873_v60 }
 0x625   :  { %v3681_v4 = vpop.f32.mrf.mxu0  ;;  %v7667_v58 = vpop.f32.mrf.mxu1  ;;  %4137 = vmatprep.mubr.f32.mxu0 %v8445_v0 }
 0x626   :  { %v3874_v59 = vmax.f32 %v3852_v17, %v3863_v2  ;;  %v3853_v48 = vadd.f32 %v3842_v44, %v10160_v6  ;;  %v3682_v42 = vadd.f32 %v3681_v4, %v10175_v49 }
 0x627   :  { %v7615_v57 = vpop.f32.mrf.mxu0  ;;  %v3801_v20 = vpop.f32.mrf.mxu1 }
 0x628   :  { %v3864_v39 = vmul.f32 0.01, %v3853_v48  ;;  %v3843_v23 = vadd.f32 %v3801_v20, %v3682_v42  ;;  %6130 = vmatmul.mubr.msk.f32.gmra.mxu0 %vm1519_vm5, %v3874_v59  ;;  %7722 = vmatprep.mubr.msk.f32.mxu1 %vm1519_vm5, %v3874_v59 }
 0x629   :  { %v3686_v55 = vpop.f32.mrf.mxu0  ;;  %v7670_v41 = vpop.f32.mrf.mxu1  ;;  %4143 = vmatprep.mubr.f32.mxu0 %v8445_v0 }
 0x62a   :  { %v3875_v36 = vmax.f32 %v3853_v48, %v3864_v39  ;;  %v3854_v54 = vadd.f32 %v3843_v23, %v10170_v35  ;;  %v3687_v63 = vadd.f32 %v3686_v55, %v10185_v28 }
 0x62b   :  { %v7618_v6 = vpop.f32.mrf.mxu0  ;;  %v3806_v38 = vpop.f32.mrf.mxu1 }
 0x62c   :  { %v3865_v49 = vmul.f32 0.01, %v3854_v54  ;;  %v3844_v5 = vadd.f32 %v3806_v38, %v3687_v63  ;;  %6131 = vmatmul.mubr.msk.f32.gmra.mxu0 %vm1519_vm5, %v3875_v36  ;;  %7723 = vmatmul.mubr.msk.f32.gmra.mxu1 %vm1519_vm5, %v3875_v36 }
 0x62d   :  { %v3691_v7 = vpop.f32.mrf.mxu0  ;;  %v7673_v40 = vpop.f32.mrf.mxu1  ;;  %4149 = vmatprep.mubr.f32.mxu0 %v8445_v0 }
 0x62e   :  { %v3876_v1 = vmax.f32 %v3854_v54, %v3865_v49  ;;  %v3855_v11 = vadd.f32 %v3844_v5, %v10180_v53  ;;  %v3692_v26 = vadd.f32 %v3691_v7, %v10193_v14 }
 0x62f   :  { %v7621_v35 = vpop.f32.mrf.mxu0  ;;  %v3811_v62 = vpop.f32.mrf.mxu1 }
 0x630   :  { %v3866_v28 = vmul.f32 0.01, %v3855_v11  ;;  %v3845_v30 = vadd.f32 %v3811_v62, %v3692_v26  ;;  %6132 = vmatmul.mubr.msk.f32.gmra.mxu0 %vm1519_vm5, %v3876_v1  ;;  %7725 = vmatprep.mubr.msk.f32.mxu1 %vm1519_vm5, %v3876_v1 }
 0x631   :  { %v3696_v33 = vpop.f32.mrf.mxu0  ;;  %v7676_v31 = vpop.f32.mrf.mxu1  ;;  %4155 = vmatprep.mubr.f32.mxu0 %v8445_v0 }
 0x632   :  { %v3877_v9 = vmax.f32 %v3855_v11, %v3866_v28  ;;  %v3856_v8 = vadd.f32 %v3845_v30, %v10190_v3  ;;  %v3697_v24 = vadd.f32 %v3696_v33, %v10202_v25 }
 0x633   :  { %v7624_v53 = vpop.f32.mrf.mxu0  ;;  %v3816_v50 = vpop.f32.mrf.mxu1 }
 0x634   :  { %v3867_v14 = vmul.f32 0.01, %v3856_v8  ;;  %v3846_v29 = vadd.f32 %v3816_v50, %v3697_v24  ;;  %6133 = vmatmul.mubr.msk.f32.gmra.mxu0 %vm1519_vm5, %v3877_v9  ;;  %7726 = vmatmul.mubr.msk.f32.gmra.mxu1 %vm1519_vm5, %v3877_v9 }
 0x635   :  { %v3701_v16 = vpop.f32.mrf.mxu0  ;;  %v7679_v51 = vpop.f32.mrf.mxu1  ;;  %4161 = vmatprep.mubr.f32.mxu0 %v8445_v0 }
 0x636   :  { %v3878_v52 = vmax.f32 %v3856_v8, %v3867_v14  ;;  %v3857_v56 = vadd.f32 %v3846_v29, %v10200_v46  ;;  %v3702_v12 = vadd.f32 %v3701_v16, %v10212_v13 }
 0x637   :  { %v7627_v3 = vpop.f32.mrf.mxu0  ;;  %v3821_v21 = vpop.f32.mrf.mxu1 }
 0x638   :  { %v3868_v25 = vmul.f32 0.01, %v3857_v56  ;;  %v3847_v34 = vadd.f32 %v3821_v21, %v3702_v12  ;;  %6134 = vmatmul.mubr.msk.f32.gmra.mxu0 %vm1519_vm5, %v3878_v52  ;;  %7728 = vmatprep.mubr.msk.f32.mxu1 %vm1519_vm5, %v3878_v52 }
 0x639   :  { %v3706_v22 = vpop.f32.mrf.mxu0  ;;  %v7682_v45 = vpop.f32.mrf.mxu1  ;;  %4167 = vmatprep.mubr.f32.mxu0 %v8445_v0 }
 0x63a   :  { %v3879_v60 = vmax.f32 %v3857_v56, %v3868_v25  ;;  %v3858_v17 = vadd.f32 %v3847_v34, %v10207_v32  ;;  %v3707_v15 = vadd.f32 %v3706_v22, %v10221_v27 }
 0x63b   :  { %v7630_v46 = vpop.f32.mrf.mxu0  ;;  %v3826_v47 = vpop.f32.mrf.mxu1 }
 0x63c   :  { %v3869_v13 = vmul.f32 0.01, %v3858_v17  ;;  %v3848_v43 = vadd.f32 %v3826_v47, %v3707_v15  ;;  %6135 = vmatmul.mubr.msk.f32.gmra.mxu0 %vm1519_vm5, %v3879_v60  ;;  %7729 = vmatmul.mubr.msk.f32.gmra.mxu1 %vm1519_vm5, %v3879_v60 }
 0x63d   :  { %v3711_v2 = vpop.f32.mrf.mxu0  ;;  %v7685_v44 = vpop.f32.mrf.mxu1  ;;  %4173 = vmatprep.mubr.f32.mxu0 %v8445_v0 }
 0x63e   :  { %v3880_v4 = vmax.f32 %v3858_v17, %v3869_v13  ;;  %v3859_v58 = vadd.f32 %v3848_v43, %v10217_v19  ;;  %v3712_v59 = vadd.f32 %v3711_v2, %v10231_v61  ;;  %v10374_v43 = vld [vmem:[%s11645_s10] sm:$0xff] }
 0x63f   :  { %v7633_v32 = vpop.f32.mrf.mxu0  ;;  %v3831_v48 = vpop.f32.mrf.mxu1 }
 0x640   :  { %v3870_v27 = vmul.f32 0.01, %v3859_v58  ;;  %v3849_v42 = vadd.f32 %v3831_v48, %v3712_v59  ;;  %6136 = vmatmul.mubr.msk.f32.gmra.mxu0 %vm1519_vm5, %v3880_v4  ;;  %7731 = vmatprep.mubr.msk.f32.mxu1 %vm1519_vm5, %v3880_v4  ;;  %v10387_v4 = vld [vmem:[%s11645_s10 + $0xa8] sm:$0xff] }
 0x641   :  { %v3716_v57 = vpop.f32.mrf.mxu0  ;;  %v7688_v20 = vpop.f32.mrf.mxu1  ;;  %4179 = vmatprep.mubr.f32.mxu0 %v8445_v0  ;;  %v10400_v59 = vld [vmem:[%s11645_s10 + $0x8] sm:$0xff] }
 0x642   :  { %v3881_v39 = vmax.f32 %v3859_v58, %v3870_v27  ;;  %v3860_v23 = vadd.f32 %v3849_v42, %v10227_v37  ;;  %v3717_v55 = vadd.f32 %v3716_v57, %v10241_v10  ;;  %v10412_v27 = vld [vmem:[%s11645_s10 + $0xb0] sm:$0xff] }
 0x643   :  { %v3836_v19 = vpop.f32.mrf.mxu1  ;;  %v7636_v41 = vpop.f32.mrf.mxu0  ;;  %v10424_v57 = vld [vmem:[%s11645_s10 + $0x10] sm:$0xff] }
 0x644   :  { %v3871_v61 = vmul.f32 0.01, %v3860_v23  ;;  %v3850_v36 = vadd.f32 %v3836_v19, %v3717_v55  ;;  %6137 = vmatmul.mubr.msk.f32.gmra.mxu0 %vm1519_vm5, %v3881_v39  ;;  %7732 = vmatmul.mubr.msk.f32.gmra.mxu1 %vm1519_vm5, %v3881_v39  ;;  %v10436_v39 = vld [vmem:[%s11645_s10 + $0xb8] sm:$0xff]  ;;  %v10462_v41 = vld [vmem:[%s11645_s10 + $0xc0] sm:$0xff] }
 0x645   :  { %4185 = vmatprep.mubr.f32.mxu0 %v8445_v0  ;;  %v7691_v54 = vpop.f32.mrf.mxu1  ;;  %v10449_v55 = vld [vmem:[%s11645_s10 + $0x18] sm:$0xff] }
 0x646   :  { %v3882_v63 = vmax.f32 %v3860_v23, %v3871_v61  ;;  %v3861_v6 = vadd.f32 %v3850_v36, %v10237_v18  ;;  %v10475_v36 = vld [vmem:[%s11645_s10 + $0x20] sm:$0xff] }
 0x648   :  { %v3872_v38 = vmul.f32 0.01, %v3861_v6  ;;  %6138 = vmatmul.mubr.msk.f32.gmra.mxu0 %vm1519_vm5, %v3882_v63  ;;  %7734 = vmatprep.mubr.msk.f32.mxu1 %vm1519_vm5, %v3882_v63  ;;  %v10486_v63 = vld [vmem:[%s11645_s10 + $0xc8] sm:$0xff] }
 0x649   :  { %4191 = vmatprep.mubr.f32.mxu0 %v8445_v0 }
 0x64a   :  { %v3883_v37 = vmax.f32 %v3861_v6, %v3872_v38  ;;  %v10499_v38 = vld [vmem:[%s11645_s10 + $0x28] sm:$0xff] }
 0x64c   :  { %6139 = vmatmul.mubr.msk.f32.gmra.mxu0 %vm1519_vm5, %v3883_v37  ;;  %7735 = vmatmul.mubr.msk.f32.gmra.mxu1 %vm1519_vm5, %v3883_v37 }
 0x64d   :  { %7844 = vmatprep.mubr.msk.f32.mxu0 %vm8446_vm4, %v8445_v0  ;;  %7759 = vmatprep.mubr.msk.f32.mxu1 %vm8446_vm4, %v8445_v0 }
 0x6ac   :  { %v10309_v10 = vpop.f32.mrf.mxu0 }
 0x6ae   :  { %v10311_v18 = vpop.f32.mrf.mxu0 }
 0x6b1   :  { %v10313_v49 = vpop.f32.mrf.mxu0  ;;  %v10321_v9 = vpop.f32.mrf.mxu1 }
 0x6b3   :  { %v10315_v5 = vpop.f32.mrf.mxu0  ;;  %v10323_v53 = vpop.f32.mrf.mxu1 }
 0x6b7   :  { %v10317_v7 = vpop.f32.mrf.mxu0 }
 0x6b9   :  { %v10319_v40 = vpop.f32.mrf.mxu0 }
 0x6bd   :  { %v4085_v1 = vpop.f32.mrf.mxu0  ;;  %v10325_v14 = vpop.f32.mrf.mxu1 }
 0x6bf   :  { %v4087_v11 = vpop.f32.mrf.mxu0  ;;  %v10327_v51 = vpop.f32.mrf.mxu1 }
 0x6c3   :  { %v4091_v26 = vpop.f32.mrf.mxu0 }
 0x6c5   :  { %v4093_v35 = vpop.f32.mrf.mxu0 }
 0x6c9   :  { %v4097_v62 = vpop.f32.mrf.mxu0  ;;  %v10329_v56 = vpop.f32.mrf.mxu1 }
 0x6cb   :  { %v4099_v28 = vpop.f32.mrf.mxu0  ;;  %v10334_v3 = vpop.f32.mrf.mxu1 }
 0x6ce   :  { %v4103_v30 = vpop.f32.mrf.mxu0 }
 0x6d0   :  { %v4105_v33 = vpop.f32.mrf.mxu0 }
 0x6d2   :  { %v4109_v31 = vpop.f32.mrf.mxu0  ;;  %v10340_v25 = vpop.f32.mrf.mxu1 }
 0x6d4   :  { %v4111_v8 = vpop.f32.mrf.mxu0  ;;  %v10350_v45 = vpop.f32.mrf.mxu1 }
 0x6d6   :  { %v4115_v24 = vpop.f32.mrf.mxu0 }
 0x6d8   :  { %v4117_v50 = vpop.f32.mrf.mxu0 }
 0x6da   :  { %v4121_v29 = vpop.f32.mrf.mxu0  ;;  %v7718_v17 = vpop.f32.mrf.mxu1 }
 0x6dc   :  { %v4123_v16 = vpop.f32.mrf.mxu0  ;;  %v4304_v47 = vpop.f32.mrf.mxu1 }
 0x6de   :  { %v4127_v52 = vpop.f32.mrf.mxu0 }
 0x6df   :  { %7823 = vmatpush3.msra.mxu0 %v4127_v52 }
 0x6e0   :  { %v4129_v12 = vpop.f32.mrf.mxu0  ;;  %7824 = vmatprep.subr.mxu0 %v8445_v0 }
 0x6e1   :  { %7738 = vmatpush3.msra.mxu1 %v4129_v12  ;;  %7825 = vmatpush3.msra.mxu0 %v4121_v29  ;;  %v10691_v29 = vld [vmem:[%s11645_s10 + $0x70] sm:$0xff]  ;;  %v10729_v12 = vld [vmem:[%s11645_s10 + $0x80] sm:$0xff] }
 0x6e2   :  { %7739 = vmatprep.subr.mxu1 %v8445_v0  ;;  %7826 = vmatprep.subr.mxu0 %v8445_v0 }
 0x6e3   :  { %7740 = vmatpush3.msra.mxu1 %v4123_v16  ;;  %7827 = vmatpush3.msra.mxu0 %v4115_v24  ;;  %v10652_v24 = vld [vmem:[%s11645_s10 + $0x60] sm:$0xff]  ;;  %v10700_v16 = vld [vmem:[%s11645_s10 + $0x118] sm:$0xff] }
 0x6e4   :  { %v10336_v21 = vpop.f32.mrf.mxu0  ;;  %7741 = vmatprep.subr.mxu1 %v8445_v0  ;;  %7828 = vmatprep.subr.mxu0 %v8445_v0  ;;  %v10376_v2 = vpop.f32.mrf.mxu1 }
 0x6e5   :  { %7742 = vmatpush3.msra.mxu1 %v4117_v50  ;;  %7829 = vmatpush3.msra.mxu0 %v4109_v31  ;;  %v10619_v31 = vld [vmem:[%s11645_s10 + $0xf8] sm:$0xff]  ;;  %v10673_v50 = vld [vmem:[%s11645_s10 + $0x68] sm:$0xff] }
 0x6e6   :  { %v10342_v34 = vpop.f32.mrf.mxu0  ;;  %7743 = vmatprep.subr.mxu1 %v8445_v0  ;;  %7830 = vmatprep.subr.mxu0 %v8445_v0  ;;  %v4314_v32 = vpop.f32.mrf.mxu1 }
 0x6e7   :  { %7744 = vmatpush3.msra.mxu1 %v4111_v8  ;;  %7831 = vmatpush3.msra.mxu0 %v4103_v30  ;;  %v10597_v30 = vld [vmem:[%s11645_s10 + $0xf0] sm:$0xff]  ;;  %v10641_v8 = vld [vmem:[%s11645_s10 + $0x100] sm:$0xff] }
 0x6e8   :  { %v10346_v22 = vpop.f32.mrf.mxu0  ;;  %7745 = vmatprep.subr.mxu1 %v8445_v0  ;;  %7832 = vmatprep.subr.mxu0 %v8445_v0 }
 0x6e9   :  { %7746 = vmatpush3.msra.mxu1 %v4105_v33  ;;  %7833 = vmatpush3.msra.mxu0 %v4097_v62  ;;  %v10576_v62 = vld [vmem:[%s11645_s10 + $0xe8] sm:$0xff]  ;;  %v10608_v33 = vld [vmem:[%s11645_s10 + $0x50] sm:$0xff] }
 0x6ea   :  { %v10352_v60 = vpop.f32.mrf.mxu0  ;;  %7747 = vmatprep.subr.mxu1 %v8445_v0  ;;  %7834 = vmatprep.subr.mxu0 %v8445_v0 }
 0x6eb   :  { %7748 = vmatpush3.msra.mxu1 %v4099_v28  ;;  %7835 = vmatpush3.msra.mxu0 %v4091_v26  ;;  %v10556_v26 = vld [vmem:[%s11645_s10 + $0xe0] sm:$0xff]  ;;  %v10586_v28 = vld [vmem:[%s11645_s10 + $0x48] sm:$0xff] }
 0x6ec   :  { %v10356_v15 = vpop.f32.mrf.mxu0  ;;  %7749 = vmatprep.subr.mxu1 %v8445_v0  ;;  %7836 = vmatprep.subr.mxu0 %v8445_v0  ;;  %v10711_v52 = vpop.f32.mrf.mxu1 }
 0x6ed   :  { %7750 = vmatpush3.msra.mxu1 %v4093_v35  ;;  %7837 = vmatpush3.msra.mxu0 %v4085_v1  ;;  %v10546_v1 = vld [vmem:[%s11645_s10 + $0x38] sm:$0xff]  ;;  %v10566_v35 = vld [vmem:[%s11645_s10 + $0x40] sm:$0xff] }
 0x6ee   :  { %v10360_v46 = vpop.f32.mrf.mxu0  ;;  %7751 = vmatprep.subr.mxu1 %v8445_v0  ;;  %7838 = vmatprep.subr.mxu0 %v8445_v0 }
 0x6ef   :  { %7752 = vmatpush3.msra.mxu1 %v4087_v11  ;;  %7839 = vmatpush3.msra.mxu0 %v10317_v7  ;;  %v10534_v7 = vld [vmem:[%s11645_s10 + $0xd8] sm:$0xff] }
 0x6f0   :  { %v10365_v13 = vpop.f32.mrf.mxu0  ;;  %7753 = vmatprep.subr.mxu1 %v8445_v0  ;;  %7840 = vmatprep.subr.mxu0 %v8445_v0 }
 0x6f1   :  { %7754 = vmatpush3.msra.mxu1 %v10319_v40  ;;  %7841 = vmatpush3.msra.mxu0 %v10313_v49  ;;  %v10523_v49 = vld [vmem:[%s11645_s10 + $0x30] sm:$0xff] }
 0x6f2   :  { %v10378_v44 = vpop.f32.mrf.mxu0  ;;  %7755 = vmatprep.subr.mxu1 %v8445_v0  ;;  %7842 = vmatprep.subr.mxu0 %v8445_v0 }
 0x6f3   :  { %7756 = vmatpush3.msra.mxu1 %v10315_v5  ;;  %7843 = vmatpush3.msra.mxu0 %v10309_v10  ;;  %v10510_v10 = vld [vmem:[%s11645_s10 + $0xd0] sm:$0xff] }
 0x6f4   :  { %v10389_v58 = vpop.f32.mrf.mxu0  ;;  %7757 = vmatprep.subr.mxu1 %v8445_v0  ;;  %7845 = vmatmul.mubr.msk.f32.vlgmr.msra.gmra.mxu0 %vm2965_vm7, %v10374_v43 }
 0x6f5   :  { %7758 = vmatpush3.msra.mxu1 %v10311_v18  ;;  %7847 = vmatprep.mubr.msk.f32.mxu0 %vm8446_vm4, %v8445_v0 }
 0x6f6   :  { %v10402_v48 = vpop.f32.mrf.mxu0  ;;  %7760 = vmatmul.mubr.msk.f32.vlgmr.msra.gmra.mxu1 %vm2965_vm7, %v10387_v4  ;;  %7907 = vmatprep.subr.mxu1 %v8445_v0 }
 0x6f7   :  { %7908 = vmatpush3.msra.mxu1 %v4314_v32  ;;  %7762 = vmatprep.mubr.msk.f32.mxu1 %vm8446_vm4, %v8445_v0  ;;  %v10789_v32 = vld [vmem:[%s11645_s10 + $0x98] sm:$0xff] }
 0x6f8   :  { %v10414_v42 = vpop.f32.mrf.mxu0  ;;  %7848 = vmatmul.mubr.msk.f32.gmra.mxu0 %vm2965_vm7, %v10400_v59  ;;  %7909 = vmatprep.subr.mxu1 %v8445_v0  ;;  %11651 = vst [vmem:[#allocation21_spill] sm:$0xff] %v10789_v32 }
 0x6f9   :  { %7910 = vmatpush3.msra.mxu1 %v7718_v17  ;;  %7850 = vmatprep.mubr.msk.f32.mxu0 %vm8446_vm4, %v8445_v0 }
 0x6fa   :  { %v10426_v20 = vpop.f32.mrf.mxu0  ;;  %7763 = vmatmul.mubr.msk.f32.gmra.mxu1 %vm2965_vm7, %v10412_v27  ;;  %7911 = vmatprep.subr.mxu1 %v8445_v0 }
 0x6fb   :  { %7912 = vmatpush3.msra.mxu1 %v4304_v47  ;;  %7765 = vmatprep.mubr.msk.f32.mxu1 %vm8446_vm4, %v8445_v0 }
 0x6fc   :  { %v10438_v23 = vpop.f32.mrf.mxu0  ;;  %7851 = vmatmul.mubr.msk.f32.gmra.mxu0 %vm2965_vm7, %v10424_v57  ;;  %7913 = vmatprep.subr.mxu1 %v8445_v0 }
 0x6fd   :  { %7914 = vmatpush3.msra.mxu1 %v10340_v25  ;;  %7853 = vmatprep.mubr.msk.f32.mxu0 %vm8446_vm4, %v8445_v0  ;;  %v10740_v25 = vld [vmem:[%s11645_s10 + $0x128] sm:$0xff] }
 0x6fe   :  { %v10451_v19 = vpop.f32.mrf.mxu0  ;;  %7766 = vmatmul.mubr.msk.f32.gmra.mxu1 %vm2965_vm7, %v10436_v39  ;;  %7915 = vmatprep.subr.mxu1 %v8445_v0 }
 0x6ff   :  { %7916 = vmatpush3.msra.mxu1 %v10350_v45  ;;  %7768 = vmatprep.mubr.msk.f32.mxu1 %vm8446_vm4, %v8445_v0  ;;  %v10751_v45 = vld [vmem:[%s11645_s10 + $0x88] sm:$0xff] }
 0x700   :  { %v10464_v61 = vpop.f32.mrf.mxu0  ;;  %7854 = vmatmul.mubr.msk.f32.gmra.mxu0 %vm2965_vm7, %v10449_v55  ;;  %7917 = vmatprep.subr.mxu1 %v8445_v0 }
 0x701   :  { %7918 = vmatpush3.msra.mxu1 %v10329_v56  ;;  %7856 = vmatprep.mubr.msk.f32.mxu0 %vm8446_vm4, %v8445_v0  ;;  %v10720_v56 = vld [vmem:[%s11645_s10 + $0x120] sm:$0xff] }
 0x702   :  { %v4177_v54 = vpop.f32.mrf.mxu0  ;;  %7769 = vmatmul.mubr.msk.f32.gmra.mxu1 %vm2965_vm7, %v10462_v41  ;;  %7919 = vmatprep.subr.mxu1 %v8445_v0 }
 0x703   :  { %7920 = vmatpush3.msra.mxu1 %v10334_v3  ;;  %7771 = vmatprep.mubr.msk.f32.mxu1 %vm8446_vm4, %v8445_v0  ;;  %v10731_v3 = vpop.f32.mrf.mxu1 }
 0x704   :  { %v10488_v6 = vpop.f32.mrf.mxu0  ;;  %7857 = vmatmul.mubr.msk.f32.gmra.mxu0 %vm2965_vm7, %v10475_v36  ;;  %7921 = vmatprep.subr.mxu1 %v8445_v0 }
 0x705   :  { %7922 = vmatpush3.msra.mxu1 %v10325_v14  ;;  %7859 = vmatprep.mubr.msk.f32.mxu0 %vm8446_vm4, %v8445_v0  ;;  %v10682_v14 = vld [vmem:[%s11645_s10 + $0x110] sm:$0xff] }
 0x706   :  { %v4183_v37 = vpop.f32.mrf.mxu0  ;;  %7772 = vmatmul.mubr.msk.f32.gmra.mxu1 %vm2965_vm7, %v10486_v63  ;;  %7923 = vmatprep.subr.mxu1 %v8445_v0 }
 0x707   :  { %7924 = vmatpush3.msra.mxu1 %v10327_v51  ;;  %7774 = vmatprep.mubr.msk.f32.mxu1 %vm8446_vm4, %v8445_v0  ;;  %v10709_v51 = vld [vmem:[%s11645_s10 + $0x78] sm:$0xff] }
 0x708   :  { %v10512_v18 = vpop.f32.mrf.mxu0  ;;  %7860 = vmatmul.mubr.msk.f32.gmra.mxu0 %vm2965_vm7, %v10499_v38  ;;  %7925 = vmatprep.subr.mxu1 %v8445_v0 }
 0x709   :  { %7926 = vmatpush3.msra.mxu1 %v10321_v9  ;;  %7862 = vmatprep.mubr.msk.f32.mxu0 %vm8446_vm4, %v8445_v0  ;;  %v10630_v9 = vld [vmem:[%s11645_s10 + $0x58] sm:$0xff] }
 0x70a   :  { %v4189_v5 = vpop.f32.mrf.mxu0  ;;  %7775 = vmatmul.mubr.msk.f32.gmra.mxu1 %vm2965_vm7, %v10510_v10  ;;  %7927 = vmatprep.subr.mxu1 %v8445_v0 }
 0x70b   :  { %7928 = vmatpush3.msra.mxu1 %v10323_v53  ;;  %7777 = vmatprep.mubr.msk.f32.mxu1 %vm8446_vm4, %v8445_v0  ;;  %v10663_v53 = vld [vmem:[%s11645_s10 + $0x108] sm:$0xff] }
 0x70c   :  { %v10536_v40 = vpop.f32.mrf.mxu0  ;;  %7863 = vmatmul.mubr.msk.f32.gmra.mxu0 %vm2965_vm7, %v10523_v49  ;;  %7992 = vmatprep.subr.mxu0 %v8445_v0 }
 0x70d   :  { %7865 = vmatprep.mubr.msk.f32.mxu0 %vm8446_vm4, %v8445_v0  ;;  %8077 = vmatprep.subr.mxu1 %v8445_v0 }
 0x70e   :  { %v4195_v11 = vpop.f32.mrf.mxu0  ;;  %7778 = vmatmul.mubr.msk.f32.gmra.mxu1 %vm2965_vm7, %v10534_v7 }
 0x70f   :  { %7993 = vmatpush3.msra.mxu0 %v4195_v11  ;;  %7780 = vmatprep.mubr.msk.f32.mxu1 %vm8446_vm4, %v8445_v0 }
 0x710   :  { %7866 = vmatmul.mubr.msk.f32.gmra.mxu0 %vm2965_vm7, %v10546_v1  ;;  %7994 = vmatprep.subr.mxu0 %v8445_v0 }
 0x711   :  { %7995 = vmatpush3.msra.mxu0 %v4189_v5  ;;  %7868 = vmatprep.mubr.msk.f32.mxu0 %vm8446_vm4, %v8445_v0 }
 0x712   :  { %7781 = vmatmul.mubr.msk.f32.gmra.mxu1 %vm2965_vm7, %v10556_v26  ;;  %7996 = vmatprep.subr.mxu0 %v8445_v0 }
 0x713   :  { %7997 = vmatpush3.msra.mxu0 %v4183_v37  ;;  %7783 = vmatprep.mubr.msk.f32.mxu1 %vm8446_vm4, %v8445_v0  ;;  %v10816_v37 = vld [vmem:[%s11645_s10 + $0x148] sm:$0xff] }
 0x714   :  { %7869 = vmatmul.mubr.msk.f32.gmra.mxu0 %vm2965_vm7, %v10566_v35  ;;  %7998 = vmatprep.subr.mxu0 %v8445_v0 }
 0x715   :  { %7999 = vmatpush3.msra.mxu0 %v4177_v54  ;;  %7871 = vmatprep.mubr.msk.f32.mxu0 %vm8446_vm4, %v8445_v0  ;;  %v10807_v54 = vld [vmem:[%s11645_s10 + $0xa0] sm:$0xff] }
 0x716   :  { %7784 = vmatmul.mubr.msk.f32.gmra.mxu1 %vm2965_vm7, %v10576_v62  ;;  %8000 = vmatprep.subr.mxu0 %v8445_v0  ;;  %11652 = vst [vmem:[#allocation22_spill] sm:$0xff] %v10807_v54 }
 0x717   :  { %8001 = vmatpush3.msra.mxu0 %v10451_v19  ;;  %7786 = vmatprep.mubr.msk.f32.mxu1 %vm8446_vm4, %v8445_v0 }
 0x718   :  { %7872 = vmatmul.mubr.msk.f32.gmra.mxu0 %vm2965_vm7, %v10586_v28  ;;  %8002 = vmatprep.subr.mxu0 %v8445_v0 }
 0x719   :  { %8003 = vmatpush3.msra.mxu0 %v10426_v20  ;;  %7874 = vmatprep.mubr.msk.f32.mxu0 %vm8446_vm4, %v8445_v0  ;;  %v10798_v20 = vld [vmem:[%s11645_s10 + $0x140] sm:$0xff] }
 0x71a   :  { %7787 = vmatmul.mubr.msk.f32.gmra.mxu1 %vm2965_vm7, %v10597_v30  ;;  %8004 = vmatprep.subr.mxu0 %v8445_v0 }
 0x71b   :  { %8005 = vmatpush3.msra.mxu0 %v10402_v48  ;;  %7789 = vmatprep.mubr.msk.f32.mxu1 %vm8446_vm4, %v8445_v0 }
 0x71c   :  { %7875 = vmatmul.mubr.msk.f32.gmra.mxu0 %vm2965_vm7, %v10608_v33  ;;  %8006 = vmatprep.subr.mxu0 %v8445_v0 }
 0x71d   :  { %8007 = vmatpush3.msra.mxu0 %v10378_v44  ;;  %7877 = vmatprep.mubr.msk.f32.mxu0 %vm8446_vm4, %v8445_v0  ;;  %v10780_v44 = vld [vmem:[%s11645_s10 + $0x138] sm:$0xff] }
 0x71e   :  { %7790 = vmatmul.mubr.msk.f32.gmra.mxu1 %vm2965_vm7, %v10619_v31  ;;  %8008 = vmatprep.subr.mxu0 %v8445_v0 }
 0x71f   :  { %8009 = vmatpush3.msra.mxu0 %v10360_v46  ;;  %7792 = vmatprep.mubr.msk.f32.mxu1 %vm8446_vm4, %v8445_v0  ;;  %v10771_v46 = vld [vmem:[%s11645_s10 + $0x90] sm:$0xff] }
 0x720   :  { %7878 = vmatmul.mubr.msk.f32.gmra.mxu0 %vm2965_vm7, %v10630_v9  ;;  %8010 = vmatprep.subr.mxu0 %v8445_v0 }
 0x721   :  { %8011 = vmatpush3.msra.mxu0 %v10352_v60  ;;  %7880 = vmatprep.mubr.msk.f32.mxu0 %vm8446_vm4, %v8445_v0  ;;  %v10760_v60 = vld [vmem:[%s11645_s10 + $0x130] sm:$0xff] }
 0x722   :  { %7793 = vmatmul.mubr.msk.f32.gmra.mxu1 %vm2965_vm7, %v10641_v8  ;;  %8012 = vmatprep.subr.mxu0 %v8445_v0 }
 0x723   :  { %8013 = vmatpush3.msra.mxu0 %v10342_v34  ;;  %7795 = vmatprep.mubr.msk.f32.mxu1 %vm8446_vm4, %v8445_v0  ;;  %v10742_v34 = vpop.f32.mrf.mxu1 }
 0x724   :  { %7881 = vmatmul.mubr.msk.f32.gmra.mxu0 %vm2965_vm7, %v10652_v24  ;;  %8162 = vmatprep.subr.mxu0 %v8445_v0 }
 0x725   :  { %7883 = vmatprep.mubr.msk.f32.mxu0 %vm8446_vm4, %v8445_v0  ;;  %v10762_v17 = vpop.f32.mrf.mxu1 }
 0x726   :  { %7796 = vmatmul.mubr.msk.f32.gmra.mxu1 %vm2965_vm7, %v10663_v53 }
 0x727   :  { %7798 = vmatprep.mubr.msk.f32.mxu1 %vm8446_vm4, %v8445_v0  ;;  %v7730_v47 = vpop.f32.mrf.mxu1 }
 0x728   :  { %7884 = vmatmul.mubr.msk.f32.gmra.mxu0 %vm2965_vm7, %v10673_v50 }
 0x729   :  { %7886 = vmatprep.mubr.msk.f32.mxu0 %vm8446_vm4, %v8445_v0  ;;  %v4344_v48 = vpop.f32.mrf.mxu1 }
 0x72a   :  { %7799 = vmatmul.mubr.msk.f32.gmra.mxu1 %vm2965_vm7, %v10682_v14 }
 0x72b   :  { %7801 = vmatprep.mubr.msk.f32.mxu1 %vm8446_vm4, %v8445_v0  ;;  %v7733_v19 = vpop.f32.mrf.mxu1 }
 0x72c   :  { %7887 = vmatmul.mubr.msk.f32.gmra.mxu0 %vm2965_vm7, %v10691_v29 }
 0x72d   :  { %7889 = vmatprep.mubr.msk.f32.mxu0 %vm8446_vm4, %v8445_v0  ;;  %v4354_v5 = vpop.f32.mrf.mxu1 }
 0x72e   :  { %7802 = vmatmul.mubr.msk.f32.gmra.mxu1 %vm2965_vm7, %v10700_v16 }
 0x72f   :  { %7804 = vmatprep.mubr.msk.f32.mxu1 %vm8446_vm4, %v8445_v0  ;;  %v7736_v11 = vpop.f32.mrf.mxu1 }
 0x730   :  { %7890 = vmatmul.mubr.msk.f32.gmra.mxu0 %vm2965_vm7, %v10709_v51 }
 0x731   :  { %7892 = vmatprep.mubr.msk.f32.mxu0 %vm8446_vm4, %v8445_v0 }
 0x732   :  { %7805 = vmatmul.mubr.msk.f32.gmra.mxu1 %vm2965_vm7, %v10720_v56 }
 0x733   :  { %7807 = vmatprep.mubr.msk.f32.mxu1 %vm8446_vm4, %v8445_v0 }
 0x734   :  { %7893 = vmatmul.mubr.msk.f32.gmra.mxu0 %vm2965_vm7, %v10729_v12 }
 0x735   :  { %7895 = vmatprep.mubr.msk.f32.mxu0 %vm8446_vm4, %v8445_v0 }
 0x736   :  { %7808 = vmatmul.mubr.msk.f32.gmra.mxu1 %vm2965_vm7, %v10740_v25 }
 0x737   :  { %7810 = vmatprep.mubr.msk.f32.mxu1 %vm8446_vm4, %v8445_v0 }
 0x738   :  { %7896 = vmatmul.mubr.msk.f32.gmra.mxu0 %vm2965_vm7, %v10751_v45 }
 0x739   :  { %7898 = vmatprep.mubr.msk.f32.mxu0 %vm8446_vm4, %v8445_v0 }
 0x73a   :  { %7811 = vmatmul.mubr.msk.f32.gmra.mxu1 %vm2965_vm7, %v10760_v60 }
 0x73b   :  { %7813 = vmatprep.mubr.msk.f32.mxu1 %vm8446_vm4, %v8445_v0 }
 0x73c   :  { %7899 = vmatmul.mubr.msk.f32.gmra.mxu0 %vm2965_vm7, %v10771_v46 }
 0x73d   :  { %7901 = vmatprep.mubr.msk.f32.mxu0 %vm8446_vm4, %v8445_v0 }
 0x73e   :  { %7814 = vmatmul.mubr.msk.f32.gmra.mxu1 %vm2965_vm7, %v10780_v44 }
 0x73f   :  { %7816 = vmatprep.mubr.msk.f32.mxu1 %vm8446_vm4, %v8445_v0 }
 0x740   :  { %7902 = vmatmul.mubr.msk.f32.gmra.mxu0 %vm2965_vm7, %v10789_v32  ;;  %v10829_v32 = vld [vmem:[%s11645_s10 + $0x150] sm:$0xff] }
 0x741   :  { %7904 = vmatprep.mubr.msk.f32.mxu0 %vm8446_vm4, %v8445_v0 }
 0x742   :  { %7817 = vmatmul.mubr.msk.f32.gmra.mxu1 %vm2965_vm7, %v10798_v20 }
 0x743   :  { %7819 = vmatprep.mubr.msk.f32.mxu1 %vm8446_vm4, %v8445_v0 }
 0x744   :  { %7905 = vmatmul.mubr.msk.f32.gmra.mxu0 %vm2965_vm7, %v10807_v54  ;;  %v4364_v54 = vpop.f32.mrf.mxu1 }
 0x745   :  { %8014 = vmatprep.mubr.msk.f32.mxu0 %vm8446_vm4, %v8445_v0 }
 0x746   :  { %7820 = vmatmul.mubr.msk.f32.gmra.mxu1 %vm2965_vm7, %v10816_v37 }
 0x747   :  { %7929 = vmatprep.mubr.msk.f32.mxu1 %vm8446_vm4, %v8445_v0 }
 0x748   :  { %8015 = vmatmul.mubr.msk.f32.vlgmr.msra.gmra.mxu0 %vm2965_vm7, %v10387_v4  ;;  %v10844_v4 = vld [vmem:[%s11645_s10 + $0x158] sm:$0xff] }
 0x749   :  { %8163 = vmatpush3.msra.mxu0 %v7736_v11  ;;  %8017 = vmatprep.mubr.msk.f32.mxu0 %vm8446_vm4, %v8445_v0 }
 0x74a   :  { %8164 = vmatprep.subr.mxu0 %v8445_v0  ;;  %7930 = vmatmul.mubr.msk.f32.vlgmr.msra.gmra.mxu1 %vm2965_vm7, %v10829_v32 }
 0x74b   :  { %8078 = vmatpush3.msra.mxu1 %v10536_v40  ;;  %8165 = vmatpush3.msra.mxu0 %v4364_v54  ;;  %v11108_v40 = vld [vmem:[%s11645_s10 + $0x1e8] sm:$0xff] }
 0x74c   :  { %8079 = vmatprep.subr.mxu1 %v8445_v0  ;;  %8166 = vmatprep.subr.mxu0 %v8445_v0 }
 0x74d   :  { %8080 = vmatpush3.msra.mxu1 %v10512_v18  ;;  %8167 = vmatpush3.msra.mxu0 %v7733_v19  ;;  %v10862_v18 = vld [vmem:[%s11645_s10 + $0x160] sm:$0xff] }
 0x74e   :  { %7932 = vmatprep.mubr.msk.f32.mxu1 %vm8446_vm4, %v8445_v0  ;;  %8081 = vmatprep.subr.mxu1 %v8445_v0 }
 0x74f   :  { %8168 = vmatprep.subr.mxu0 %v8445_v0  ;;  %7933 = vmatmul.mubr.msk.f32.gmra.mxu1 %vm2965_vm7, %v10844_v4 }
 0x750   :  { %8082 = vmatpush3.msra.mxu1 %v10488_v6  ;;  %8169 = vmatpush3.msra.mxu0 %v4354_v5  ;;  %v11069_v6 = vld [vmem:[%s11645_s10 + $0x1d0] sm:$0xff] }
 0x751   :  { %8083 = vmatprep.subr.mxu1 %v8445_v0  ;;  %8170 = vmatprep.subr.mxu0 %v8445_v0 }
 0x752   :  { %8018 = vmatmul.mubr.msk.f32.gmra.mxu0 %vm2965_vm7, %v10412_v27  ;;  %8084 = vmatpush3.msra.mxu1 %v10464_v61  ;;  %v10881_v27 = vld [vmem:[%s11645_s10 + $0x168] sm:$0xff]  ;;  %v11043_v61 = vld [vmem:[%s11645_s10 + $0x1c0] sm:$0xff] }
 0x753   :  { %8171 = vmatpush3.msra.mxu0 %v7730_v47  ;;  %7935 = vmatprep.mubr.msk.f32.mxu1 %vm8446_vm4, %v8445_v0 }
 0x754   :  { %8085 = vmatprep.subr.mxu1 %v8445_v0  ;;  %8172 = vmatprep.subr.mxu0 %v8445_v0 }
 0x755   :  { %7936 = vmatmul.mubr.msk.f32.gmra.mxu1 %vm2965_vm7, %v10862_v18  ;;  %8173 = vmatpush3.msra.mxu0 %v4344_v48 }
 0x756   :  { %8086 = vmatpush3.msra.mxu1 %v10438_v23  ;;  %8020 = vmatprep.mubr.msk.f32.mxu0 %vm8446_vm4, %v8445_v0  ;;  %v11017_v23 = vld [vmem:[%s11645_s10 + $0x1b0] sm:$0xff] }
 0x757   :  { %8087 = vmatprep.subr.mxu1 %v8445_v0  ;;  %8174 = vmatprep.subr.mxu0 %v8445_v0 }
 0x758   :  { %8021 = vmatmul.mubr.msk.f32.gmra.mxu0 %vm2965_vm7, %v10436_v39  ;;  %8088 = vmatpush3.msra.mxu1 %v10414_v42  ;;  %v10902_v42 = vld [vmem:[%s11645_s10 + $0x170] sm:$0xff]  ;;  %v11004_v39 = vld [vmem:[%s11645_s10 + $0x1a8] sm:$0xff] }
 0x759   :  { %8175 = vmatpush3.msra.mxu0 %v10742_v34  ;;  %7938 = vmatprep.mubr.msk.f32.mxu1 %vm8446_vm4, %v8445_v0 }
 0x75a   :  { %8089 = vmatprep.subr.mxu1 %v8445_v0  ;;  %8176 = vmatprep.subr.mxu0 %v8445_v0 }
 0x75b   :  { %7939 = vmatmul.mubr.msk.f32.gmra.mxu1 %vm2965_vm7, %v10881_v27  ;;  %8177 = vmatpush3.msra.mxu0 %v10762_v17 }
 0x75c   :  { %8090 = vmatpush3.msra.mxu1 %v10389_v58  ;;  %8023 = vmatprep.mubr.msk.f32.mxu0 %vm8446_vm4, %v8445_v0  ;;  %v10991_v58 = vld [vmem:[%s11645_s10 + $0x1a0] sm:$0xff] }
 0x75d   :  { %8091 = vmatprep.subr.mxu1 %v8445_v0  ;;  %8178 = vmatprep.subr.mxu0 %v8445_v0 }
 0x75e   :  { %8024 = vmatmul.mubr.msk.f32.gmra.mxu0 %vm2965_vm7, %v10462_v41  ;;  %8092 = vmatpush3.msra.mxu1 %v10365_v13  ;;  %v10920_v13 = vld [vmem:[%s11645_s10 + $0x178] sm:$0xff] }
 0x75f   :  { %8179 = vmatpush3.msra.mxu0 %v10711_v52  ;;  %7941 = vmatprep.mubr.msk.f32.mxu1 %vm8446_vm4, %v8445_v0  ;;  %v11030_v41 = vld [vmem:[%s11645_s10 + $0x1b8] sm:$0xff] }
 0x760   :  { %8093 = vmatprep.subr.mxu1 %v8445_v0  ;;  %8180 = vmatprep.subr.mxu0 %v8445_v0 }
 0x761   :  { %7942 = vmatmul.mubr.msk.f32.gmra.mxu1 %vm2965_vm7, %v10902_v42  ;;  %8181 = vmatpush3.msra.mxu0 %v10731_v3 }
 0x762   :  { %8094 = vmatpush3.msra.mxu1 %v10356_v15  ;;  %8026 = vmatprep.mubr.msk.f32.mxu0 %vm8446_vm4, %v8445_v0  ;;  %v10937_v15 = vld [vmem:[%s11645_s10 + $0x180] sm:$0xff] }
 0x763   :  { %8095 = vmatprep.subr.mxu1 %v8445_v0  ;;  %8182 = vmatprep.subr.mxu0 %v8445_v0 }
 0x764   :  { %8027 = vmatmul.mubr.msk.f32.gmra.mxu0 %vm2965_vm7, %v10486_v63  ;;  %8096 = vmatpush3.msra.mxu1 %v10346_v22  ;;  %v10965_v22 = vld [vmem:[%s11645_s10 + $0x190] sm:$0xff]  ;;  %v11056_v63 = vld [vmem:[%s11645_s10 + $0x1c8] sm:$0xff] }
 0x765   :  { %8183 = vmatpush3.msra.mxu0 %v10376_v2  ;;  %7944 = vmatprep.mubr.msk.f32.mxu1 %vm8446_vm4, %v8445_v0  ;;  %v10978_v2 = vld [vmem:[%s11645_s10 + $0x198] sm:$0xff] }
 0x766   :  { %8097 = vmatprep.subr.mxu1 %v8445_v0  ;;  %7945 = vmatmul.mubr.msk.f32.gmra.mxu1 %vm2965_vm7, %v10920_v13 }
 0x767   :  { %8098 = vmatpush3.msra.mxu1 %v10336_v21  ;;  %8029 = vmatprep.mubr.msk.f32.mxu0 %vm8446_vm4, %v8445_v0  ;;  %v10952_v21 = vld [vmem:[%s11645_s10 + $0x188] sm:$0xff] }
 0x768   :  { %8030 = vmatmul.mubr.msk.f32.gmra.mxu0 %vm2965_vm7, %v10510_v10  ;;  %7947 = vmatprep.mubr.msk.f32.mxu1 %vm8446_vm4, %v8445_v0  ;;  %v11082_v10 = vld [vmem:[%s11645_s10 + $0x1d8] sm:$0xff] }
 0x769   :  { %8032 = vmatprep.mubr.msk.f32.mxu0 %vm8446_vm4, %v8445_v0 }
 0x76a   :  { %7948 = vmatmul.mubr.msk.f32.gmra.mxu1 %vm2965_vm7, %v10937_v15 }
 0x76b   :  { %7950 = vmatprep.mubr.msk.f32.mxu1 %vm8446_vm4, %v8445_v0 }
 0x76c   :  { %8033 = vmatmul.mubr.msk.f32.gmra.mxu0 %vm2965_vm7, %v10534_v7  ;;  %v11095_v7 = vld [vmem:[%s11645_s10 + $0x1e0] sm:$0xff] }
 0x76d   :  { %8035 = vmatprep.mubr.msk.f32.mxu0 %vm8446_vm4, %v8445_v0 }
 0x76e   :  { %7951 = vmatmul.mubr.msk.f32.gmra.mxu1 %vm2965_vm7, %v10952_v21 }
 0x76f   :  { %7953 = vmatprep.mubr.msk.f32.mxu1 %vm8446_vm4, %v8445_v0 }
 0x770   :  { %8036 = vmatmul.mubr.msk.f32.gmra.mxu0 %vm2965_vm7, %v10556_v26  ;;  %v11121_v26 = vld [vmem:[%s11645_s10 + $0x1f0] sm:$0xff] }
 0x771   :  { %8038 = vmatprep.mubr.msk.f32.mxu0 %vm8446_vm4, %v8445_v0 }
 0x772   :  { %7954 = vmatmul.mubr.msk.f32.gmra.mxu1 %vm2965_vm7, %v10965_v22 }
 0x773   :  { %7956 = vmatprep.mubr.msk.f32.mxu1 %vm8446_vm4, %v8445_v0 }
 0x774   :  { %8039 = vmatmul.mubr.msk.f32.gmra.mxu0 %vm2965_vm7, %v10576_v62 }
 0x775   :  { %8041 = vmatprep.mubr.msk.f32.mxu0 %vm8446_vm4, %v8445_v0 }
 0x776   :  { %7957 = vmatmul.mubr.msk.f32.gmra.mxu1 %vm2965_vm7, %v10978_v2 }
 0x777   :  { %7959 = vmatprep.mubr.msk.f32.mxu1 %vm8446_vm4, %v8445_v0 }
 0x778   :  { %8042 = vmatmul.mubr.msk.f32.gmra.mxu0 %vm2965_vm7, %v10597_v30 }
 0x779   :  { %8044 = vmatprep.mubr.msk.f32.mxu0 %vm8446_vm4, %v8445_v0 }
 0x77a   :  { %7960 = vmatmul.mubr.msk.f32.gmra.mxu1 %vm2965_vm7, %v10991_v58 }
 0x77b   :  { %7962 = vmatprep.mubr.msk.f32.mxu1 %vm8446_vm4, %v8445_v0 }
 0x77c   :  { %8045 = vmatmul.mubr.msk.f32.gmra.mxu0 %vm2965_vm7, %v10619_v31 }
 0x77d   :  { %8047 = vmatprep.mubr.msk.f32.mxu0 %vm8446_vm4, %v8445_v0 }
 0x77e   :  { %7963 = vmatmul.mubr.msk.f32.gmra.mxu1 %vm2965_vm7, %v11004_v39 }
 0x77f   :  { %7965 = vmatprep.mubr.msk.f32.mxu1 %vm8446_vm4, %v8445_v0 }
 0x780   :  { %8048 = vmatmul.mubr.msk.f32.gmra.mxu0 %vm2965_vm7, %v10641_v8 }
 0x781   :  { %8050 = vmatprep.mubr.msk.f32.mxu0 %vm8446_vm4, %v8445_v0 }
 0x782   :  { %7966 = vmatmul.mubr.msk.f32.gmra.mxu1 %vm2965_vm7, %v11017_v23 }
 0x783   :  { %7968 = vmatprep.mubr.msk.f32.mxu1 %vm8446_vm4, %v8445_v0 }
 0x784   :  { %8051 = vmatmul.mubr.msk.f32.gmra.mxu0 %vm2965_vm7, %v10663_v53 }
 0x785   :  { %8053 = vmatprep.mubr.msk.f32.mxu0 %vm8446_vm4, %v8445_v0 }
 0x786   :  { %7969 = vmatmul.mubr.msk.f32.gmra.mxu1 %vm2965_vm7, %v11030_v41 }
 0x787   :  { %7971 = vmatprep.mubr.msk.f32.mxu1 %vm8446_vm4, %v8445_v0 }
 0x788   :  { %8054 = vmatmul.mubr.msk.f32.gmra.mxu0 %vm2965_vm7, %v10682_v14 }
 0x789   :  { %8056 = vmatprep.mubr.msk.f32.mxu0 %vm8446_vm4, %v8445_v0 }
 0x78a   :  { %7972 = vmatmul.mubr.msk.f32.gmra.mxu1 %vm2965_vm7, %v11043_v61 }
 0x78b   :  { %7974 = vmatprep.mubr.msk.f32.mxu1 %vm8446_vm4, %v8445_v0 }
 0x78c   :  { %8057 = vmatmul.mubr.msk.f32.gmra.mxu0 %vm2965_vm7, %v10700_v16 }
 0x78d   :  { %8059 = vmatprep.mubr.msk.f32.mxu0 %vm8446_vm4, %v8445_v0 }
 0x78e   :  { %7975 = vmatmul.mubr.msk.f32.gmra.mxu1 %vm2965_vm7, %v11056_v63 }
 0x78f   :  { %7977 = vmatprep.mubr.msk.f32.mxu1 %vm8446_vm4, %v8445_v0 }
 0x790   :  { %8060 = vmatmul.mubr.msk.f32.gmra.mxu0 %vm2965_vm7, %v10720_v56 }
 0x791   :  { %8062 = vmatprep.mubr.msk.f32.mxu0 %vm8446_vm4, %v8445_v0 }
 0x792   :  { %7978 = vmatmul.mubr.msk.f32.gmra.mxu1 %vm2965_vm7, %v11069_v6 }
 0x793   :  { %7980 = vmatprep.mubr.msk.f32.mxu1 %vm8446_vm4, %v8445_v0 }
 0x794   :  { %8063 = vmatmul.mubr.msk.f32.gmra.mxu0 %vm2965_vm7, %v10740_v25 }
 0x795   :  { %8065 = vmatprep.mubr.msk.f32.mxu0 %vm8446_vm4, %v8445_v0 }
 0x796   :  { %7981 = vmatmul.mubr.msk.f32.gmra.mxu1 %vm2965_vm7, %v11082_v10 }
 0x797   :  { %7983 = vmatprep.mubr.msk.f32.mxu1 %vm8446_vm4, %v8445_v0 }
 0x798   :  { %8066 = vmatmul.mubr.msk.f32.gmra.mxu0 %vm2965_vm7, %v10760_v60 }
 0x799   :  { %8068 = vmatprep.mubr.msk.f32.mxu0 %vm8446_vm4, %v8445_v0 }
 0x79a   :  { %7984 = vmatmul.mubr.msk.f32.gmra.mxu1 %vm2965_vm7, %v11095_v7 }
 0x79b   :  { %7986 = vmatprep.mubr.msk.f32.mxu1 %vm8446_vm4, %v8445_v0 }
 0x79c   :  { %8069 = vmatmul.mubr.msk.f32.gmra.mxu0 %vm2965_vm7, %v10780_v44 }
 0x79d   :  { %8071 = vmatprep.mubr.msk.f32.mxu0 %vm8446_vm4, %v8445_v0 }
 0x79e   :  { %7987 = vmatmul.mubr.msk.f32.gmra.mxu1 %vm2965_vm7, %v11108_v40 }
 0x79f   :  { %7989 = vmatprep.mubr.msk.f32.mxu1 %vm8446_vm4, %v8445_v0 }
 0x7a0   :  { %8072 = vmatmul.mubr.msk.f32.gmra.mxu0 %vm2965_vm7, %v10798_v20 }
 0x7a1   :  { %8074 = vmatprep.mubr.msk.f32.mxu0 %vm8446_vm4, %v8445_v0 }
 0x7a2   :  { %7990 = vmatmul.mubr.msk.f32.gmra.mxu1 %vm2965_vm7, %v11121_v26 }
 0x7a3   :  { %8099 = vmatprep.mubr.msk.f32.mxu1 %vm8446_vm4, %v8445_v0 }
 0x7a4   :  { %8075 = vmatmul.mubr.msk.f32.gmra.mxu0 %vm2965_vm7, %v10816_v37 }
 0x7a5   :  { %8184 = vmatprep.mubr.msk.f32.mxu0 %vm8446_vm4, %v8445_v0 }
 0x7a6   :  { %8100 = vmatmul.mubr.msk.f32.vlgmr.msra.gmra.mxu1 %vm2965_vm7, %v10374_v43 }
 0x7a7   :  { %8102 = vmatprep.mubr.msk.f32.mxu1 %vm8446_vm4, %v8445_v0 }
 0x7a8   :  { %8185 = vmatmul.mubr.msk.f32.vlgmr.msra.gmra.mxu0 %vm2965_vm7, %v10829_v32 }
 0x7a9   :  { %8187 = vmatprep.mubr.msk.f32.mxu0 %vm8446_vm4, %v8445_v0 }
 0x7aa   :  { %8103 = vmatmul.mubr.msk.f32.gmra.mxu1 %vm2965_vm7, %v10400_v59 }
 0x7ab   :  { %8105 = vmatprep.mubr.msk.f32.mxu1 %vm8446_vm4, %v8445_v0 }
 0x7ac   :  { %8188 = vmatmul.mubr.msk.f32.gmra.mxu0 %vm2965_vm7, %v10844_v4 }
 0x7ad   :  { %8190 = vmatprep.mubr.msk.f32.mxu0 %vm8446_vm4, %v8445_v0 }
 0x7ae   :  { %8106 = vmatmul.mubr.msk.f32.gmra.mxu1 %vm2965_vm7, %v10424_v57 }
 0x7af   :  { %8108 = vmatprep.mubr.msk.f32.mxu1 %vm8446_vm4, %v8445_v0 }
 0x7b0   :  { %8191 = vmatmul.mubr.msk.f32.gmra.mxu0 %vm2965_vm7, %v10862_v18 }
 0x7b1   :  { %8193 = vmatprep.mubr.msk.f32.mxu0 %vm8446_vm4, %v8445_v0 }
 0x7b2   :  { %8109 = vmatmul.mubr.msk.f32.gmra.mxu1 %vm2965_vm7, %v10449_v55 }
 0x7b3   :  { %8111 = vmatprep.mubr.msk.f32.mxu1 %vm8446_vm4, %v8445_v0 }
 0x7b4   :  { %8194 = vmatmul.mubr.msk.f32.gmra.mxu0 %vm2965_vm7, %v10881_v27  ;;  %v4821_v43 = vpop.f32.mrf.mxu0 }
 0x7b5   :  { %8196 = vmatprep.mubr.msk.f32.mxu0 %vm8446_vm4, %v8445_v0 }
 0x7b6   :  { %8112 = vmatmul.mubr.msk.f32.gmra.mxu1 %vm2965_vm7, %v10475_v36  ;;  %v4588_v59 = vpop.f32.mrf.mxu1  ;;  %v7846_v57 = vpop.f32.mrf.mxu0 }
 0x7b7   :  { %8114 = vmatprep.mubr.msk.f32.mxu1 %vm8446_vm4, %v8445_v0  ;;  %v11171_v62 = vadd.f32 %v4821_v43, %v4588_v59 }
 0x7b8   :  { %8197 = vmatmul.mubr.msk.f32.gmra.mxu0 %vm2965_vm7, %v10902_v42  ;;  %v7761_v55 = vpop.f32.mrf.mxu1  ;;  %v4826_v30 = vpop.f32.mrf.mxu0 }
 0x7b9   :  { %8199 = vmatprep.mubr.msk.f32.mxu0 %vm8446_vm4, %v8445_v0 }
 0x7ba   :  { %8115 = vmatmul.mubr.msk.f32.gmra.mxu1 %vm2965_vm7, %v10499_v38  ;;  %v4593_v31 = vpop.f32.mrf.mxu1  ;;  %v7849_v36 = vpop.f32.mrf.mxu0 }
 0x7bb   :  { %8117 = vmatprep.mubr.msk.f32.mxu1 %vm8446_vm4, %v8445_v0  ;;  %v11181_v8 = vadd.f32 %v4826_v30, %v4593_v31 }
 0x7bc   :  { %8200 = vmatmul.mubr.msk.f32.gmra.mxu0 %vm2965_vm7, %v10920_v13  ;;  %v7764_v53 = vpop.f32.mrf.mxu1  ;;  %v4831_v14 = vpop.f32.mrf.mxu0 }
 0x7bd   :  { %8202 = vmatprep.mubr.msk.f32.mxu0 %vm8446_vm4, %v8445_v0 }
 0x7be   :  { %8118 = vmatmul.mubr.msk.f32.gmra.mxu1 %vm2965_vm7, %v10523_v49  ;;  %v4598_v16 = vpop.f32.mrf.mxu1  ;;  %v7852_v38 = vpop.f32.mrf.mxu0 }
 0x7bf   :  { %8120 = vmatprep.mubr.msk.f32.mxu1 %vm8446_vm4, %v8445_v0  ;;  %v11191_v52 = vadd.f32 %v4831_v14, %v4598_v16 }
 0x7c0   :  { %8203 = vmatmul.mubr.msk.f32.gmra.mxu0 %vm2965_vm7, %v10937_v15  ;;  %v7767_v56 = vpop.f32.mrf.mxu1  ;;  %v4836_v3 = vpop.f32.mrf.mxu0 }
 0x7c1   :  { %8205 = vmatprep.mubr.msk.f32.mxu0 %vm8446_vm4, %v8445_v0 }
 0x7c2   :  { %8121 = vmatmul.mubr.msk.f32.gmra.mxu1 %vm2965_vm7, %v10546_v1  ;;  %v4603_v25 = vpop.f32.mrf.mxu1  ;;  %v7855_v49 = vpop.f32.mrf.mxu0 }
 0x7c3   :  { %8123 = vmatprep.mubr.msk.f32.mxu1 %vm8446_vm4, %v8445_v0  ;;  %v11201_v34 = vadd.f32 %v4836_v3, %v4603_v25 }
 0x7c4   :  { %8206 = vmatmul.mubr.msk.f32.gmra.mxu0 %vm2965_vm7, %v10952_v21  ;;  %v7770_v60 = vpop.f32.mrf.mxu1  ;;  %v4841_v17 = vpop.f32.mrf.mxu0 }
 0x7c5   :  { %8208 = vmatprep.mubr.msk.f32.mxu0 %vm8446_vm4, %v8445_v0 }
 0x7c6   :  { %8124 = vmatmul.mubr.msk.f32.gmra.mxu1 %vm2965_vm7, %v10566_v35  ;;  %v4608_v47 = vpop.f32.mrf.mxu1  ;;  %v7858_v1 = vpop.f32.mrf.mxu0 }
 0x7c7   :  { %8126 = vmatprep.mubr.msk.f32.mxu1 %vm8446_vm4, %v8445_v0  ;;  %v11211_v44 = vadd.f32 %v4841_v17, %v4608_v47  ;;  %v11653_v47 = vld [vmem:[#allocation21_spill] sm:$0xff] }
 0x7c8   :  { %8209 = vmatmul.mubr.msk.f32.gmra.mxu0 %vm2965_vm7, %v10965_v22  ;;  %v7773_v32 = vpop.f32.mrf.mxu1  ;;  %v4846_v48 = vpop.f32.mrf.mxu0 }
 0x7c9   :  { %8211 = vmatprep.mubr.msk.f32.mxu0 %vm8446_vm4, %v8445_v0 }
 0x7ca   :  { %8127 = vmatmul.mubr.msk.f32.gmra.mxu1 %vm2965_vm7, %v10586_v28  ;;  %v4613_v20 = vpop.f32.mrf.mxu1  ;;  %v7861_v35 = vpop.f32.mrf.mxu0 }
 0x7cb   :  { %8129 = vmatprep.mubr.msk.f32.mxu1 %vm8446_vm4, %v8445_v0  ;;  %v11221_v19 = vadd.f32 %v4846_v48, %v4613_v20  ;;  %v11654_v20 = vld [vmem:[#allocation22_spill] sm:$0xff] }
 0x7cc   :  { %8212 = vmatmul.mubr.msk.f32.gmra.mxu0 %vm2965_vm7, %v10978_v2  ;;  %v7776_v54 = vpop.f32.mrf.mxu1  ;;  %v4851_v37 = vpop.f32.mrf.mxu0 }
 0x7cd   :  { %8214 = vmatprep.mubr.msk.f32.mxu0 %vm8446_vm4, %v8445_v0 }
 0x7ce   :  { %8130 = vmatmul.mubr.msk.f32.gmra.mxu1 %vm2965_vm7, %v10608_v33  ;;  %v4618_v5 = vpop.f32.mrf.mxu1  ;;  %v7864_v28 = vpop.f32.mrf.mxu0 }
 0x7cf   :  { %8132 = vmatprep.mubr.msk.f32.mxu1 %vm8446_vm4, %v8445_v0  ;;  %v11231_v11 = vadd.f32 %v4851_v37, %v4618_v5 }
 0x7d0   :  { %8215 = vmatmul.mubr.msk.f32.gmra.mxu0 %vm2965_vm7, %v10991_v58  ;;  %v7779_v4 = vpop.f32.mrf.mxu1  ;;  %v4856_v18 = vpop.f32.mrf.mxu0 }
 0x7d1   :  { %8217 = vmatprep.mubr.msk.f32.mxu0 %vm8446_vm4, %v8445_v0 }
 0x7d2   :  { %8133 = vmatmul.mubr.msk.f32.gmra.mxu1 %vm2965_vm7, %v10630_v9  ;;  %v4623_v27 = vpop.f32.mrf.mxu1  ;;  %v7867_v33 = vpop.f32.mrf.mxu0 }
 0x7d3   :  { %8135 = vmatprep.mubr.msk.f32.mxu1 %vm8446_vm4, %v8445_v0  ;;  %v11241_v42 = vadd.f32 %v4856_v18, %v4623_v27 }
 0x7d4   :  { %8218 = vmatmul.mubr.msk.f32.gmra.mxu0 %vm2965_vm7, %v11004_v39  ;;  %v7782_v13 = vpop.f32.mrf.mxu1  ;;  %v4861_v15 = vpop.f32.mrf.mxu0 }
 0x7d5   :  { %8220 = vmatprep.mubr.msk.f32.mxu0 %vm8446_vm4, %v8445_v0 }
 0x7d6   :  { %8136 = vmatmul.mubr.msk.f32.gmra.mxu1 %vm2965_vm7, %v10652_v24  ;;  %v4628_v21 = vpop.f32.mrf.mxu1  ;;  %v7870_v9 = vpop.f32.mrf.mxu0 }
 0x7d7   :  { %8138 = vmatprep.mubr.msk.f32.mxu1 %vm8446_vm4, %v8445_v0  ;;  %v11251_v22 = vadd.f32 %v4861_v15, %v4628_v21 }
 0x7d8   :  { %8221 = vmatmul.mubr.msk.f32.gmra.mxu0 %vm2965_vm7, %v11017_v23  ;;  %v7785_v2 = vpop.f32.mrf.mxu1  ;;  %v4866_v58 = vpop.f32.mrf.mxu0 }
 0x7d9   :  { %8223 = vmatprep.mubr.msk.f32.mxu0 %vm8446_vm4, %v8445_v0 }
 0x7da   :  { %8139 = vmatmul.mubr.msk.f32.gmra.mxu1 %vm2965_vm7, %v10673_v50  ;;  %v4633_v39 = vpop.f32.mrf.mxu1  ;;  %v7873_v24 = vpop.f32.mrf.mxu0 }
 0x7db   :  { %8141 = vmatprep.mubr.msk.f32.mxu1 %vm8446_vm4, %v8445_v0  ;;  %v11261_v43 = vadd.f32 %v4866_v58, %v4633_v39 }
 0x7dc   :  { %8224 = vmatmul.mubr.msk.f32.gmra.mxu0 %vm2965_vm7, %v11030_v41  ;;  %v7788_v59 = vpop.f32.mrf.mxu1  ;;  %v4871_v23 = vpop.f32.mrf.mxu0 }
 0x7dd   :  { %8226 = vmatprep.mubr.msk.f32.mxu0 %vm8446_vm4, %v8445_v0 }
 0x7de   :  { %8142 = vmatmul.mubr.msk.f32.gmra.mxu1 %vm2965_vm7, %v10691_v29  ;;  %v4638_v57 = vpop.f32.mrf.mxu1  ;;  %v7876_v50 = vpop.f32.mrf.mxu0 }
 0x7df   :  { %8144 = vmatprep.mubr.msk.f32.mxu1 %vm8446_vm4, %v8445_v0  ;;  %v11271_v55 = vadd.f32 %v4871_v23, %v4638_v57 }
 0x7e0   :  { %8227 = vmatmul.mubr.msk.f32.gmra.mxu0 %vm2965_vm7, %v11043_v61  ;;  %v7791_v30 = vpop.f32.mrf.mxu1  ;;  %v4876_v41 = vpop.f32.mrf.mxu0 }
 0x7e1   :  { %8229 = vmatprep.mubr.msk.f32.mxu0 %vm8446_vm4, %v8445_v0 }
 0x7e2   :  { %8145 = vmatmul.mubr.msk.f32.gmra.mxu1 %vm2965_vm7, %v10709_v51  ;;  %v4643_v31 = vpop.f32.mrf.mxu1  ;;  %v7879_v29 = vpop.f32.mrf.mxu0 }
 0x7e3   :  { %8147 = vmatprep.mubr.msk.f32.mxu1 %vm8446_vm4, %v8445_v0  ;;  %v11281_v36 = vadd.f32 %v4876_v41, %v4643_v31  ;;  %v11343_v41 = vld [vmem:[#allocation14] sm:$0xff] }
 0x7e4   :  { %8230 = vmatmul.mubr.msk.f32.gmra.mxu0 %vm2965_vm7, %v11056_v63  ;;  %v7794_v53 = vpop.f32.mrf.mxu1  ;;  %v4881_v61 = vpop.f32.mrf.mxu0 }
 0x7e5   :  { %8232 = vmatprep.mubr.msk.f32.mxu0 %vm8446_vm4, %v8445_v0 }
 0x7e6   :  { %8148 = vmatmul.mubr.msk.f32.gmra.mxu1 %vm2965_vm7, %v10729_v12  ;;  %v4648_v14 = vpop.f32.mrf.mxu1  ;;  %v7882_v51 = vpop.f32.mrf.mxu0 }
 0x7e7   :  { %8150 = vmatprep.mubr.msk.f32.mxu1 %vm8446_vm4, %v8445_v0  ;;  %v11291_v16 = vadd.f32 %v4881_v61, %v4648_v14  ;;  %v11350_v51 = vld [vmem:[#allocation14 + $0x8] sm:$0xff] }
 0x7e8   :  { %8233 = vmatmul.mubr.msk.f32.gmra.mxu0 %vm2965_vm7, %v11069_v6  ;;  %v7797_v38 = vpop.f32.mrf.mxu1  ;;  %v4886_v63 = vpop.f32.mrf.mxu0 }
 0x7e9   :  { %8235 = vmatprep.mubr.msk.f32.mxu0 %vm8446_vm4, %v8445_v0 }
 0x7ea   :  { %8151 = vmatmul.mubr.msk.f32.gmra.mxu1 %vm2965_vm7, %v10751_v45  ;;  %v4653_v56 = vpop.f32.mrf.mxu1  ;;  %v7885_v12 = vpop.f32.mrf.mxu0 }
 0x7eb   :  { %8153 = vmatprep.mubr.msk.f32.mxu1 %vm8446_vm4, %v8445_v0  ;;  %v11301_v3 = vadd.f32 %v4886_v63, %v4653_v56 }
 0x7ec   :  { %8236 = vmatmul.mubr.msk.f32.gmra.mxu0 %vm2965_vm7, %v11082_v10  ;;  %v7800_v25 = vpop.f32.mrf.mxu1  ;;  %v4891_v6 = vpop.f32.mrf.mxu0 }
 0x7ed   :  { %8238 = vmatprep.mubr.msk.f32.mxu0 %vm8446_vm4, %v8445_v0 }
 0x7ee   :  { %8154 = vmatmul.mubr.msk.f32.gmra.mxu1 %vm2965_vm7, %v10771_v46  ;;  %v4658_v49 = vpop.f32.mrf.mxu1  ;;  %v7888_v45 = vpop.f32.mrf.mxu0 }
 0x7ef   :  { %8156 = vmatprep.mubr.msk.f32.mxu1 %vm8446_vm4, %v8445_v0  ;;  %v11311_v60 = vadd.f32 %v4891_v6, %v4658_v49  ;;  %v11359_v6 = vld [vmem:[#allocation14 + $0x10] sm:$0xff] }
 0x7f0   :  { %8239 = vmatmul.mubr.msk.f32.gmra.mxu0 %vm2965_vm7, %v11095_v7  ;;  %v7803_v17 = vpop.f32.mrf.mxu1  ;;  %v4896_v10 = vpop.f32.mrf.mxu0 }
 0x7f1   :  { %8241 = vmatprep.mubr.msk.f32.mxu0 %vm8446_vm4, %v8445_v0 }
 0x7f2   :  { %8157 = vmatmul.mubr.msk.f32.gmra.mxu1 %vm2965_vm7, %v11653_v47  ;;  %v4663_v1 = vpop.f32.mrf.mxu1  ;;  %v7891_v46 = vpop.f32.mrf.mxu0 }
 0x7f3   :  { %8159 = vmatprep.mubr.msk.f32.mxu1 %vm8446_vm4, %v8445_v0  ;;  %v11321_v32 = vadd.f32 %v4896_v10, %v4663_v1  ;;  %v11368_v1 = vld [vmem:[#allocation14 + $0x18] sm:$0xff] }
 0x7f4   :  { %8242 = vmatmul.mubr.msk.f32.gmra.mxu0 %vm2965_vm7, %v11108_v40  ;;  %v7806_v48 = vpop.f32.mrf.mxu1  ;;  %v4901_v7 = vpop.f32.mrf.mxu0 }
 0x7f5   :  { %8244 = vmatprep.mubr.msk.f32.mxu0 %vm8446_vm4, %v8445_v0 }
 0x7f6   :  { %8160 = vmatmul.mubr.msk.f32.gmra.mxu1 %vm2965_vm7, %v11654_v20  ;;  %v4668_v35 = vpop.f32.mrf.mxu1  ;;  %v7894_v54 = vpop.f32.mrf.mxu0 }
 0x7f7   :  { %v11329_v37 = vadd.f32 %v4901_v7, %v4668_v35  ;;  %v11377_v54 = vld [vmem:[#allocation14 + $0x20] sm:$0xff] }
 0x7f8   :  { %8245 = vmatmul.mubr.msk.f32.gmra.mxu0 %vm2965_vm7, %v11121_v26  ;;  %v7809_v5 = vpop.f32.mrf.mxu1  ;;  %v4906_v28 = vpop.f32.mrf.mxu0 }
 0x7fa   :  { %v4673_v4 = vpop.f32.mrf.mxu1  ;;  %v7897_v18 = vpop.f32.mrf.mxu0 }
 0x7fb   :  { %v11333_v40 = vadd.f32 %v4906_v28, %v4673_v4 }
 0x7fc   :  { %v7812_v27 = vpop.f32.mrf.mxu1  ;;  %v4911_v33 = vpop.f32.mrf.mxu0 }
 0x7fe   :  { %v4678_v13 = vpop.f32.mrf.mxu1  ;;  %v7900_v0 = vpop.f32.mrf.mxu0 }
 0x7ff   :  { %v11335_v15 = vadd.f32 %v4911_v33, %v4678_v13 }
 0x800   :  { %v7815_v21 = vpop.f32.mrf.mxu1  ;;  %v4916_v9 = vpop.f32.mrf.mxu0 }
 0x802   :  { %v4683_v2 = vpop.f32.mrf.mxu1  ;;  %v7903_v58 = vpop.f32.mrf.mxu0 }
 0x803   :  { %v11337_v39 = vadd.f32 %v4916_v9, %v4683_v2  ;;  %v11392_v2 = vld [vmem:[#allocation14 + $0x30] sm:$0xff] }
 0x804   :  { %v7818_v24 = vpop.f32.mrf.mxu1  ;;  %v4921_v26 = vpop.f32.mrf.mxu0 }
 0x806   :  { %v4688_v59 = vpop.f32.mrf.mxu1  ;;  %v7906_v23 = vpop.f32.mrf.mxu0 }
 0x807   :  { %v11339_v57 = vadd.f32 %v4921_v26, %v4688_v59 }
 0x808   :  { %v7821_v50 = vpop.f32.mrf.mxu1  ;;  %v11341_v30 = vpop.f32.mrf.mxu0 }
 0x809   :  { %v11401_v50 = vld [vmem:[#allocation14 + $0x38] sm:$0xff] }
 0x80a   :  { %v5054_v31 = vpop.f32.mrf.mxu1  ;;  %v8016_v29 = vpop.f32.mrf.mxu0 }
 0x80b   :  { %v5158_v53 = vadd.f32 %v5054_v31, %v11171_v62 }
 0x80c   :  { %v7931_v61 = vpop.f32.mrf.mxu1 }
 0x80d   :  { %v5179_v14 = vadd.f32 %v5158_v53, %v11343_v41 }
 0x80f   :  { %5200 = vst [vmem:[%s11648_s13] sm:$0xff] %v5179_v14  ;;  %v5059_v38 = vpop.f32.mrf.mxu1 }
 0x810   :  { %v5159_v63 = vadd.f32 %v5059_v38, %v11181_v8  ;;  %v11410_v38 = vld [vmem:[#allocation14 + $0x40] sm:$0xff] }
 0x811   :  { %v7934_v56 = vpop.f32.mrf.mxu1 }
 0x812   :  { %v5180_v12 = vadd.f32 %v5159_v63, %v11350_v51  ;;  %v11354_v25 = vpop.f32.mrf.mxu0 }
 0x814   :  { %5201 = vst [vmem:[%s11648_s13 + $0x8] sm:$0xff] %v5180_v12  ;;  %v8019_v62 = vpop.f32.mrf.mxu0 }
 0x815   :  { %v5064_v49 = vpop.f32.mrf.mxu1 }
 0x816   :  { %v5160_v45 = vadd.f32 %v5064_v49, %v11191_v52 }
 0x817   :  { %v7937_v17 = vpop.f32.mrf.mxu1 }
 0x818   :  { %v5181_v10 = vadd.f32 %v5160_v45, %v11359_v6  ;;  %v11363_v47 = vpop.f32.mrf.mxu0  ;;  %v11419_v45 = vld [vmem:[#allocation14 + $0x48] sm:$0xff] }
 0x81a   :  { %5202 = vst [vmem:[%s11648_s13 + $0x10] sm:$0xff] %v5181_v10  ;;  %v8022_v8 = vpop.f32.mrf.mxu0 }
 0x81b   :  { %v5069_v46 = vpop.f32.mrf.mxu1 }
 0x81c   :  { %v5161_v48 = vadd.f32 %v5069_v46, %v11201_v34  ;;  %v11386_v34 = vld [vmem:[#allocation14 + $0x28] sm:$0xff] }
 0x81d   :  { %v7940_v7 = vpop.f32.mrf.mxu1 }
 0x81e   :  { %v5182_v20 = vadd.f32 %v5161_v48, %v11368_v1  ;;  %v11372_v35 = vpop.f32.mrf.mxu0  ;;  %v11428_v7 = vld [vmem:[#allocation14 + $0x50] sm:$0xff] }
 0x820   :  { %5203 = vst [vmem:[%s11648_s13 + $0x18] sm:$0xff] %v5182_v20  ;;  %v8025_v52 = vpop.f32.mrf.mxu0 }
 0x821   :  { %v5074_v5 = vpop.f32.mrf.mxu1 }
 0x822   :  { %v5162_v28 = vadd.f32 %v5074_v5, %v11211_v44 }
 0x823   :  { %v7943_v4 = vpop.f32.mrf.mxu1 }
 0x824   :  { %v5183_v18 = vadd.f32 %v5162_v28, %v11377_v54  ;;  %v11381_v27 = vpop.f32.mrf.mxu0 }
 0x826   :  { %5204 = vst [vmem:[%s11648_s13 + $0x20] sm:$0xff] %v5183_v18  ;;  %v5079_v33 = vpop.f32.mrf.mxu1  ;;  %v8028_v13 = vpop.f32.mrf.mxu0  ;;  %v11437_v18 = vld [vmem:[#allocation14 + $0x58] sm:$0xff] }
 0x827   :  { %v5163_v0 = vadd.f32 %v5079_v33, %v11221_v19 }
 0x828   :  { %v7946_v21 = vpop.f32.mrf.mxu1  ;;  %v11389_v9 = vpop.f32.mrf.mxu0 }
 0x829   :  { %v5184_v44 = vadd.f32 %v5163_v0, %v11386_v34 }
 0x82a   :  { %v5084_v58 = vpop.f32.mrf.mxu1  ;;  %v8031_v24 = vpop.f32.mrf.mxu0 }
 0x82b   :  { %5205 = vst [vmem:[%s11648_s13 + $0x28] sm:$0xff] %v5184_v44  ;;  %v5164_v26 = vadd.f32 %v5084_v58, %v11231_v11  ;;  %v11446_v58 = vld [vmem:[#allocation14 + $0x60] sm:$0xff] }
 0x82c   :  { %v7949_v59 = vpop.f32.mrf.mxu1  ;;  %v11398_v23 = vpop.f32.mrf.mxu0 }
 0x82d   :  { %v5185_v19 = vadd.f32 %v5164_v26, %v11392_v2 }
 0x82e   :  { %v5089_v31 = vpop.f32.mrf.mxu1  ;;  %v8034_v29 = vpop.f32.mrf.mxu0 }
 0x82f   :  { %5206 = vst [vmem:[%s11648_s13 + $0x30] sm:$0xff] %v5185_v19  ;;  %v5165_v53 = vadd.f32 %v5089_v31, %v11241_v42  ;;  %v11455_v29 = vld [vmem:[#allocation14 + $0x68] sm:$0xff] }
 0x830   :  { %v7952_v61 = vpop.f32.mrf.mxu1  ;;  %v11407_v14 = vpop.f32.mrf.mxu0 }
 0x831   :  { %v5186_v11 = vadd.f32 %v5165_v53, %v11401_v50 }
 0x832   :  { %v5094_v63 = vpop.f32.mrf.mxu1  ;;  %v8037_v56 = vpop.f32.mrf.mxu0 }
 0x833   :  { %5207 = vst [vmem:[%s11648_s13 + $0x38] sm:$0xff] %v5186_v11  ;;  %v5166_v12 = vadd.f32 %v5094_v63, %v11251_v22 }
 0x834   :  { %v7955_v62 = vpop.f32.mrf.mxu1  ;;  %v11416_v49 = vpop.f32.mrf.mxu0 }
 0x835   :  { %v5187_v42 = vadd.f32 %v5166_v12, %v11410_v38  ;;  %v11464_v12 = vld [vmem:[#allocation14 + $0x70] sm:$0xff] }
 0x836   :  { %v5099_v17 = vpop.f32.mrf.mxu1  ;;  %v8040_v10 = vpop.f32.mrf.mxu0 }
 0x837   :  { %5208 = vst [vmem:[%s11648_s13 + $0x40] sm:$0xff] %v5187_v42  ;;  %v5167_v8 = vadd.f32 %v5099_v17, %v11261_v43 }
 0x838   :  { %v7958_v46 = vpop.f32.mrf.mxu1  ;;  %v11425_v48 = vpop.f32.mrf.mxu0 }
 0x839   :  { %v5188_v22 = vadd.f32 %v5167_v8, %v11419_v45  ;;  %v11473_v46 = vld [vmem:[#allocation14 + $0x78] sm:$0xff] }
 0x83a   :  { %v5104_v20 = vpop.f32.mrf.mxu1  ;;  %v8043_v52 = vpop.f32.mrf.mxu0 }
 0x83b   :  { %5209 = vst [vmem:[%s11648_s13 + $0x48] sm:$0xff] %v5188_v22  ;;  %v5168_v5 = vadd.f32 %v5104_v20, %v11271_v55 }
 0x83c   :  { %v7961_v28 = vpop.f32.mrf.mxu1  ;;  %v11434_v4 = vpop.f32.mrf.mxu0 }
 0x83d   :  { %v5189_v43 = vadd.f32 %v5168_v5, %v11428_v7 }
 0x83e   :  { %v5109_v33 = vpop.f32.mrf.mxu1  ;;  %v8046_v13 = vpop.f32.mrf.mxu0 }
 0x83f   :  { %5210 = vst [vmem:[%s11648_s13 + $0x50] sm:$0xff] %v5189_v43  ;;  %v5169_v0 = vadd.f32 %v5109_v33, %v11281_v36  ;;  %v11482_v43 = vld [vmem:[#allocation14 + $0x80] sm:$0xff] }
 0x840   :  { %v7964_v21 = vpop.f32.mrf.mxu1  ;;  %v11443_v44 = vpop.f32.mrf.mxu0 }
 0x841   :  { %v5190_v55 = vadd.f32 %v5169_v0, %v11437_v18 }
 0x842   :  { %v5114_v24 = vpop.f32.mrf.mxu1  ;;  %v8049_v26 = vpop.f32.mrf.mxu0 }
 0x843   :  { %5211 = vst [vmem:[%s11648_s13 + $0x58] sm:$0xff] %v5190_v55  ;;  %v5170_v59 = vadd.f32 %v5114_v24, %v11291_v16  ;;  %v11491_v24 = vld [vmem:[#allocation14 + $0x88] sm:$0xff] }
 0x844   :  { %v7967_v19 = vpop.f32.mrf.mxu1  ;;  %v11452_v31 = vpop.f32.mrf.mxu0 }
 0x845   :  { %v5191_v36 = vadd.f32 %v5170_v59, %v11446_v58 }
 0x846   :  { %v5119_v53 = vpop.f32.mrf.mxu1  ;;  %v8052_v61 = vpop.f32.mrf.mxu0 }
 0x847   :  { %5212 = vst [vmem:[%s11648_s13 + $0x60] sm:$0xff] %v5191_v36  ;;  %v5171_v11 = vadd.f32 %v5119_v53, %v11301_v3  ;;  %v11500_v61 = vld [vmem:[#allocation14 + $0x90] sm:$0xff] }
 0x848   :  { %v7970_v63 = vpop.f32.mrf.mxu1  ;;  %v11461_v56 = vpop.f32.mrf.mxu0 }
 0x849   :  { %v5192_v16 = vadd.f32 %v5171_v11, %v11455_v29 }
 0x84a   :  { %v5124_v62 = vpop.f32.mrf.mxu1  ;;  %v8055_v42 = vpop.f32.mrf.mxu0 }
 0x84b   :  { %5213 = vst [vmem:[%s11648_s13 + $0x68] sm:$0xff] %v5192_v16  ;;  %v5172_v17 = vadd.f32 %v5124_v62, %v11311_v60 }
 0x84c   :  { %v7973_v10 = vpop.f32.mrf.mxu1  ;;  %v11470_v8 = vpop.f32.mrf.mxu0 }
 0x84d   :  { %v5193_v3 = vadd.f32 %v5172_v17, %v11464_v12  ;;  %v11509_v17 = vld [vmem:[#allocation14 + $0x98] sm:$0xff] }
 0x84e   :  { %v5129_v22 = vpop.f32.mrf.mxu1  ;;  %v8058_v20 = vpop.f32.mrf.mxu0 }
 0x84f   :  { %5214 = vst [vmem:[%s11648_s13 + $0x70] sm:$0xff] %v5193_v3  ;;  %v5173_v52 = vadd.f32 %v5129_v22, %v11321_v32 }
 0x850   :  { %v7976_v5 = vpop.f32.mrf.mxu1  ;;  %v11479_v28 = vpop.f32.mrf.mxu0 }
 0x851   :  { %v5194_v60 = vadd.f32 %v5173_v52, %v11473_v46  ;;  %v11518_v5 = vld [vmem:[#allocation14 + $0xa0] sm:$0xff] }
 0x852   :  { %v5134_v33 = vpop.f32.mrf.mxu1  ;;  %v8061_v13 = vpop.f32.mrf.mxu0 }
 0x853   :  { %5215 = vst [vmem:[%s11648_s13 + $0x78] sm:$0xff] %v5194_v60  ;;  %v5174_v0 = vadd.f32 %v5134_v33, %v11329_v37 }
 0x854   :  { %v7979_v21 = vpop.f32.mrf.mxu1  ;;  %v11488_v55 = vpop.f32.mrf.mxu0 }
 0x855   :  { %v5195_v32 = vadd.f32 %v5174_v0, %v11482_v43 }
 0x856   :  { %v5139_v26 = vpop.f32.mrf.mxu1  ;;  %v8064_v59 = vpop.f32.mrf.mxu0 }
 0x857   :  { %5216 = vst [vmem:[%s11648_s13 + $0x80] sm:$0xff] %v5195_v32  ;;  %v5175_v19 = vadd.f32 %v5139_v26, %v11333_v40 }
 0x858   :  { %v7982_v36 = vpop.f32.mrf.mxu1  ;;  %v11497_v53 = vpop.f32.mrf.mxu0 }
 0x859   :  { %v5196_v37 = vadd.f32 %v5175_v19, %v11491_v24 }
 0x85a   :  { %v5144_v11 = vpop.f32.mrf.mxu1  ;;  %v8067_v63 = vpop.f32.mrf.mxu0 }
 0x85b   :  { %5217 = vst [vmem:[%s11648_s13 + $0x88] sm:$0xff] %v5196_v37  ;;  %v5176_v16 = vadd.f32 %v5144_v11, %v11335_v15 }
 0x85c   :  { %v7985_v62 = vpop.f32.mrf.mxu1  ;;  %v11506_v42 = vpop.f32.mrf.mxu0 }
 0x85d   :  { %v5197_v40 = vadd.f32 %v5176_v16, %v11500_v61 }
 0x85e   :  { %v5149_v10 = vpop.f32.mrf.mxu1  ;;  %v8070_v3 = vpop.f32.mrf.mxu0 }
 0x85f   :  { %5218 = vst [vmem:[%s11648_s13 + $0x90] sm:$0xff] %v5197_v40  ;;  %v5177_v22 = vadd.f32 %v5149_v10, %v11337_v39 }
 0x860   :  { %v7988_v20 = vpop.f32.mrf.mxu1  ;;  %v11515_v52 = vpop.f32.mrf.mxu0 }
 0x861   :  { %v5198_v15 = vadd.f32 %v5177_v22, %v11509_v17 }
 0x862   :  { %v5154_v60 = vpop.f32.mrf.mxu1  ;;  %v8073_v33 = vpop.f32.mrf.mxu0 }
 0x863   :  { %5219 = vst [vmem:[%s11648_s13 + $0x98] sm:$0xff] %v5198_v15  ;;  %v5178_v13 = vadd.f32 %v5154_v60, %v11339_v57 }
 0x864   :  { %v7991_v0 = vpop.f32.mrf.mxu1  ;;  %v11524_v21 = vpop.f32.mrf.mxu0 }
 0x865   :  { %v5199_v39 = vadd.f32 %v5178_v13, %v11518_v5 }
 0x866   :  { %v8076_v32 = vpop.f32.mrf.mxu0  ;;  %v5457_v26 = vpop.f32.mrf.mxu1 }
 0x867   :  { %5220 = vst [vmem:[%s11648_s13 + $0xa0] sm:$0xff] %v5199_v39  ;;  %v5458_v59 = vadd.f32 %v5457_v26, %v11341_v30 }
 0x868   :  { %v8101_v19 = vpop.f32.mrf.mxu1  ;;  %v5627_v36 = vpop.f32.mrf.mxu0 }
 0x869   :  { %v5731_v37 = vadd.f32 %v5627_v36, %v5458_v59 }
 0x86a   :  { %v5462_v11 = vpop.f32.mrf.mxu1  ;;  %v8186_v63 = vpop.f32.mrf.mxu0 }
 0x86b   :  { %v5752_v57 = vadd.f32 %v5731_v37, %v11343_v41  ;;  %v5463_v16 = vadd.f32 %v5462_v11, %v11354_v25 }
 0x86c   :  { %v8104_v62 = vpop.f32.mrf.mxu1  ;;  %v5632_v40 = vpop.f32.mrf.mxu0 }
 0x86d   :  { %5773 = vst [vmem:[%s11648_s13 + $0xa8] sm:$0xff] %v5752_v57  ;;  %v5732_v10 = vadd.f32 %v5632_v40, %v5463_v16 }
 0x86e   :  { %v5467_v3 = vpop.f32.mrf.mxu1  ;;  %v8189_v22 = vpop.f32.mrf.mxu0 }
 0x86f   :  { %v5753_v30 = vadd.f32 %v5732_v10, %v11350_v51  ;;  %v5468_v20 = vadd.f32 %v5467_v3, %v11363_v47 }
 0x870   :  { %v8107_v15 = vpop.f32.mrf.mxu1  ;;  %v5637_v60 = vpop.f32.mrf.mxu0 }
 0x871   :  { %5774 = vst [vmem:[%s11648_s13 + $0xb0] sm:$0xff] %v5753_v30  ;;  %v5733_v41 = vadd.f32 %v5637_v60, %v5468_v20 }
 0x872   :  { %v5472_v25 = vpop.f32.mrf.mxu1  ;;  %v8192_v33 = vpop.f32.mrf.mxu0 }
 0x873   :  { %v5754_v13 = vadd.f32 %v5733_v41, %v11359_v6  ;;  %v5473_v0 = vadd.f32 %v5472_v25, %v11372_v35 }
 0x874   :  { %v8110_v39 = vpop.f32.mrf.mxu1  ;;  %v5642_v32 = vpop.f32.mrf.mxu0 }
 0x875   :  { %5775 = vst [vmem:[%s11648_s13 + $0xb8] sm:$0xff] %v5754_v13  ;;  %v5734_v51 = vadd.f32 %v5642_v32, %v5473_v0 }
 0x876   :  { %v5477_v47 = vpop.f32.mrf.mxu1  ;;  %v8195_v26 = vpop.f32.mrf.mxu0 }
 0x877   :  { %v5755_v59 = vadd.f32 %v5734_v51, %v11368_v1  ;;  %v5478_v19 = vadd.f32 %v5477_v47, %v11381_v27 }
 0x878   :  { %v8113_v36 = vpop.f32.mrf.mxu1  ;;  %v5647_v37 = vpop.f32.mrf.mxu0 }
 0x879   :  { %5776 = vst [vmem:[%s11648_s13 + $0xc0] sm:$0xff] %v5755_v59  ;;  %v5735_v6 = vadd.f32 %v5647_v37, %v5478_v19 }
 0x87a   :  { %v5482_v35 = vpop.f32.mrf.mxu1  ;;  %v8198_v11 = vpop.f32.mrf.mxu0 }
 0x87b   :  { %v5756_v63 = vadd.f32 %v5735_v6, %v11377_v54  ;;  %v5483_v57 = vadd.f32 %v5482_v35, %v11389_v9 }
 0x87c   :  { %v8116_v16 = vpop.f32.mrf.mxu1  ;;  %v5652_v62 = vpop.f32.mrf.mxu0 }
 0x87d   :  { %5777 = vst [vmem:[%s11648_s13 + $0xc8] sm:$0xff] %v5756_v63  ;;  %v5736_v1 = vadd.f32 %v5652_v62, %v5483_v57 }
 0x87e   :  { %v5487_v27 = vpop.f32.mrf.mxu1  ;;  %v8201_v40 = vpop.f32.mrf.mxu0 }
 0x87f   :  { %v5757_v10 = vadd.f32 %v5736_v1, %v11386_v34  ;;  %v5488_v3 = vadd.f32 %v5487_v27, %v11398_v23 }
 0x880   :  { %v8119_v22 = vpop.f32.mrf.mxu1  ;;  %v5657_v30 = vpop.f32.mrf.mxu0 }
 0x881   :  { %5778 = vst [vmem:[%s11648_s13 + $0xd0] sm:$0xff] %v5757_v10  ;;  %v5737_v54 = vadd.f32 %v5657_v30, %v5488_v3 }
 0x882   :  { %v5492_v9 = vpop.f32.mrf.mxu1  ;;  %v8204_v20 = vpop.f32.mrf.mxu0 }
 0x883   :  { %v5758_v15 = vadd.f32 %v5737_v54, %v11392_v2  ;;  %v5493_v60 = vadd.f32 %v5492_v9, %v11407_v14 }
 0x884   :  { %v8122_v41 = vpop.f32.mrf.mxu1  ;;  %v5662_v25 = vpop.f32.mrf.mxu0 }
 0x885   :  { %5779 = vst [vmem:[%s11648_s13 + $0xd8] sm:$0xff] %v5758_v15  ;;  %v5738_v34 = vadd.f32 %v5662_v25, %v5493_v60 }
 0x886   :  { %v5497_v23 = vpop.f32.mrf.mxu1  ;;  %v8207_v33 = vpop.f32.mrf.mxu0 }
 0x887   :  { %v5759_v13 = vadd.f32 %v5738_v34, %v11401_v50  ;;  %v5498_v0 = vadd.f32 %v5497_v23, %v11416_v49 }
 0x888   :  { %v8125_v39 = vpop.f32.mrf.mxu1  ;;  %v5667_v32 = vpop.f32.mrf.mxu0 }
 0x889   :  { %5780 = vst [vmem:[%s11648_s13 + $0xe0] sm:$0xff] %v5759_v13  ;;  %v5739_v2 = vadd.f32 %v5667_v32, %v5498_v0 }
 0x88a   :  { %v5502_v14 = vpop.f32.mrf.mxu1  ;;  %v8210_v51 = vpop.f32.mrf.mxu0 }
 0x88b   :  { %v5760_v47 = vadd.f32 %v5739_v2, %v11410_v38  ;;  %v5503_v26 = vadd.f32 %v5502_v14, %v11425_v48 }
 0x88c   :  { %v8128_v59 = vpop.f32.mrf.mxu1  ;;  %v5672_v19 = vpop.f32.mrf.mxu0 }
 0x88d   :  { %5781 = vst [vmem:[%s11648_s13 + $0xe8] sm:$0xff] %v5760_v47  ;;  %v5740_v50 = vadd.f32 %v5672_v19, %v5503_v26 }
 0x88e   :  { %v5507_v49 = vpop.f32.mrf.mxu1  ;;  %v8213_v36 = vpop.f32.mrf.mxu0 }
 0x88f   :  { %v5761_v37 = vadd.f32 %v5740_v50, %v11419_v45  ;;  %v5508_v6 = vadd.f32 %v5507_v49, %v11434_v4 }
 0x890   :  { %v8131_v35 = vpop.f32.mrf.mxu1  ;;  %v5677_v11 = vpop.f32.mrf.mxu0 }
 0x891   :  { %5782 = vst [vmem:[%s11648_s13 + $0xf0] sm:$0xff] %v5761_v37  ;;  %v5741_v38 = vadd.f32 %v5677_v11, %v5508_v6 }
 0x892   :  { %v5512_v48 = vpop.f32.mrf.mxu1  ;;  %v8216_v63 = vpop.f32.mrf.mxu0 }
 0x893   :  { %v5762_v57 = vadd.f32 %v5741_v38, %v11428_v7  ;;  %v5513_v16 = vadd.f32 %v5512_v48, %v11443_v44 }
 0x894   :  { %v8134_v62 = vpop.f32.mrf.mxu1  ;;  %v5682_v1 = vpop.f32.mrf.mxu0 }
 0x895   :  { %5783 = vst [vmem:[%s11648_s13 + $0xf8] sm:$0xff] %v5762_v57  ;;  %v5742_v45 = vadd.f32 %v5682_v1, %v5513_v16 }
 0x896   :  { %v5517_v4 = vpop.f32.mrf.mxu1  ;;  %v8219_v27 = vpop.f32.mrf.mxu0 }
 0x897   :  { %v5763_v40 = vadd.f32 %v5742_v45, %v11437_v18  ;;  %v5518_v10 = vadd.f32 %v5517_v4, %v11452_v31 }
 0x898   :  { %v8137_v3 = vpop.f32.mrf.mxu1  ;;  %v5687_v22 = vpop.f32.mrf.mxu0 }
 0x899   :  { %5784 = vst [vmem:[%s11648_s13 + $0x100] sm:$0xff] %v5763_v40  ;;  %v5743_v7 = vadd.f32 %v5687_v22, %v5518_v10 }
 0x89a   :  { %v5522_v44 = vpop.f32.mrf.mxu1  ;;  %v8222_v30 = vpop.f32.mrf.mxu0 }
 0x89b   :  { %v5764_v54 = vadd.f32 %v5743_v7, %v11446_v58  ;;  %v5523_v9 = vadd.f32 %v5522_v44, %v11461_v56 }
 0x89c   :  { %v8140_v20 = vpop.f32.mrf.mxu1  ;;  %v5692_v15 = vpop.f32.mrf.mxu0 }
 0x89d   :  { %5785 = vst [vmem:[%s11648_s13 + $0x108] sm:$0xff] %v5764_v54  ;;  %v5744_v18 = vadd.f32 %v5692_v15, %v5523_v9 }
 0x89e   :  { %v5527_v31 = vpop.f32.mrf.mxu1  ;;  %v8225_v60 = vpop.f32.mrf.mxu0 }
 0x89f   :  { %v5765_v41 = vadd.f32 %v5744_v18, %v11455_v29  ;;  %v5528_v25 = vadd.f32 %v5527_v31, %v11470_v8 }
 0x8a0   :  { %v8143_v34 = vpop.f32.mrf.mxu1  ;;  %v5697_v23 = vpop.f32.mrf.mxu0 }
 0x8a1   :  { %5786 = vst [vmem:[%s11648_s13 + $0x110] sm:$0xff] %v5765_v41  ;;  %v5745_v58 = vadd.f32 %v5697_v23, %v5528_v25 }
 0x8a2   :  { %v5532_v56 = vpop.f32.mrf.mxu1  ;;  %v8228_v33 = vpop.f32.mrf.mxu0 }
 0x8a3   :  { %v5766_v13 = vadd.f32 %v5745_v58, %v11464_v12  ;;  %v5533_v0 = vadd.f32 %v5532_v56, %v11479_v28 }
 0x8a4   :  { %v8146_v39 = vpop.f32.mrf.mxu1  ;;  %v5702_v32 = vpop.f32.mrf.mxu0 }
 0x8a5   :  { %5787 = vst [vmem:[%s11648_s13 + $0x118] sm:$0xff] %v5766_v13  ;;  %v5746_v29 = vadd.f32 %v5702_v32, %v5533_v0 }
 0x8a6   :  { %v5537_v8 = vpop.f32.mrf.mxu1  ;;  %v8231_v2 = vpop.f32.mrf.mxu0 }
 0x8a7   :  { %v5767_v14 = vadd.f32 %v5746_v29, %v11473_v46  ;;  %v5538_v51 = vadd.f32 %v5537_v8, %v11488_v55 }
 0x8a8   :  { %v8149_v47 = vpop.f32.mrf.mxu1  ;;  %v5707_v26 = vpop.f32.mrf.mxu0 }
 0x8a9   :  { %5788 = vst [vmem:[%s11648_s13 + $0x120] sm:$0xff] %v5767_v14  ;;  %v5747_v12 = vadd.f32 %v5707_v26, %v5538_v51 }
 0x8aa   :  { %v5542_v28 = vpop.f32.mrf.mxu1  ;;  %v8234_v59 = vpop.f32.mrf.mxu0 }
 0x8ab   :  { %v5768_v19 = vadd.f32 %v5747_v12, %v11482_v43  ;;  %v5543_v50 = vadd.f32 %v5542_v28, %v11497_v53 }
 0x8ac   :  { %v8152_v49 = vpop.f32.mrf.mxu1  ;;  %v5712_v36 = vpop.f32.mrf.mxu0 }
 0x8ad   :  { %5789 = vst [vmem:[%s11648_s13 + $0x128] sm:$0xff] %v5768_v19  ;;  %v5748_v46 = vadd.f32 %v5712_v36, %v5543_v50 }
 0x8ae   :  { %v5547_v55 = vpop.f32.mrf.mxu1  ;;  %v8237_v37 = vpop.f32.mrf.mxu0 }
 0x8af   :  { %v5769_v6 = vadd.f32 %v5748_v46, %v11491_v24  ;;  %v5548_v35 = vadd.f32 %v5547_v55, %v11506_v42 }
 0x8b0   :  { %v8155_v11 = vpop.f32.mrf.mxu1  ;;  %v5717_v38 = vpop.f32.mrf.mxu0 }
 0x8b1   :  { %5790 = vst [vmem:[%s11648_s13 + $0x130] sm:$0xff] %v5769_v6  ;;  %v5749_v43 = vadd.f32 %v5717_v38, %v5548_v35 }
 0x8b2   :  { %v5552_v53 = vpop.f32.mrf.mxu1  ;;  %v8240_v48 = vpop.f32.mrf.mxu0 }
 0x8b3   :  { %v5770_v63 = vadd.f32 %v5749_v43, %v11500_v61  ;;  %v5553_v57 = vadd.f32 %v5552_v53, %v11515_v52 }
 0x8b4   :  { %v8158_v16 = vpop.f32.mrf.mxu1  ;;  %v5722_v62 = vpop.f32.mrf.mxu0 }
 0x8b5   :  { %5791 = vst [vmem:[%s11648_s13 + $0x138] sm:$0xff] %v5770_v63  ;;  %v5750_v24 = vadd.f32 %v5722_v62, %v5553_v57 }
 0x8b6   :  { %v5557_v42 = vpop.f32.mrf.mxu1  ;;  %v8243_v1 = vpop.f32.mrf.mxu0 }
 0x8b7   :  { %v5771_v45 = vadd.f32 %v5750_v24, %v11509_v17  ;;  %v5558_v4 = vadd.f32 %v5557_v42, %v11524_v21 }
 0x8b8   :  { %v5727_v27 = vpop.f32.mrf.mxu0  ;;  %v8161_v40 = vpop.f32.mrf.mxu1 }
 0x8b9   :  { %5792 = vst [vmem:[%s11648_s13 + $0x140] sm:$0xff] %v5771_v45  ;;  %v5751_v61 = vadd.f32 %v5727_v27, %v5558_v4 }
 0x8ba   :  { %v8246_v52 = vpop.f32.mrf.mxu0 }
 0x8bb   :  { %v5772_v10 = vadd.f32 %v5751_v61, %v11518_v5 }
 0x8bd   :  { %5793 = vst [vmem:[%s11648_s13 + $0x148] sm:$0xff] %v5772_v10 }
 0x8be   :  { %5798 = vsyncpa [#allocation4], 1 }
 0x8bf   :  { %5799 = vsyncpa [#allocation6], 1 }
 0x8c0   :  { %5800 = vsyncpa [#allocation9], 1 }
 0x8c1   :  { %5801 = vsyncpa [#allocation12], 1 }
 0x8c2   :  { %5802 = vsyncpa [#allocation15], 1 }

</bundles_post_ra>
